<compile_context>
chip_gen: v6e
topology: v6e:2x2x1
jax: 0.10.0
libtpu: 0.0.40
codegen_flags: <defaults>
</compile_context>

<pallas_src>
import math
from functools import partial

import numpy as np
import jax
import jax.numpy as jnp
from jax import lax
from jax.experimental import pallas as pl
from jax.experimental.pallas import tpu as pltpu

BN_EPS = 1e-5


def _cdiv(a, b):
    return -(-a // b)


def _tap_dtype_for_device():
    """bf16 depthwise taps on chips with a native bf16 VPU (v6e/v7x); f32 otherwise."""
    try:
        kind = jax.devices()[0].device_kind.lower()
    except Exception:
        return jnp.float32
    if any(tag in kind for tag in ("v2", "v3", "v4", "v5")):
        return jnp.float32
    return jnp.bfloat16


def _pick_row_tile(Ho, Wo, n_batch, target_m=512):
    """Pick TH so the pointwise matmul M = TH*Wo lands in ~256-1024."""
    th = max(1, min(Ho, max(1, target_m // max(Wo, 1))))
    if th >= 8:
        th = (th // 8) * 8            # sublane-friendly M
    th = min(th, Ho)
    # Keep at least 2 grid steps so the "parallel" axes give both v7x cores work.
    while th > 1 and n_batch * _cdiv(Ho, th) < 2:
        th = _cdiv(th, 2)
    return th


def _dsconv_kernel(xwin_ref, dw_ref, pw_ref, b1_ref, b2_ref, o_ref, *,
                   identity, row_off, col_off, tap_dtype):
    # xwin_ref : (span, Wp, Cp)   bf16 halo row window (cols/rows deinterleaved for stride=2)
    # dw_ref   : (3, 3, Cp)       depthwise 3x3 weights, BN1 scale folded in (tap_dtype)
    # pw_ref   : (Cp, Cop)        pointwise weights, BN2 scale folded in (bf16)
    # b1_ref   : (1, Cp)          BN1 folded bias (f32)
    # b2_ref   : (1, Cop)         BN2 folded bias (f32)
    # o_ref    : (TH, Wo, Cop)    one output-row tile
    TH, Wo, Cop = o_ref.shape
    Cp = xwin_ref.shape[-1]

    xwin = xwin_ref[...]                       # bf16
    x_taps = xwin.astype(tap_dtype)
    dw = dw_ref[...]                           # (3, 3, Cp) tap_dtype

    # Three kw-shifted column views built once (3 sublane shifts instead of 9);
    # every per-tap slice below is a leading-dim (free) slice.
    cols = [lax.slice_in_dim(x_taps, c0, c0 + Wo, axis=1) for c0 in col_off]

    # --- depthwise 3x3 conv (BN1 scale pre-folded); first-tap accumulator init ---
    acc = cols[0][row_off[0]:row_off[0] + TH] * dw[0, 0]
    for kh in range(3):
        for kw in range(3):
            if kh == 0 and kw == 0:
                continue
            acc = acc + cols[kw][row_off[kh]:row_off[kh] + TH] * dw[kh, kw]

    # --- BN1 bias + ReLU6 (f32) ---
    y = jnp.clip(acc.astype(jnp.float32) + b1_ref[0], 0.0, 6.0)

    # --- pointwise 1x1 conv == matmul on the MXU (bf16 operands, f32 accumulate) ---
    y2 = jnp.dot(y.reshape(TH * Wo, Cp).astype(jnp.bfloat16), pw_ref[...],
                 preferred_element_type=jnp.float32)             # (TH*Wo, Cop)

    # --- BN2 bias ---
    y2 = (y2 + b2_ref[0]).reshape(TH, Wo, Cop)

    # --- residual from the centre of the resident halo window (stride=1 only) ---
    if identity:
        y2 = y2 + xwin[1:TH + 1, 1:Wo + 1, :].astype(jnp.float32)

    o_ref[...] = y2.astype(o_ref.dtype)


def depthwise_separable_conv(x_nchw, params, stride, target_m=512):
    """Forward of DepthwiseSeparableConv (eval-mode BN). x_nchw: (N, C, H, W)."""
    dw_w, pw_w, (g1, bt1, m1, v1), (g2, bt2, m2, v2) = params
    N, C, H, W = x_nchw.shape
    Cout = pw_w.shape[0]
    identity = (C == Cout) and (stride == 1)

    Ho = (H + 2 - 3) // stride + 1
    Wo = (W + 2 - 3) // stride + 1
    Wp = W + 2

    # Lane-dense channel padding (multiples of 128).
    Cp = _cdiv(C, 128) * 128
    Cop = _cdiv(Cout, 128) * 128

    tap_dtype = _tap_dtype_for_device()

    # Output-row tiling: TH*Wo ~ 256-1024, grid R = cdiv(Ho, TH), output padded to R*TH.
    TH = _pick_row_tile(Ho, Wo, N, target_m)
    R = _cdiv(Ho, TH)
    Ho_pad = R * TH
    span = (TH - 1) * stride + 3                 # padded input rows per tile (incl. halo)
    Hp_pad = (Ho_pad - 1) * stride + 3           # total padded input rows needed

    # ---- fold eval-mode BatchNorm: scales into the conv weights, biases kept ----
    s1 = g1 / jnp.sqrt(v1 + BN_EPS)
    b1 = bt1 - m1 * s1
    s2 = g2 / jnp.sqrt(v2 + BN_EPS)
    b2 = bt2 - m2 * s2

    dw_hwc = jnp.transpose(dw_w[:, 0, :, :], (1, 2, 0)) * s1[None, None, :]   # (3,3,C)
    dw_hwc = jnp.pad(dw_hwc, ((0, 0), (0, 0), (0, Cp - C))).astype(tap_dtype)
    pw_cc = jnp.transpose(pw_w[:, :, 0, 0], (1, 0)) * s2[None, :]             # (C,Cout)
    pw_cc = jnp.pad(pw_cc, ((0, Cp - C), (0, Cop - Cout))).astype(jnp.bfloat16)
    b1p = jnp.pad(b1, (0, Cp - C)).reshape(1, Cp).astype(jnp.float32)
    b2p = jnp.pad(b2, (0, Cop - Cout)).reshape(1, Cop).astype(jnp.float32)

    # ---- stage the input as bf16 halo row-tiles (no full-image VMEM residency) ----
    x_nhwc = jnp.transpose(x_nchw, (0, 2, 3, 1))
    x_pad = jnp.pad(
        x_nhwc, ((0, 0), (1, Hp_pad - H - 1), (1, 1), (0, Cp - C))
    ).astype(jnp.bfloat16)                                       # (N, Hp_pad, Wp, Cp)

    if stride == 1:
        x_cols = x_pad
        col_off = (0, 1, 2)
        row_off = (0, 1, 2)
        row_order = np.arange(span)
    else:  # stride == 2: even/odd deinterleave -> every tap is a contiguous slice
        We = (Wp + 1) // 2
        col_order = np.concatenate([np.arange(0, Wp, 2), np.arange(1, Wp, 2)])
        x_cols = x_pad[:, :, col_order, :]
        col_off = (0, We, 1)
        row_order = np.concatenate([np.arange(0, span, 2), np.arange(1, span, 2)])
        row_off = (0, TH + 1, 1)

    if R == 1 and stride == 1:
        x_tiles = x_cols[:, None]                                # (N, 1, span, Wp, Cp)
    else:
        base = (np.arange(R) * TH * stride)[:, None]             # (R, 1)
        x_tiles = x_cols[:, base + row_order[None, :]]           # (N, R, span, Wp, Cp)

    # ---- explicit VMEM budget (>= 32 MiB, capped at 56 MiB: safe on v7x) ----
    out_itemsize = jnp.dtype(x_nchw.dtype).itemsize
    in_tile_b = span * Wp * Cp * 2
    out_tile_b = TH * Wo * Cop * out_itemsize
    w_b = 9 * Cp * jnp.dtype(tap_dtype).itemsize + Cp * Cop * 2 + (Cp + Cop) * 4
    tmp_b = 8 * TH * Wo * max(Cp, Cop) * 4
    est = 2 * (in_tile_b + out_tile_b + w_b) + tmp_b + (2 << 20)
    vmem_limit = int(min(max(est, 32 << 20), 56 << 20))

    out_pad = pl.pallas_call(
        partial(_dsconv_kernel, identity=identity, row_off=row_off,
                col_off=col_off, tap_dtype=tap_dtype),
        out_shape=jax.ShapeDtypeStruct((N, Ho_pad, Wo, Cop), x_nchw.dtype),
        grid=(N, R),
        in_specs=[
            pl.BlockSpec((None, None, span, Wp, Cp), lambda n, r: (n, r, 0, 0, 0)),
            pl.BlockSpec((3, 3, Cp), lambda n, r: (0, 0, 0)),     # dw weights
            pl.BlockSpec((Cp, Cop), lambda n, r: (0, 0)),         # pw weights (bf16)
            pl.BlockSpec((1, Cp), lambda n, r: (0, 0)),           # b1
            pl.BlockSpec((1, Cop), lambda n, r: (0, 0)),          # b2
        ],
        out_specs=pl.BlockSpec((None, TH, Wo, Cop), lambda n, r: (n, r, 0, 0)),
        compiler_params=pltpu.CompilerParams(
            dimension_semantics=("parallel", "parallel"),
            vmem_limit_bytes=vmem_limit),
    )(x_tiles, dw_hwc, pw_cc, b1p, b2p)

    # Strip row/channel padding, NHWC -> NCHW.
    out = out_pad[:, :Ho, :, :Cout]
    return jnp.transpose(out, (0, 3, 1, 2))


def ref_forward(x_nchw, params, stride):
    """Pure-JAX reference (NCHW, mirrors the PyTorch forward, eval-mode BN)."""
    dw_w, pw_w, (g1, bt1, m1, v1), (g2, bt2, m2, v2) = params
    C = x_nchw.shape[1]
    Cout = pw_w.shape[0]
    identity = (C == Cout) and (stride == 1)

    y = lax.conv_general_dilated(
        x_nchw, dw_w, (stride, stride), ((1, 1), (1, 1)),
        feature_group_count=C,
        dimension_numbers=("NCHW", "OIHW", "NCHW"))
    y = (y - m1[None, :, None, None]) / jnp.sqrt(v1 + BN_EPS)[None, :, None, None] \
        * g1[None, :, None, None] + bt1[None, :, None, None]
    y = jnp.clip(y, 0.0, 6.0)
    y = lax.conv_general_dilated(
        y, pw_w, (1, 1), ((0, 0), (0, 0)),
        dimension_numbers=("NCHW", "OIHW", "NCHW"))
    y = (y - m2[None, :, None, None]) / jnp.sqrt(v2 + BN_EPS)[None, :, None, None] \
        * g2[None, :, None, None] + bt2[None, :, None, None]
    return x_nchw + y if identity else y


def make_params(key, in_dim, out_dim):
    ks = jax.random.split(key, 10)
    dw_w = jax.random.normal(ks[0], (in_dim, 1, 3, 3), jnp.float32) * 0.2
    pw_w = jax.random.normal(ks[1], (out_dim, in_dim, 1, 1), jnp.float32) * 0.2
    bn1 = (jax.random.uniform(ks[2], (in_dim,), jnp.float32, 0.5, 1.5),   # gamma
           jax.random.normal(ks[3], (in_dim,), jnp.float32) * 0.1,        # beta
           jax.random.normal(ks[4], (in_dim,), jnp.float32) * 0.1,        # running mean
           jax.random.uniform(ks[5], (in_dim,), jnp.float32, 0.5, 1.5))   # running var
    bn2 = (jax.random.uniform(ks[6], (out_dim,), jnp.float32, 0.5, 1.5),
           jax.random.normal(ks[7], (out_dim,), jnp.float32) * 0.1,
           jax.random.normal(ks[8], (out_dim,), jnp.float32) * 0.1,
           jax.random.uniform(ks[9], (out_dim,), jnp.float32, 0.5, 1.5))
    return dw_w, pw_w, bn1, bn2


if __name__ == "__main__":
    key = jax.random.PRNGKey(0)
    kx, kp1, kp2 = jax.random.split(key, 3)

    # Tolerance sized for the intentional bf16 input staging / depthwise taps /
    # pointwise MXU matmul (f32 accumulation kept everywhere it matters).
    ATOL = RTOL = 8e-2

    # Config 1: identity branch active (in_dim == out_dim, stride == 1)
    x1 = jax.random.normal(kx, (2, 8, 16, 16), jnp.float32)     # NCHW
    p1 = make_params(kp1, in_dim=8, out_dim=8)
    out1 = jax.block_until_ready(depthwise_separable_conv(x1, p1, stride=1))
    ref1 = ref_forward(x1, p1, stride=1)
    assert out1.shape == (2, 8, 16, 16)
    assert jnp.allclose(out1, ref1, atol=ATOL, rtol=RTOL), "mismatch (config 1)"

    # Config 2: no identity (channel expansion, stride 2)
    x2 = jax.random.normal(kx, (2, 8, 16, 16), jnp.float32)
    p2 = make_params(kp2, in_dim=8, out_dim=16)
    out2 = jax.block_until_ready(depthwise_separable_conv(x2, p2, stride=2))
    ref2 = ref_forward(x2, p2, stride=2)
    assert out2.shape == (2, 16, 8, 8)
    assert jnp.allclose(out2, ref2, atol=ATOL, rtol=RTOL), "mismatch (config 2)"

    print("KERNEL_OK")
</pallas_src>

<mosaic_0001>
module attributes {stable_mosaic.version = 11 : i64} {
  func.func @_dsconv_kernel(%arg0: i32, %arg1: i32, %arg2: memref<1x1x18x18x128xbf16, #tpu.memory_space<vmem>>, %arg3: memref<3x3x128xbf16, #tpu.memory_space<vmem>>, %arg4: memref<128x128xbf16, #tpu.memory_space<vmem>>, %arg5: memref<1x128xf32, #tpu.memory_space<vmem>>, %arg6: memref<1x128xf32, #tpu.memory_space<vmem>>, %arg7: memref<1x16x16x128xf32, #tpu.memory_space<vmem>>) attributes {dimension_semantics = [#tpu.dimension_semantics<parallel>, #tpu.dimension_semantics<parallel>], iteration_bounds = array<i64: 2, 1>, scalar_prefetch = 0 : i64, scratch_operands = 0 : i64, tpu.core_type = #tpu.core_type<tc>, window_params = [{transform_indices = @transform_0, window_bounds = array<i64: 1, 1, 18, 18, 128>}, {pipeline_mode = #tpu.pipeline_mode<synchronous>, transform_indices = @transform_1, window_bounds = array<i64: 3, 3, 128>}, {pipeline_mode = #tpu.pipeline_mode<synchronous>, transform_indices = @transform_2, window_bounds = array<i64: 128, 128>}, {pipeline_mode = #tpu.pipeline_mode<synchronous>, transform_indices = @transform_3, window_bounds = array<i64: 1, 128>}, {pipeline_mode = #tpu.pipeline_mode<synchronous>, transform_indices = @transform_4, window_bounds = array<i64: 1, 128>}, {transform_indices = @transform_5, window_bounds = array<i64: 1, 16, 16, 128>}]} {
    %c0 = arith.constant 0 : index
    %c0_0 = arith.constant 0 : index
    %c0_1 = arith.constant 0 : index
    %c0_2 = arith.constant 0 : index
    %c0_3 = arith.constant 0 : index
    %0 = vector.load %arg2[%c0, %c0_0, %c0_1, %c0_2, %c0_3] : memref<1x1x18x18x128xbf16, #tpu.memory_space<vmem>>, vector<1x1x18x18x128xbf16>
    %1 = vector.shape_cast %0 : vector<1x1x18x18x128xbf16> to vector<18x18x128xbf16>
    %c0_4 = arith.constant 0 : index
    %c0_5 = arith.constant 0 : index
    %c0_6 = arith.constant 0 : index
    %2 = vector.load %arg3[%c0_4, %c0_5, %c0_6] : memref<3x3x128xbf16, #tpu.memory_space<vmem>>, vector<3x3x128xbf16>
    %3 = vector.extract_strided_slice %1 {offsets = [0, 0, 0], sizes = [18, 16, 128], strides = [1, 1, 1]} : vector<18x18x128xbf16> to vector<18x16x128xbf16>
    %4 = vector.extract_strided_slice %1 {offsets = [0, 1, 0], sizes = [18, 16, 128], strides = [1, 1, 1]} : vector<18x18x128xbf16> to vector<18x16x128xbf16>
    %5 = vector.extract_strided_slice %1 {offsets = [0, 2, 0], sizes = [18, 16, 128], strides = [1, 1, 1]} : vector<18x18x128xbf16> to vector<18x16x128xbf16>
    %6 = vector.extract_strided_slice %3 {offsets = [0, 0, 0], sizes = [16, 16, 128], strides = [1, 1, 1]} : vector<18x16x128xbf16> to vector<16x16x128xbf16>
    %7 = vector.extract_strided_slice %2 {offsets = [0, 0, 0], sizes = [1, 1, 128], strides = [1, 1, 1]} : vector<3x3x128xbf16> to vector<1x1x128xbf16>
    %8 = vector.shape_cast %7 : vector<1x1x128xbf16> to vector<128xbf16>
    %9 = vector.shape_cast %8 : vector<128xbf16> to vector<1x1x128xbf16>
    %10 = vector.broadcast %9 : vector<1x1x128xbf16> to vector<16x16x128xbf16>
    %11 = arith.mulf %6, %10 : vector<16x16x128xbf16>
    %12 = vector.extract_strided_slice %4 {offsets = [0, 0, 0], sizes = [16, 16, 128], strides = [1, 1, 1]} : vector<18x16x128xbf16> to vector<16x16x128xbf16>
    %13 = vector.extract_strided_slice %2 {offsets = [0, 1, 0], sizes = [1, 1, 128], strides = [1, 1, 1]} : vector<3x3x128xbf16> to vector<1x1x128xbf16>
    %14 = vector.shape_cast %13 : vector<1x1x128xbf16> to vector<128xbf16>
    %15 = vector.shape_cast %14 : vector<128xbf16> to vector<1x1x128xbf16>
    %16 = vector.broadcast %15 : vector<1x1x128xbf16> to vector<16x16x128xbf16>
    %17 = arith.mulf %12, %16 : vector<16x16x128xbf16>
    %18 = arith.addf %11, %17 : vector<16x16x128xbf16>
    %19 = vector.extract_strided_slice %5 {offsets = [0, 0, 0], sizes = [16, 16, 128], strides = [1, 1, 1]} : vector<18x16x128xbf16> to vector<16x16x128xbf16>
    %20 = vector.extract_strided_slice %2 {offsets = [0, 2, 0], sizes = [1, 1, 128], strides = [1, 1, 1]} : vector<3x3x128xbf16> to vector<1x1x128xbf16>
    %21 = vector.shape_cast %20 : vector<1x1x128xbf16> to vector<128xbf16>
    %22 = vector.shape_cast %21 : vector<128xbf16> to vector<1x1x128xbf16>
    %23 = vector.broadcast %22 : vector<1x1x128xbf16> to vector<16x16x128xbf16>
    %24 = arith.mulf %19, %23 : vector<16x16x128xbf16>
    %25 = arith.addf %18, %24 : vector<16x16x128xbf16>
    %26 = vector.extract_strided_slice %3 {offsets = [1, 0, 0], sizes = [16, 16, 128], strides = [1, 1, 1]} : vector<18x16x128xbf16> to vector<16x16x128xbf16>
    %27 = vector.extract_strided_slice %2 {offsets = [1, 0, 0], sizes = [1, 1, 128], strides = [1, 1, 1]} : vector<3x3x128xbf16> to vector<1x1x128xbf16>
    %28 = vector.shape_cast %27 : vector<1x1x128xbf16> to vector<128xbf16>
    %29 = vector.shape_cast %28 : vector<128xbf16> to vector<1x1x128xbf16>
    %30 = vector.broadcast %29 : vector<1x1x128xbf16> to vector<16x16x128xbf16>
    %31 = arith.mulf %26, %30 : vector<16x16x128xbf16>
    %32 = arith.addf %25, %31 : vector<16x16x128xbf16>
    %33 = vector.extract_strided_slice %4 {offsets = [1, 0, 0], sizes = [16, 16, 128], strides = [1, 1, 1]} : vector<18x16x128xbf16> to vector<16x16x128xbf16>
    %34 = vector.extract_strided_slice %2 {offsets = [1, 1, 0], sizes = [1, 1, 128], strides = [1, 1, 1]} : vector<3x3x128xbf16> to vector<1x1x128xbf16>
    %35 = vector.shape_cast %34 : vector<1x1x128xbf16> to vector<128xbf16>
    %36 = vector.shape_cast %35 : vector<128xbf16> to vector<1x1x128xbf16>
    %37 = vector.broadcast %36 : vector<1x1x128xbf16> to vector<16x16x128xbf16>
    %38 = arith.mulf %33, %37 : vector<16x16x128xbf16>
    %39 = arith.addf %32, %38 : vector<16x16x128xbf16>
    %40 = vector.extract_strided_slice %5 {offsets = [1, 0, 0], sizes = [16, 16, 128], strides = [1, 1, 1]} : vector<18x16x128xbf16> to vector<16x16x128xbf16>
    %41 = vector.extract_strided_slice %2 {offsets = [1, 2, 0], sizes = [1, 1, 128], strides = [1, 1, 1]} : vector<3x3x128xbf16> to vector<1x1x128xbf16>
    %42 = vector.shape_cast %41 : vector<1x1x128xbf16> to vector<128xbf16>
    %43 = vector.shape_cast %42 : vector<128xbf16> to vector<1x1x128xbf16>
    %44 = vector.broadcast %43 : vector<1x1x128xbf16> to vector<16x16x128xbf16>
    %45 = arith.mulf %40, %44 : vector<16x16x128xbf16>
    %46 = arith.addf %39, %45 : vector<16x16x128xbf16>
    %47 = vector.extract_strided_slice %3 {offsets = [2, 0, 0], sizes = [16, 16, 128], strides = [1, 1, 1]} : vector<18x16x128xbf16> to vector<16x16x128xbf16>
    %48 = vector.extract_strided_slice %2 {offsets = [2, 0, 0], sizes = [1, 1, 128], strides = [1, 1, 1]} : vector<3x3x128xbf16> to vector<1x1x128xbf16>
    %49 = vector.shape_cast %48 : vector<1x1x128xbf16> to vector<128xbf16>
    %50 = vector.shape_cast %49 : vector<128xbf16> to vector<1x1x128xbf16>
    %51 = vector.broadcast %50 : vector<1x1x128xbf16> to vector<16x16x128xbf16>
    %52 = arith.mulf %47, %51 : vector<16x16x128xbf16>
    %53 = arith.addf %46, %52 : vector<16x16x128xbf16>
    %54 = vector.extract_strided_slice %4 {offsets = [2, 0, 0], sizes = [16, 16, 128], strides = [1, 1, 1]} : vector<18x16x128xbf16> to vector<16x16x128xbf16>
    %55 = vector.extract_strided_slice %2 {offsets = [2, 1, 0], sizes = [1, 1, 128], strides = [1, 1, 1]} : vector<3x3x128xbf16> to vector<1x1x128xbf16>
    %56 = vector.shape_cast %55 : vector<1x1x128xbf16> to vector<128xbf16>
    %57 = vector.shape_cast %56 : vector<128xbf16> to vector<1x1x128xbf16>
    %58 = vector.broadcast %57 : vector<1x1x128xbf16> to vector<16x16x128xbf16>
    %59 = arith.mulf %54, %58 : vector<16x16x128xbf16>
    %60 = arith.addf %53, %59 : vector<16x16x128xbf16>
    %61 = vector.extract_strided_slice %5 {offsets = [2, 0, 0], sizes = [16, 16, 128], strides = [1, 1, 1]} : vector<18x16x128xbf16> to vector<16x16x128xbf16>
    %62 = vector.extract_strided_slice %2 {offsets = [2, 2, 0], sizes = [1, 1, 128], strides = [1, 1, 1]} : vector<3x3x128xbf16> to vector<1x1x128xbf16>
    %63 = vector.shape_cast %62 : vector<1x1x128xbf16> to vector<128xbf16>
    %64 = vector.shape_cast %63 : vector<128xbf16> to vector<1x1x128xbf16>
    %65 = vector.broadcast %64 : vector<1x1x128xbf16> to vector<16x16x128xbf16>
    %66 = arith.mulf %61, %65 : vector<16x16x128xbf16>
    %67 = arith.addf %60, %66 : vector<16x16x128xbf16>
    %68 = arith.extf %67 : vector<16x16x128xbf16> to vector<16x16x128xf32>
    %c0_7 = arith.constant 0 : index
    %c0_8 = arith.constant 0 : index
    %69 = vector.load %arg5[%c0_7, %c0_8] : memref<1x128xf32, #tpu.memory_space<vmem>>, vector<1x128xf32>
    %70 = vector.shape_cast %69 : vector<1x128xf32> to vector<128xf32>
    %71 = vector.shape_cast %70 : vector<128xf32> to vector<1x1x128xf32>
    %72 = vector.broadcast %71 : vector<1x1x128xf32> to vector<16x16x128xf32>
    %73 = arith.addf %68, %72 : vector<16x16x128xf32>
    %cst = arith.constant 0.000000e+00 : f32
    %cst_9 = arith.constant 6.000000e+00 : f32
    %74 = vector.broadcast %cst : f32 to vector<16x16x128xf32>
    %75 = arith.maximumf %74, %73 : vector<16x16x128xf32>
    %76 = vector.broadcast %cst_9 : f32 to vector<16x16x128xf32>
    %77 = arith.minimumf %76, %75 : vector<16x16x128xf32>
    %78 = vector.shape_cast %77 : vector<16x16x128xf32> to vector<256x128xf32>
    %79 = arith.truncf %78 : vector<256x128xf32> to vector<256x128xbf16>
    %c0_10 = arith.constant 0 : index
    %c0_11 = arith.constant 0 : index
    %80 = vector.load %arg4[%c0_10, %c0_11] : memref<128x128xbf16, #tpu.memory_space<vmem>>, vector<128x128xbf16>
    %cst_12 = arith.constant dense<0.000000e+00> : vector<256x128xf32>
    %81 = tpu.matmul %79, %80, %cst_12 {dimension_numbers = #tpu.dot_dimension_numbers<[1], [0], [0], [1], [0, 0, 1, 1], [], []>} : vector<256x128xbf16>, vector<128x128xbf16>, vector<256x128xf32> -> vector<256x128xf32>
    %c0_13 = arith.constant 0 : index
    %c0_14 = arith.constant 0 : index
    %82 = vector.load %arg6[%c0_13, %c0_14] : memref<1x128xf32, #tpu.memory_space<vmem>>, vector<1x128xf32>
    %83 = vector.shape_cast %82 : vector<1x128xf32> to vector<128xf32>
    %84 = vector.shape_cast %83 : vector<128xf32> to vector<1x128xf32>
    %85 = vector.broadcast %84 : vector<1x128xf32> to vector<256x128xf32>
    %86 = arith.addf %81, %85 : vector<256x128xf32>
    %87 = vector.shape_cast %86 : vector<256x128xf32> to vector<16x16x128xf32>
    %88 = vector.extract_strided_slice %1 {offsets = [1, 1, 0], sizes = [16, 16, 128], strides = [1, 1, 1]} : vector<18x18x128xbf16> to vector<16x16x128xbf16>
    %89 = arith.extf %88 : vector<16x16x128xbf16> to vector<16x16x128xf32>
    %90 = arith.addf %87, %89 : vector<16x16x128xf32>
    %c0_15 = arith.constant 0 : index
    %c0_16 = arith.constant 0 : index
    %c0_17 = arith.constant 0 : index
    %c0_18 = arith.constant 0 : index
    %91 = vector.load %arg7[%c0_15, %c0_16, %c0_17, %c0_18] : memref<1x16x16x128xf32, #tpu.memory_space<vmem>>, vector<1x16x16x128xf32>
    %92 = vector.shape_cast %91 : vector<1x16x16x128xf32> to vector<16x16x128xf32>
    %93 = vector.shape_cast %90 : vector<16x16x128xf32> to vector<1x16x16x128xf32>
    tpu.vector_store %arg7[%c0_15, %c0_16, %c0_17, %c0_18], %93 {strides = array<i32>} : memref<1x16x16x128xf32, #tpu.memory_space<vmem>>, vector<1x16x16x128xf32>,
    return
  }
  func.func @transform_0(%arg0: i32, %arg1: i32) -> (i32, i32, i32, i32, i32) {
    %c0_i32 = arith.constant 0 : i32
    %c0_i32_0 = arith.constant 0 : i32
    %c0_i32_1 = arith.constant 0 : i32
    %c0_i32_2 = arith.constant 0 : i32
    return %arg0, %arg1, %c0_i32, %c0_i32_0, %c0_i32_1 : i32, i32, i32, i32, i32
  }
  func.func @transform_1(%arg0: i32, %arg1: i32) -> (i32, i32, i32) {
    %c0_i32 = arith.constant 0 : i32
    %c0_i32_0 = arith.constant 0 : i32
    %c0_i32_1 = arith.constant 0 : i32
    %c0_i32_2 = arith.constant 0 : i32
    return %c0_i32, %c0_i32_0, %c0_i32_1 : i32, i32, i32
  }
  func.func @transform_2(%arg0: i32, %arg1: i32) -> (i32, i32) {
    %c0_i32 = arith.constant 0 : i32
    %c0_i32_0 = arith.constant 0 : i32
    %c0_i32_1 = arith.constant 0 : i32
    return %c0_i32, %c0_i32_0 : i32, i32
  }
  func.func @transform_3(%arg0: i32, %arg1: i32) -> (i32, i32) {
    %c0_i32 = arith.constant 0 : i32
    %c0_i32_0 = arith.constant 0 : i32
    %c0_i32_1 = arith.constant 0 : i32
    return %c0_i32, %c0_i32_0 : i32, i32
  }
  func.func @transform_4(%arg0: i32, %arg1: i32) -> (i32, i32) {
    %c0_i32 = arith.constant 0 : i32
    %c0_i32_0 = arith.constant 0 : i32
    %c0_i32_1 = arith.constant 0 : i32
    return %c0_i32, %c0_i32_0 : i32, i32
  }
  func.func @transform_5(%arg0: i32, %arg1: i32) -> (i32, i32, i32, i32) {
    %c0_i32 = arith.constant 0 : i32
    %c0_i32_0 = arith.constant 0 : i32
    %c0_i32_1 = arith.constant 0 : i32
    return %arg0, %arg1, %c0_i32, %c0_i32_0 : i32, i32, i32, i32
  }
}

</mosaic_0001>

<bundles_post_ra>
// kernel: tpu_custom_call.1
= control target key start
LH: loop header
LB: loop body
LE: loop exit
PB: predicated region body
PF: predicated region fallthrough
CT: control target
= control target key end

     0   :  { %10 = vsyncpa [#allocation3], 0  ;;  %s5782_s0 = inlined_call_operand.vmem [shape: bf16[2,1,18,18,128], index: 0, kind: input, shape index: {}]   ;;  %s5783_s1 = inlined_call_operand.vmem [shape: bf16[3,3,128], index: 1, kind: input, shape index: {}]   ;;  %s5784_s2 = inlined_call_operand.vmem [shape: bf16[128,128], index: 2, kind: input, shape index: {}]   ;;  %s5785_s3 = inlined_call_operand.vmem [shape: f32[1,128], index: 3, kind: input, shape index: {}]   ;;  %s5786_s4 = inlined_call_operand.vmem [shape: f32[1,128], index: 4, kind: input, shape index: {}]   ;;  %s5787_s5 = inlined_call_operand.hbm [shape: f32[2,16,16,128], index: 5, kind: output, shape index: {}]  }
   0x1   :  { %12 = vsyncpa [#allocation3 + $0x1], 0  ;;  %s4024_s18 = smov 0   ;;  %s4026_s19 = smov 0  }
   0x2   :  { %s4028_s20 = smov 0   ;;  %s4030_s21 = smov 0  }
   0x3   :  { %s4032_s22 = smov 0   ;;  %s4034_s23 = smov 0  }
   0x4 LB: > { %s3625_s24 = sadd.s32 4294967295, %s3989_s23   ;;  %s3626_s25 = sadd.s32 4294967294, %s3989_s23   ;;  %s3989_s23 = sphi %s4034_s23, %s18_s23   ;;  %s3985_s22 = sphi %s4032_s22, %s5798_s22   ;;  %s3981_s21 = sphi %s4030_s21, %s5797_s21   ;;  %s3977_s20 = sphi %s4028_s20, %s5796_s20   ;;  %s3973_s19 = sphi %s4026_s19, %s5795_s19   ;;  %s3969_s18 = sphi %s4024_s18, %s5794_s18  }
   0x5   : > { %s30_s26 = sadd.s32 1, %s3985_s22  ;;  %s151_s27 = sadd.s32 1, %s3977_s20 }
   0x6   : > { %p32_p0 = scmp.ge.s32.totalorder %s30_s26, 2  ;;  %p161_p1 = scmp.ne.s32.totalorder %s3977_s20, %s3973_s19 }
   0x7   : > { %p162_p2 = scmp.eq.s32.totalorder %s3625_s24, 1  ;;  %p167_p3 = scmp.ne.s32.totalorder %s3973_s19, %s3969_s18 }
   0x8   : > { %s5800_s26 = smov (%p32_p0, %s30_s26), 0  ;;  %p168_p5 = scmp.eq.s32.totalorder %s3626_s25, 1 }
   0x9   : > { %p4064_p4 = por %p162_p2, %p161_p1  ;;  %s146_s29 = ssub.s32 %s3985_s22, %s5800_s26 }
   0xa   : > { %p3629_p6 = scmp.ge.s32.totalorder %s3989_s23, 1  ;;  %p149_p7 = scmp.eq.s32.totalorder %s146_s29, 0 }
   0xb   : > { %p4071_p8 = por %p168_p5, %p167_p3  ;;  %p210_p9 = scmp.lt.s32.totalorder %s3989_s23, 3 }
   0xc   : > { %s4077_s6 = scalar_select %p149_p7, %s3977_s20, %s151_s27  }
   0xd   : > { %p211_p10 = pnand %p3629_p6, %p210_p9 }
   0xe   : > { %p242_p11 = scmp.lt.s32.totalorder (!%p211_p10), %s3981_s21, 1  ;;  %s3991_s8 = smov (!%p211_p10), [#allocation2]  }
   0xf   : > { %214 = sbr.rel (%p211_p10) target bundleno = 722 (0x2d2), region = 40  ;;  %s3917_s9 = sshll.u32 (!%p211_p10), %s3991_s8, 4  ;;  %s3918_s9 = int_to_ptr.vmem [resolvable:$false] %s3917_s9 }
  0x10   : > { %s3919_s10 = scalar_lea.vmem (!%p211_p10), %s3918_s9, 8192 }
  0x14   : > { %v3851_v0 = vld [vmem:[%s5784_s2 + $0x38] sm:$0xff]   ;;  %v3852_v1 = vld [vmem:[%s5784_s2 + $0x30] sm:$0xff]   ;;  %v3853_v2 = vld [vmem:[%s5784_s2 + $0x28] sm:$0xff]   ;;  %v313_v3 = vlaneseq  ;;  %s243_s13 = scalar_select %p242_p11, %s3981_s21, 1  ;;  %vm967_vm0 = vcmask 1042432   ;;  %vm968_vm1 = vcmask 1046532  }
  0x15   : > { %3729 = vmatprep.subr.bf16.mxu0 %v3851_v0  ;;  %3777 = vmatprep.subr.bf16.mxu1 %v3851_v0  ;;  %v3854_v4 = vld [vmem:[%s5784_s2 + $0x20] sm:$0xff]   ;;  %v3855_v9 = vld [vmem:[%s5784_s2 + $0x18] sm:$0xff]   ;;  %v3856_v23 = vld [vmem:[%s5784_s2 + $0x10] sm:$0xff]   ;;  %vm412_vm2 = vsmask.f32 3328  ;;  %vm3349_vm6 = vcmask 1046528  }
  0x16   : > { %3730 = vmatpush3.bf16.msra.mxu0 %v3851_v0  ;;  %3785 = vmatpush3.bf16.msra.mxu1 %v3851_v0  ;;  %v314_v5 = vshrl.u32 %v313_v3, 7  ;;  %s3793_s16 = smul.u32 216, %s243_s13  ;;  %v307_v7 = vld [vmem:[%s5783_s1] sm:$0x3]  ;;  %v308_v8 = vld [vmem:[%s5783_s1 + $0x2] sm:$0x3]  ;;  %vm4178_vm4 = vmor %vm967_vm0, %vm968_vm1 }
  0x17   : > { %3731 = vmatprep.subr.bf16.mxu0 %v3852_v1  ;;  %3778 = vmatprep.subr.bf16.mxu1 %v3852_v1  ;;  %v4107_v10 = vld [vmem:[%s5783_s1 + $0x4] sm:$0x3]  ;;  %v311_v11 = vpack.i.b16 %v307_v7, %v307_v7  ;;  %v353_v13 = vshrl.u32 %v307_v7, 16  ;;  %v1147_v14 = vpack.i.b16 %v308_v8, %v308_v8  ;;  %v1221_v15 = vshrl.u32 %v308_v8, 16  ;;  %v3857_v43 = vld [vmem:[%s5784_s2 + $0x8] sm:$0xff]   ;;  %s239_s13 = sand.u32 1, %s3973_s19  }
  0x18   : > { %v4093_v6 = vsub.s32 1, %v314_v5  ;;  %v4109_v12 = vsub.s32 0, %v314_v5  ;;  %v4113_v16 = vpack.i.b16 %v4107_v10, %v4107_v10  ;;  %s4118_s12 = scalar_lea.vmem %s5782_s0, %s3793_s16  ;;  %vm413_vm3 = vsmask.f32 7440  ;;  %v3858_v58 = vld [vmem:[%s5784_s2] sm:$0xff]   ;;  %s5569_s14 = sshll.u32 %s239_s13, 8 }
  0x19   : > { %v354_v18 = vpack.i.b16 %v353_v13, %v353_v13  ;;  %v1222_v21 = vpack.i.b16 %v1221_v15, %v1221_v15  ;;  %v4133_v27 = vld [vmem:[%s4118_s12] sm:$0xf]  ;;  %v4136_v28 = vld [vmem:[%s4118_s12 + $0x4] sm:$0xf]  ;;  %v255_v29 = vld [vmem:[%s4118_s12 + $0x8] sm:$0x1] }
  0x1a   : > { %3732 = vmatpush3.bf16.msra.mxu0 %v3852_v1  ;;  %3786 = vmatpush3.bf16.msra.mxu1 %v3852_v1  ;;  %v316_v17 = vrot.slane %v311_v11, %v4109_v12  ;;  %v866_v19 = vrot.slane %v311_v11, %v4093_v6  ;;  %v1152_v20 = vrot.slane %v1147_v14, %v4109_v12  ;;  %v4149_v34 = vld [vmem:[%s4118_s12 + $0xc] sm:$0xf]  ;;  %v2083_v42 = vshrl.u32 %v4107_v10, 16  ;;  %v4169_v44 = vld [vmem:[%s4118_s12 + $0x10] sm:$0xf]  ;;  %vm4211_vm5 = vmor %vm412_vm2, %vm413_vm3  ;;  %s5587_s15 = scalar_lea.vmem [#allocation2], %s5569_s14 }
  0x1b   : > { %3733 = vmatprep.subr.bf16.mxu0 %v3853_v2  ;;  %3779 = vmatprep.subr.bf16.mxu1 %v3853_v2  ;;  %v1731_v22 = vrot.slane %v1147_v14, %v4093_v6  ;;  %v359_v25 = vrot.slane %v354_v18, %v4109_v12  ;;  %v1227_v31 = vrot.slane %v1222_v21, %v4109_v12  ;;  %v4201_v63 = vld [vmem:[%s4118_s12 + $0x14] sm:$0x1]  ;;  %v3872_v48 = vld [vmem:[%s4118_s12 + $0x10] sm:$0xf]  ;;  %s3543_s24 = sshll.u32 %s5587_s15, 4  ;;  %s5731_s24 = int_to_ptr.vmem [resolvable:$true] %s3543_s24 }
  0x1c   : > { %v4127_v24 = vcombine.low %v316_v17, %v316_v17  ;;  %v4130_v26 = vcombine.low %v866_v19, %v866_v19  ;;  %v4139_v30 = vcombine.low %v1152_v20, %v1152_v20  ;;  %v4146_v33 = vrot.slane %v4113_v16, %v4109_v12  ;;  %s3913_s7 = scalar_lea.vmem %s5731_s24, 4096  ;;  %p3920_p1 = scmp.lt.s32.totalorder %s5731_s24, %s3918_s9 }
  0x1d   : > { %v4142_v32 = vcombine.low %v1731_v22, %v1731_v22  ;;  %v4155_v37 = vcombine.low %v359_v25, %v359_v25  ;;  %v4188_v53 = vcombine.low %v1227_v31, %v1227_v31  ;;  %p3914_p12 = scmp.ne.s32.totalorder %s5731_s24, %s3913_s7  ;;  %p3921_p2 = scmp.lt.s32.totalorder %s3919_s10, %s3913_s7 }
  0x1e   : > { %3734 = vmatpush3.bf16.msra.mxu0 %v3853_v2  ;;  %3787 = vmatpush3.bf16.msra.mxu1 %v3853_v2  ;;  %v321_v35 = vmul.bf16 %v4127_v24, %v4133_v27  ;;  %v322_v36 = vmul.bf16 %v4127_v24, %v4136_v28  ;;  %v871_v38 = vmul.bf16 %v4130_v26, %v4133_v27 }
  0x1f   : > { %3735 = vmatprep.subr.bf16.mxu0 %v3854_v4  ;;  %3780 = vmatprep.subr.bf16.mxu1 %v3854_v4  ;;  %v872_v39 = vmul.bf16 %v4130_v26, %v4136_v28  ;;  %v873_v40 = vmul.bf16 %v4130_v26, %v255_v29  ;;  %v1157_v41 = vmul.bf16 %v4139_v30, %v4149_v34  ;;  %p3915_p13 = pnand %p3914_p12, %p4064_p4  ;;  %p3922_p3 = por %p3921_p2, %p3920_p1 }
  0x20   : > { %v364_v45 = vmul.bf16 %v4155_v37, %v4133_v27  ;;  %v365_v46 = vmul.bf16 %v4155_v37, %v4136_v28  ;;  %v366_v47 = vmul.bf16 %v4155_v37, %v255_v29  ;;  %v4182_v49 = vrot.slane %v871_v38, 9 }
  0x21   : > { %v4184_v50 = vrot.slane %v872_v39, 5  ;;  %v975_v51 = vrot.slane %v873_v40, 5  ;;  %v1158_v52 = vmul.bf16 %v4139_v30, %v4169_v44  ;;  %v1232_v62 = vmul.bf16 %v4188_v53, %v4149_v34  ;;  %p3916_p0 = pneg %p3915_p13 }
  0x22   : > { %3736 = vmatpush3.bf16.msra.mxu0 %v3854_v4  ;;  %3788 = vmatpush3.bf16.msra.mxu1 %v3854_v4  ;;  %v416_v54 = vshrl.u32 %v364_v45, 16  ;;  %v419_v55 = vshll.u32 %v364_v45, 16  ;;  %v425_v56 = vshll.u32 %v365_v46, 16  ;;  %v429_v57 = vshrl.u32 %v365_v46, 16 }
  0x23   : > { %3737 = vmatprep.subr.bf16.mxu0 %v3855_v9  ;;  %3781 = vmatprep.subr.bf16.mxu1 %v3855_v9  ;;  %v435_v59 = vshll.u32 %v366_v47, 16  ;;  %v973_v60 = vsel %vm4178_vm4, %v4182_v49, %v4184_v50  ;;  %v974_v61 = vrot.slane %v4184_v50, 4  ;;  %v1233_v7 = vmul.bf16 %v4188_v53, %v4169_v44  ;;  %p3923_p5 = pnand %p3922_p3, %p3916_p0 }
  0x24   : > { %v418_v0 = vrot.slane %v416_v54, 4  ;;  %v421_v1 = vrot.slane %v419_v55, 5  ;;  %v427_v2 = vrot.slane %v425_v56, 5  ;;  %v431_v3 = vrot.slane %v429_v57, 4 }
  0x25   : > { %v437_v4 = vrot.slane %v435_v59, 5  ;;  %v976_v5 = vsel %vm4178_vm4, %v974_v61, %v975_v51  ;;  %v1234_v8 = vmul.bf16 %v4188_v53, %v4201_v63  ;;  %v1281_v13 = vshrl.u32 %v1232_v62, 16 }
  0x26   : > { %3738 = vmatpush3.bf16.msra.mxu0 %v3855_v9  ;;  %3789 = vmatpush3.bf16.msra.mxu1 %v3855_v9  ;;  %v422_v9 = vor.u32 %v421_v1, %v418_v0  ;;  %v432_v11 = vor.u32 %v431_v3, %v427_v2  ;;  %v1284_v14 = vshll.u32 %v1232_v62, 16  ;;  %v1290_v17 = vshll.u32 %v1233_v7, 16  ;;  %v4251_v1 = vld [vmem:[%s4118_s12 + $0x60] sm:$0xf]  ;;  %v4264_v3 = vld [vmem:[%s4118_s12 + $0x64] sm:$0xf] }
  0x27   : > { %3739 = vmatprep.subr.bf16.mxu0 %v3856_v23  ;;  %3782 = vmatprep.subr.bf16.mxu1 %v3856_v23  ;;  %v1294_v18 = vshrl.u32 %v1233_v7, 16  ;;  %v1300_v19 = vshll.u32 %v1234_v8, 16  ;;  %v1736_v20 = vmul.bf16 %v4142_v32, %v4149_v34  ;;  %v1737_v39 = vmul.bf16 %v4142_v32, %v4169_v44 }
  0x28   : > { %v423_v21 = vrot.slane %v422_v9, 4  ;;  %v433_v22 = vrot.slane %v432_v11, 4  ;;  %v1286_v25 = vrot.slane %v1284_v14, 5  ;;  %v1292_v29 = vrot.slane %v1290_v17, 5 }
  0x29   : > { %v1296_v31 = vrot.slane %v1294_v18, 4  ;;  %v1302_v38 = vrot.slane %v1300_v19, 5  ;;  %v1738_v46 = vmul.bf16 %v4142_v32, %v4201_v63  ;;  %v3654_v51 = vrot.slane %v1736_v20, 9 }
  0x2a   : > { %3740 = vmatpush3.bf16.msra.mxu0 %v3856_v23  ;;  %3790 = vmatpush3.bf16.msra.mxu1 %v3856_v23  ;;  %v1283_v23 = vrot.slane %v1281_v13, 4  ;;  %v428_v40 = vsel %vm4211_vm5, %v423_v21, %v427_v2  ;;  %v1834_v55 = vrot.slane %v1737_v39, 5  ;;  %v4233_v57 = vcombine.low %v4146_v33, %v4146_v33 }
  0x2b   : > { %3741 = vmatprep.subr.bf16.mxu0 %v3857_v43  ;;  %3783 = vmatprep.subr.bf16.mxu1 %v3857_v43  ;;  %v831_v47 = vadd.bf16 %v428_v40, %v321_v35  ;;  %v1297_v50 = vor.u32 %v1296_v31, %v1292_v29  ;;  %v1837_v56 = vrot.slane %v1738_v46, 5  ;;  %v2084_v28 = vpack.i.b16 %v2083_v42, %v2083_v42 }
  0x2c   : > { %v1287_v45 = vor.u32 %v1286_v25, %v1283_v23  ;;  %v1835_v33 = vsel %vm4178_vm4, %v3654_v51, %v1834_v55  ;;  %v1836_v62 = vrot.slane %v1834_v55, 4  ;;  %v2593_v7 = vrot.slane %v4113_v16, %v4093_v6  ;;  %v4289_v16 = vld [vmem:[%s4118_s12 + $0x20] sm:$0x1] }
  0x2d   : > { %v1114_v27 = vadd.bf16 %v973_v60, %v831_v47  ;;  %v1298_v59 = vrot.slane %v1297_v50, 4  ;;  %v338_v11 = vmul.bf16 %v4127_v24, %v4264_v3  ;;  %v388_v13 = vmul.bf16 %v4155_v37, %v4251_v1 }
  0x2e   : > { %3742 = vmatpush3.bf16.msra.mxu0 %v3857_v43  ;;  %3791 = vmatpush3.bf16.msra.mxu1 %v3857_v43  ;;  %v438_v43 = vsel %vm4211_vm5, %v433_v22, %v437_v4  ;;  %v1288_v54 = vrot.slane %v1287_v45, 4  ;;  %v4267_v4 = vld [vmem:[%s4118_s12 + $0x68] sm:$0x1]  ;;  %v4282_v17 = vcombine.low %v2593_v7, %v2593_v7 }
  0x2f   : > { %3743 = vmatprep.subr.bf16.mxu0 %v3858_v58  ;;  %3784 = vmatprep.subr.bf16.mxu1 %v3858_v58  ;;  %v832_v49 = vadd.bf16 %v438_v43, %v322_v36  ;;  %v4242_v36 = vld [vmem:[%s4118_s12 + $0x1c] sm:$0xf]  ;;  %v1189_v10 = vadd.bf16 %v1157_v41, %v1114_v27  ;;  %v1303_v60 = vsel %vm4211_vm5, %v1298_v59, %v1302_v38  ;;  %v608_v20 = vshrl.u32 %v388_v13, 16 }
  0x30   : > { %v1293_v61 = vsel %vm4211_vm5, %v1288_v54, %v1292_v29  ;;  %v2020_v2 = vmul.bf16 %v4233_v57, %v4242_v36  ;;  %v2089_v41 = vrot.slane %v2084_v28, %v4109_v12  ;;  %v389_v12 = vmul.bf16 %v4155_v37, %v4264_v3 }
  0x31   : > { %v1115_v35 = vadd.bf16 %v976_v5, %v832_v49  ;;  %v1838_v5 = vsel %vm4178_vm4, %v1836_v62, %v1837_v56  ;;  %v1696_v8 = vadd.bf16 %v1293_v61, %v1189_v10  ;;  %v390_v6 = vmul.bf16 %v4155_v37, %v4267_v4 }
  0x32   : > { %3744 = vmatpush3.bf16.msra.mxu0 %v3858_v58  ;;  %3792 = vmatpush3.bf16.msra.mxu1 %v3858_v58  ;;  %v4236_v58 = vld [vmem:[%s4118_s12 + $0x18] sm:$0xf]  ;;  %v4280_v14 = vcombine.low %v2089_v41, %v2089_v41  ;;  %v611_v21 = vshll.u32 %v388_v13, 16  ;;  %v2599_v39 = vmul.bf16 %v4282_v17, %v4242_v36  ;;  %v2600_v40 = vmul.bf16 %v4282_v17, %v4289_v16 }
  0x33   : > { %v2019_v0 = vmul.bf16 %v4233_v57, %v4236_v58  ;;  %v1190_v42 = vadd.bf16 %v1158_v52, %v1115_v35  ;;  %v337_v52 = vmul.bf16 %v4127_v24, %v4251_v1  ;;  %v1976_v18 = vadd.bf16 %v1835_v33, %v1696_v8 }
  0x34   : > { %v2094_v22 = vmul.bf16 %v4280_v14, %v4236_v58  ;;  %v2095_v23 = vmul.bf16 %v4280_v14, %v4242_v36  ;;  %v2096_v25 = vmul.bf16 %v4280_v14, %v4289_v16  ;;  %v2598_v29 = vmul.bf16 %v4282_v17, %v4236_v58 }
  0x35   : > { %v1697_v9 = vadd.bf16 %v1303_v60, %v1190_v42  ;;  %v2051_v31 = vadd.bf16 %v2019_v0, %v1976_v18  ;;  %v2696_v51 = vrot.slane %v2599_v39, 5  ;;  %v2699_v54 = vrot.slane %v2600_v40, 5  ;;  %v4318_v39 = vld [vmem:[%s4118_s12 + $0x6c] sm:$0xf]  ;;  %v4321_v40 = vld [vmem:[%s4118_s12 + $0x70] sm:$0xf] }
  0x36   : > { %v2143_v43 = vshrl.u32 %v2094_v22, 16  ;;  %v2146_v45 = vshll.u32 %v2094_v22, 16  ;;  %v2152_v46 = vshll.u32 %v2095_v23, 16  ;;  %v2156_v47 = vshrl.u32 %v2095_v23, 16 }
  0x37   : > { %v1977_v19 = vadd.bf16 %v1838_v5, %v1697_v9  ;;  %v2162_v49 = vshll.u32 %v2096_v25, 16  ;;  %v3673_v50 = vrot.slane %v2598_v29, 9  ;;  %v2698_v61 = vrot.slane %v2696_v51, 4 }
  0x38   : > { %v2145_v55 = vrot.slane %v2143_v43, 4  ;;  %v2148_v56 = vrot.slane %v2146_v45, 5  ;;  %v2154_v27 = vrot.slane %v2152_v46, 5  ;;  %v2158_v35 = vrot.slane %v2156_v47, 4 }
  0x39   : > { %v2052_v38 = vadd.bf16 %v2020_v2, %v1977_v19  ;;  %v2164_v59 = vrot.slane %v2162_v49, 5  ;;  %v2697_v28 = vsel %vm4178_vm4, %v3673_v50, %v2696_v51  ;;  %v610_v33 = vrot.slane %v608_v20, 4 }
  0x3a   : > { %v2149_v62 = vor.u32 %v2148_v56, %v2145_v55  ;;  %v2159_v0 = vor.u32 %v2158_v35, %v2154_v27  ;;  %v613_v10 = vrot.slane %v611_v21, 5  ;;  %v617_v42 = vshll.u32 %v389_v12, 16 }
  0x3b   : > { %v2700_v60 = vsel %vm4178_vm4, %v2698_v61, %v2699_v54  ;;  %v621_v2 = vshrl.u32 %v389_v12, 16  ;;  %v627_v5 = vshll.u32 %v390_v6, 16  ;;  %v895_v41 = vmul.bf16 %v4130_v26, %v4251_v1  ;;  %v4335_v54 = vld [vmem:[%s5785_s3] ss:$0 sm:$0xff]  ;;  %v4344_v61 = vld [vmem:[%s4118_s12 + $0x74] sm:$0x1] }
  0x3c   : > { %v2150_v7 = vrot.slane %v2149_v62, 4  ;;  %v2160_v8 = vrot.slane %v2159_v0, 4  ;;  %v614_v9 = vor.u32 %v613_v10, %v610_v33  ;;  %v619_v13 = vrot.slane %v617_v42, 5 }
  0x3d   : > { %v623_v18 = vrot.slane %v621_v2, 4  ;;  %v629_v19 = vrot.slane %v627_v5, 5  ;;  %v896_v20 = vmul.bf16 %v4130_v26, %v4264_v3  ;;  %v897_v21 = vmul.bf16 %v4130_v26, %v4267_v4 }
  0x3e   : > { %v2155_v12 = vsel %vm4211_vm5, %v2150_v7, %v2154_v27  ;;  %v2165_v6 = vsel %vm4211_vm5, %v2160_v8, %v2164_v59  ;;  %v615_v22 = vrot.slane %v614_v9, 4  ;;  %v3643_v23 = vrot.slane %v895_v41, 9 }
  0x3f   : > { %v2558_v25 = vadd.bf16 %v2155_v12, %v2051_v31  ;;  %v2559_v29 = vadd.bf16 %v2165_v6, %v2052_v38  ;;  %v624_v43 = vor.u32 %v623_v18, %v619_v13  ;;  %v1028_v45 = vrot.slane %v896_v20, 5 }
  0x40   : > { %v620_v4 = vsel %vm4211_vm5, %v615_v22, %v619_v13  ;;  %v1031_v46 = vrot.slane %v897_v21, 5  ;;  %v1173_v47 = vmul.bf16 %v4139_v30, %v4318_v39  ;;  %v1174_v49 = vmul.bf16 %v4139_v30, %v4321_v40 }
  0x41   : > { %v2838_v50 = vadd.bf16 %v2697_v28, %v2558_v25  ;;  %v2839_v31 = vadd.bf16 %v2700_v60, %v2559_v29  ;;  %v625_v38 = vrot.slane %v624_v43, 4  ;;  %v847_v51 = vadd.bf16 %v620_v4, %v337_v52  ;;  %v4360_v29 = vld [vmem:[%s4118_s12 + $0x78] sm:$0xf]  ;;  %v4363_v43 = vld [vmem:[%s4118_s12 + $0x7c] sm:$0xf] }
  0x42   : > { %v1029_v55 = vsel %vm4178_vm4, %v3643_v23, %v1028_v45  ;;  %v1030_v56 = vrot.slane %v1028_v45, 4  ;;  %v1256_v27 = vmul.bf16 %v4188_v53, %v4318_v39  ;;  %v1257_v35 = vmul.bf16 %v4188_v53, %v4321_v40 }
  0x43   : > { %v2870_v59 = vunpack.c.l.bf16 %v2838_v50  ;;  %v2871_v28 = vunpack.c.l.bf16 %v2839_v31  ;;  %v630_v1 = vsel %vm4211_vm5, %v625_v38, %v629_v19  ;;  %v1130_v52 = vadd.bf16 %v1029_v55, %v847_v51  ;;  %v4374_v51 = vld [vmem:[%s4118_s12 + $0x80] sm:$0x1] }
  0x44   : > { %v848_v33 = vadd.bf16 %v630_v1, %v338_v11  ;;  %v1032_v62 = vsel %vm4178_vm4, %v1030_v56, %v1031_v46  ;;  %v1258_v0 = vmul.bf16 %v4188_v53, %v4344_v61  ;;  %v1473_v10 = vshrl.u32 %v1256_v27, 16 }
  0x45   : > { %v2909_v42 = vadd.f32 %v4335_v54, %v2870_v59  ;;  %v2910_v60 = vadd.f32 %v4335_v54, %v2871_v28  ;;  %v1205_v2 = vadd.bf16 %v1173_v47, %v1130_v52  ;;  %v1476_v5 = vshll.u32 %v1256_v27, 16 }
  0x46   : > { %v1131_v41 = vadd.bf16 %v1032_v62, %v848_v33  ;;  %v1475_v7 = vrot.slane %v1473_v10, 4  ;;  %v1482_v8 = vshll.u32 %v1257_v35, 16  ;;  %v1486_v3 = vshrl.u32 %v1257_v35, 16 }
  0x47   : > { %v2941_v11 = vmax.f32 %v2909_v42, 0.0  ;;  %v2942_v9 = vmax.f32 %v2910_v60, 0.0  ;;  %v1478_v13 = vrot.slane %v1476_v5, 5  ;;  %v1492_v18 = vshll.u32 %v1258_v0, 16 }
  0x48   : > { %v1206_v19 = vadd.bf16 %v1174_v49, %v1131_v41  ;;  %v1484_v20 = vrot.slane %v1482_v8, 5  ;;  %v1488_v21 = vrot.slane %v1486_v3, 4  ;;  %v1760_v12 = vmul.bf16 %v4142_v32, %v4318_v39 }
  0x49   : > { %v2973_v6 = vmin.f32 %v2941_v11, 6.0  ;;  %v2974_v22 = vmin.f32 %v2942_v9, 6.0  ;;  %v1479_v23 = vor.u32 %v1478_v13, %v1475_v7  ;;  %v1494_v25 = vrot.slane %v1492_v18, 5 }
  0x4a   : > { %v1489_v45 = vor.u32 %v1488_v21, %v1484_v20  ;;  %v1761_v4 = vmul.bf16 %v4142_v32, %v4321_v40  ;;  %v1762_v46 = vmul.bf16 %v4142_v32, %v4344_v61  ;;  %v3662_v47 = vrot.slane %v1760_v12, 9 }
  0x4b   : > { %v3005_v49 = vpack.c.bf16 %v2974_v22, %v2973_v6  ;;  %v1480_v50 = vrot.slane %v1479_v23, 4  ;;  %v2035_v31 = vmul.bf16 %v4233_v57, %v4360_v29  ;;  %v2036_v38 = vmul.bf16 %v4233_v57, %v4363_v43 }
  0x4c   : > { %v1490_v55 = vrot.slane %v1489_v45, 4  ;;  %v1890_v56 = vrot.slane %v1761_v4, 5  ;;  %v1893_v27 = vrot.slane %v1762_v46, 5  ;;  %v2118_v35 = vmul.bf16 %v4280_v14, %v4360_v29 }
  0x4d   : > { %3745 = vmatprep.mubr.bf16.mxu0 %v3005_v49  ;;  %v1485_v59 = vsel %vm4211_vm5, %v1480_v50, %v1484_v20  ;;  %v2119_v28 = vmul.bf16 %v4280_v14, %v4363_v43  ;;  %v2120_v1 = vmul.bf16 %v4280_v14, %v4374_v51  ;;  %v2622_v52 = vmul.bf16 %v4282_v17, %v4360_v29 }
  0x4e   : > { %v1495_v33 = vsel %vm4211_vm5, %v1490_v55, %v1494_v25  ;;  %v1712_v62 = vadd.bf16 %v1485_v59, %v1205_v2  ;;  %v1891_v0 = vsel %vm4178_vm4, %v3662_v47, %v1890_v56  ;;  %v1892_v10 = vrot.slane %v1890_v56, 4 }
  0x4f   : > { %v1713_v42 = vadd.bf16 %v1495_v33, %v1206_v19  ;;  %v2335_v60 = vshrl.u32 %v2118_v35, 16  ;;  %v2338_v5 = vshll.u32 %v2118_v35, 16  ;;  %v2344_v41 = vshll.u32 %v2119_v28, 16 }
  0x50   : > { %v1894_v7 = vsel %vm4178_vm4, %v1892_v10, %v1893_v27  ;;  %v1992_v8 = vadd.bf16 %v1891_v0, %v1712_v62  ;;  %v2348_v3 = vshrl.u32 %v2119_v28, 16  ;;  %v2354_v11 = vshll.u32 %v2120_v1, 16 }
  0x51   : > { %v1993_v9 = vadd.bf16 %v1894_v7, %v1713_v42  ;;  %v2337_v13 = vrot.slane %v2335_v60, 4  ;;  %v2340_v18 = vrot.slane %v2338_v5, 5  ;;  %v2346_v20 = vrot.slane %v2344_v41, 5 }
  0x52   : > { %v2067_v21 = vadd.bf16 %v2035_v31, %v1992_v8  ;;  %v2350_v2 = vrot.slane %v2348_v3, 4  ;;  %v2356_v12 = vrot.slane %v2354_v11, 5  ;;  %v2623_v6 = vmul.bf16 %v4282_v17, %v4363_v43 }
  0x53   : > { %v2068_v19 = vadd.bf16 %v2036_v38, %v1993_v9  ;;  %v2341_v22 = vor.u32 %v2340_v18, %v2337_v13  ;;  %v2624_v23 = vmul.bf16 %v4282_v17, %v4374_v51  ;;  %v3681_v25 = vrot.slane %v2622_v52, 9 }
  0x54   : > { %v2351_v45 = vor.u32 %v2350_v2, %v2346_v20  ;;  %v2752_v4 = vrot.slane %v2623_v6, 5  ;;  %v323_v46 = vmul.bf16 %v4127_v24, %v4149_v34  ;;  %v324_v47 = vmul.bf16 %v4127_v24, %v4169_v44 }
  0x55   : > { %v2342_v49 = vrot.slane %v2341_v22, 4  ;;  %v2755_v50 = vrot.slane %v2624_v23, 5  ;;  %v367_v31 = vmul.bf16 %v4155_v37, %v4149_v34  ;;  %v368_v38 = vmul.bf16 %v4155_v37, %v4169_v44 }
  0x56   : > { %v2352_v55 = vrot.slane %v2351_v45, 4  ;;  %v2753_v56 = vsel %vm4178_vm4, %v3681_v25, %v2752_v4  ;;  %v2754_v27 = vrot.slane %v2752_v4, 4  ;;  %v369_v35 = vmul.bf16 %v4155_v37, %v4201_v63 }
  0x57   : > { %v2347_v59 = vsel %vm4211_vm5, %v2342_v49, %v2346_v20  ;;  %v440_v28 = vshrl.u32 %v367_v31, 16  ;;  %v443_v1 = vshll.u32 %v367_v31, 16  ;;  %v449_v52 = vshll.u32 %v368_v38, 16 }
  0x58   : > { %v2357_v33 = vsel %vm4211_vm5, %v2352_v55, %v2356_v12  ;;  %v2574_v62 = vadd.bf16 %v2347_v59, %v2067_v21  ;;  %v2756_v0 = vsel %vm4178_vm4, %v2754_v27, %v2755_v50  ;;  %v453_v10 = vshrl.u32 %v368_v38, 16 }
  0x59   : > { %v2575_v42 = vadd.bf16 %v2357_v33, %v2068_v19  ;;  %v442_v60 = vrot.slane %v440_v28, 4  ;;  %v445_v5 = vrot.slane %v443_v1, 5  ;;  %v451_v41 = vrot.slane %v449_v52, 5 }
  0x5a   : > { %v2854_v7 = vadd.bf16 %v2753_v56, %v2574_v62  ;;  %v455_v8 = vrot.slane %v453_v10, 4  ;;  %v459_v3 = vshll.u32 %v369_v35, 16  ;;  %v874_v11 = vmul.bf16 %v4130_v26, %v4149_v34 }
  0x5b   : > { %v2855_v9 = vadd.bf16 %v2756_v0, %v2575_v42  ;;  %v446_v13 = vor.u32 %v445_v5, %v442_v60  ;;  %v875_v18 = vmul.bf16 %v4130_v26, %v4169_v44  ;;  %v876_v20 = vmul.bf16 %v4130_v26, %v4201_v63 }
  0x5c   : > { %v2886_v21 = vunpack.c.l.bf16 %v2854_v7  ;;  %v456_v2 = vor.u32 %v455_v8, %v451_v41  ;;  %v461_v12 = vrot.slane %v459_v3, 5  ;;  %v3636_v6 = vrot.slane %v874_v11, 9 }
  0x5d   : > { %v2887_v19 = vunpack.c.l.bf16 %v2855_v9  ;;  %v447_v22 = vrot.slane %v446_v13, 4  ;;  %v979_v23 = vrot.slane %v875_v18, 5  ;;  %v982_v25 = vrot.slane %v876_v20, 5  ;;  %v4441_v13 = vld [vmem:[%s4118_s12 + $0x24] sm:$0xf] }
  0x5e   : > { %v2925_v45 = vadd.f32 %v4335_v54, %v2886_v21  ;;  %v457_v4 = vrot.slane %v456_v2, 4  ;;  %v1159_v34 = vmul.bf16 %v4139_v30, %v4236_v58  ;;  %v1160_v44 = vmul.bf16 %v4139_v30, %v4242_v36  ;;  %v4444_v18 = vld [vmem:[%s4118_s12 + $0x28] sm:$0xf] }
  0x5f   : > { %v2926_v49 = vadd.f32 %v4335_v54, %v2887_v19  ;;  %v452_v63 = vsel %vm4211_vm5, %v447_v22, %v451_v41  ;;  %v980_v50 = vsel %vm4178_vm4, %v3636_v6, %v979_v23  ;;  %v981_v31 = vrot.slane %v979_v23, 4 }
  0x60   : > { %v2957_v38 = vmax.f32 %v2925_v45, 0.0  ;;  %v462_v55 = vsel %vm4211_vm5, %v457_v4, %v461_v12  ;;  %v833_v56 = vadd.bf16 %v452_v63, %v323_v46  ;;  %v1235_v27 = vmul.bf16 %v4188_v53, %v4236_v58 }
  0x61   : > { %v2958_v35 = vmax.f32 %v2926_v49, 0.0  ;;  %v834_v59 = vadd.bf16 %v462_v55, %v324_v47  ;;  %v983_v28 = vsel %vm4178_vm4, %v981_v31, %v982_v25  ;;  %v1236_v1 = vmul.bf16 %v4188_v53, %v4242_v36  ;;  %v4457_v25 = vld [vmem:[%s4118_s12 + $0x2c] sm:$0x1] }
  0x62   : > { %v2989_v52 = vmin.f32 %v2957_v38, 6.0  ;;  %v1116_v33 = vadd.bf16 %v980_v50, %v833_v56  ;;  %v1237_v62 = vmul.bf16 %v4188_v53, %v4289_v16  ;;  %v1305_v0 = vshrl.u32 %v1235_v27, 16 }
  0x63   : > { %v2990_v46 = vmin.f32 %v2958_v35, 6.0  ;;  %v1117_v10 = vadd.bf16 %v983_v28, %v834_v59  ;;  %v1308_v42 = vshll.u32 %v1235_v27, 16  ;;  %v1314_v60 = vshll.u32 %v1236_v1, 16 }
  0x64   : > { %v1191_v5 = vadd.bf16 %v1159_v34, %v1116_v33  ;;  %v1307_v47 = vrot.slane %v1305_v0, 4  ;;  %v1318_v41 = vshrl.u32 %v1236_v1, 16  ;;  %v1324_v7 = vshll.u32 %v1237_v62, 16 }
  0x65   : > { %v3013_v8 = vpack.c.bf16 %v2990_v46, %v2989_v52  ;;  %v1192_v3 = vadd.bf16 %v1160_v44, %v1117_v10  ;;  %v1310_v11 = vrot.slane %v1308_v42, 5  ;;  %v1316_v9 = vrot.slane %v1314_v60, 5 }
  0x66   : > { %v1320_v20 = vrot.slane %v1318_v41, 4  ;;  %v1326_v21 = vrot.slane %v1324_v7, 5  ;;  %v1739_v2 = vmul.bf16 %v4142_v32, %v4236_v58  ;;  %v1740_v12 = vmul.bf16 %v4142_v32, %v4242_v36 }
  0x67   : > { %3761 = vmatprep.mubr.bf16.mxu1 %v3013_v8  ;;  %v1311_v6 = vor.u32 %v1310_v11, %v1307_v47  ;;  %v1741_v19 = vmul.bf16 %v4142_v32, %v4289_v16  ;;  %v2021_v22 = vmul.bf16 %v4233_v57, %v4441_v13  ;;  %v2022_v23 = vmul.bf16 %v4233_v57, %v4444_v18 }
  0x68   : > { %v1321_v45 = vor.u32 %v1320_v20, %v1316_v9  ;;  %v3655_v4 = vrot.slane %v1739_v2, 9  ;;  %v1841_v34 = vrot.slane %v1740_v12, 5  ;;  %v2097_v44 = vmul.bf16 %v4280_v14, %v4441_v13 }
  0x69   : > { %v1312_v49 = vrot.slane %v1311_v6, 4  ;;  %v1844_v63 = vrot.slane %v1741_v19, 5  ;;  %v2098_v50 = vmul.bf16 %v4280_v14, %v4444_v18  ;;  %v2099_v31 = vmul.bf16 %v4280_v14, %v4457_v25 }
  0x6a   : > { %v1322_v38 = vrot.slane %v1321_v45, 4  ;;  %v1842_v55 = vsel %vm4178_vm4, %v3655_v4, %v1841_v34  ;;  %v1843_v56 = vrot.slane %v1841_v34, 4  ;;  %v2167_v27 = vshrl.u32 %v2097_v44, 16 }
  0x6b   : > { %v1317_v35 = vsel %vm4211_vm5, %v1312_v49, %v1316_v9  ;;  %v2170_v59 = vshll.u32 %v2097_v44, 16  ;;  %v2176_v28 = vshll.u32 %v2098_v50, 16  ;;  %v2180_v1 = vshrl.u32 %v2098_v50, 16 }
  0x6c   : > { %v1327_v52 = vsel %vm4211_vm5, %v1322_v38, %v1326_v21  ;;  %v1698_v33 = vadd.bf16 %v1317_v35, %v1191_v5  ;;  %v1845_v62 = vsel %vm4178_vm4, %v1843_v56, %v1844_v63  ;;  %v2169_v0 = vrot.slane %v2167_v27, 4 }
  0x6d   : > { %v1699_v46 = vadd.bf16 %v1327_v52, %v1192_v3  ;;  %v2172_v10 = vrot.slane %v2170_v59, 5  ;;  %v2178_v42 = vrot.slane %v2176_v28, 5  ;;  %v2182_v60 = vrot.slane %v2180_v1, 4 }
  0x6e   : > { %v1978_v47 = vadd.bf16 %v1842_v55, %v1698_v33  ;;  %v2186_v41 = vshll.u32 %v2099_v31, 16  ;;  %v2601_v7 = vmul.bf16 %v4282_v17, %v4441_v13  ;;  %v2602_v8 = vmul.bf16 %v4282_v17, %v4444_v18 }
  0x6f   : > { %v1979_v11 = vadd.bf16 %v1845_v62, %v1699_v46  ;;  %v2173_v9 = vor.u32 %v2172_v10, %v2169_v0  ;;  %v2183_v20 = vor.u32 %v2182_v60, %v2178_v42  ;;  %v2603_v5 = vmul.bf16 %v4282_v17, %v4457_v25 }
  0x70   : > { %v2053_v21 = vadd.bf16 %v2021_v22, %v1978_v47  ;;  %v2188_v2 = vrot.slane %v2186_v41, 5  ;;  %v3674_v3 = vrot.slane %v2601_v7, 9  ;;  %v2703_v12 = vrot.slane %v2602_v8, 5 }
  0x71   : > { %v2054_v6 = vadd.bf16 %v2022_v23, %v1979_v11  ;;  %v2174_v19 = vrot.slane %v2173_v9, 4  ;;  %v2184_v45 = vrot.slane %v2183_v20, 4  ;;  %v2706_v4 = vrot.slane %v2603_v5, 5 }
  0x72   : > { %v2704_v34 = vsel %vm4178_vm4, %v3674_v3, %v2703_v12  ;;  %v2705_v44 = vrot.slane %v2703_v12, 4  ;;  %v339_v49 = vmul.bf16 %v4127_v24, %v4318_v39  ;;  %v340_v63 = vmul.bf16 %v4127_v24, %v4321_v40 }
  0x73   : > { %v2179_v22 = vsel %vm4211_vm5, %v2174_v19, %v2178_v42  ;;  %v2189_v50 = vsel %vm4211_vm5, %v2184_v45, %v2188_v2  ;;  %v391_v23 = vmul.bf16 %v4155_v37, %v4318_v39  ;;  %v392_v31 = vmul.bf16 %v4155_v37, %v4321_v40 }
  0x74   : > { %v2560_v38 = vadd.bf16 %v2179_v22, %v2053_v21  ;;  %v2561_v55 = vadd.bf16 %v2189_v50, %v2054_v6  ;;  %v2707_v56 = vsel %vm4178_vm4, %v2705_v44, %v2706_v4  ;;  %v393_v27 = vmul.bf16 %v4155_v37, %v4344_v61 }
  0x75   : > { %v632_v35 = vshrl.u32 %v391_v23, 16  ;;  %v635_v59 = vshll.u32 %v391_v23, 16  ;;  %v641_v28 = vshll.u32 %v392_v31, 16  ;;  %v645_v1 = vshrl.u32 %v392_v31, 16 }
  0x76   : > { %v2840_v52 = vadd.bf16 %v2704_v34, %v2560_v38  ;;  %v2841_v33 = vadd.bf16 %v2707_v56, %v2561_v55  ;;  %v651_v62 = vshll.u32 %v393_v27, 16  ;;  %v898_v0 = vmul.bf16 %v4130_v26, %v4318_v39 }
  0x77   : > { %v634_v46 = vrot.slane %v632_v35, 4  ;;  %v637_v10 = vrot.slane %v635_v59, 5  ;;  %v643_v42 = vrot.slane %v641_v28, 5  ;;  %v647_v60 = vrot.slane %v645_v1, 4 }
  0x78   : > { %v2872_v47 = vunpack.c.l.bf16 %v2840_v52  ;;  %v2873_v41 = vunpack.c.l.bf16 %v2841_v33  ;;  %v653_v7 = vrot.slane %v651_v62, 5  ;;  %v899_v8 = vmul.bf16 %v4130_v26, %v4321_v40 }
  0x79   : > { %v638_v11 = vor.u32 %v637_v10, %v634_v46  ;;  %v648_v9 = vor.u32 %v647_v60, %v643_v42  ;;  %v900_v20 = vmul.bf16 %v4130_v26, %v4344_v61  ;;  %v3644_v5 = vrot.slane %v898_v0, 9 }
  0x7a   : > { %v2911_v21 = vadd.f32 %v4335_v54, %v2872_v47  ;;  %v2912_v39 = vadd.f32 %v4335_v54, %v2873_v41  ;;  %v1035_v2 = vrot.slane %v899_v8, 5  ;;  %v1175_v3 = vmul.bf16 %v4139_v30, %v4360_v29  ;;  %v4526_v41 = vld [vmem:[%s4118_s12 + $0x84] sm:$0xf] }
  0x7b   : > { %v639_v12 = vrot.slane %v638_v11, 4  ;;  %v649_v6 = vrot.slane %v648_v9, 4  ;;  %v1038_v19 = vrot.slane %v900_v20, 5  ;;  %v1176_v40 = vmul.bf16 %v4139_v30, %v4363_v43 }
  0x7c   : > { %v2943_v45 = vmax.f32 %v2911_v21, 0.0  ;;  %v2944_v4 = vmax.f32 %v2912_v39, 0.0  ;;  %v1036_v61 = vsel %vm4178_vm4, %v3644_v5, %v1035_v2  ;;  %v1037_v34 = vrot.slane %v1035_v2, 4 }
  0x7d   : > { %v644_v44 = vsel %vm4211_vm5, %v639_v12, %v643_v42  ;;  %v654_v22 = vsel %vm4211_vm5, %v649_v6, %v653_v7  ;;  %v1259_v50 = vmul.bf16 %v4188_v53, %v4360_v29  ;;  %v1260_v23 = vmul.bf16 %v4188_v53, %v4363_v43  ;;  %v4529_v7 = vld [vmem:[%s4118_s12 + $0x88] sm:$0xf] }
  0x7e   : > { %v2975_v31 = vmin.f32 %v2943_v45, 6.0  ;;  %v2976_v38 = vmin.f32 %v2944_v4, 6.0  ;;  %v849_v55 = vadd.bf16 %v644_v44, %v339_v49  ;;  %v850_v56 = vadd.bf16 %v654_v22, %v340_v63 }
  0x7f   : > { %v1039_v27 = vsel %vm4178_vm4, %v1037_v34, %v1038_v19  ;;  %v1261_v35 = vmul.bf16 %v4188_v53, %v4374_v51  ;;  %v1497_v59 = vshrl.u32 %v1259_v50, 16  ;;  %v1500_v28 = vshll.u32 %v1259_v50, 16 }
  0x80   : > { %v3006_v1 = vpack.c.bf16 %v2976_v38, %v2975_v31  ;;  %v1132_v52 = vadd.bf16 %v1036_v61, %v849_v55  ;;  %v1133_v33 = vadd.bf16 %v1039_v27, %v850_v56  ;;  %v1506_v62 = vshll.u32 %v1260_v23, 16 }
  0x81   : > { %v1499_v0 = vrot.slane %v1497_v59, 4  ;;  %v1502_v46 = vrot.slane %v1500_v28, 5  ;;  %v1510_v10 = vshrl.u32 %v1260_v23, 16  ;;  %v1516_v42 = vshll.u32 %v1261_v35, 16 }
  0x82   : > { %3746 = vmatmul.mubr.bf16.vlgmr.msra.gmra.mxu0 %v3006_v1  ;;  %v1207_v49 = vadd.bf16 %v1175_v3, %v1132_v52  ;;  %v1208_v63 = vadd.bf16 %v1176_v40, %v1133_v33  ;;  %v1508_v60 = vrot.slane %v1506_v62, 5  ;;  %v1763_v47 = vmul.bf16 %v4142_v32, %v4360_v29  ;;  %v4540_v3 = vld [vmem:[%s4118_s12 + $0x8c] sm:$0x1] }
  0x83   : > { %v1503_v8 = vor.u32 %v1502_v46, %v1499_v0  ;;  %v1512_v11 = vrot.slane %v1510_v10, 4  ;;  %v1518_v9 = vrot.slane %v1516_v42, 5  ;;  %v1764_v20 = vmul.bf16 %v4142_v32, %v4363_v43 }
  0x84   : > { %v1765_v5 = vmul.bf16 %v4142_v32, %v4374_v51  ;;  %v3663_v21 = vrot.slane %v1763_v47, 9  ;;  %v2037_v39 = vmul.bf16 %v4233_v57, %v4526_v41  ;;  %v2038_v2 = vmul.bf16 %v4233_v57, %v4529_v7 }
  0x85   : > { %v1504_v12 = vrot.slane %v1503_v8, 4  ;;  %v1513_v6 = vor.u32 %v1512_v11, %v1508_v60  ;;  %v1897_v19 = vrot.slane %v1764_v20, 5  ;;  %v2121_v40 = vmul.bf16 %v4280_v14, %v4526_v41 }
  0x86   : > { %v1900_v45 = vrot.slane %v1765_v5, 5  ;;  %v2122_v4 = vmul.bf16 %v4280_v14, %v4529_v7  ;;  %v2123_v61 = vmul.bf16 %v4280_v14, %v4540_v3  ;;  %v2625_v34 = vmul.bf16 %v4282_v17, %v4526_v41 }
  0x87   : > { %v1509_v44 = vsel %vm4211_vm5, %v1504_v12, %v1508_v60  ;;  %v1514_v22 = vrot.slane %v1513_v6, 4  ;;  %v1898_v50 = vsel %vm4178_vm4, %v3663_v21, %v1897_v19  ;;  %v1899_v23 = vrot.slane %v1897_v19, 4 }
  0x88   : > { %v1714_v31 = vadd.bf16 %v1509_v44, %v1207_v49  ;;  %v2359_v38 = vshrl.u32 %v2121_v40, 16  ;;  %v2362_v55 = vshll.u32 %v2121_v40, 16  ;;  %v2368_v56 = vshll.u32 %v2122_v4, 16 }
  0x89   : > { %v1519_v27 = vsel %vm4211_vm5, %v1514_v22, %v1518_v9  ;;  %v1901_v35 = vsel %vm4178_vm4, %v1899_v23, %v1900_v45  ;;  %v2372_v59 = vshrl.u32 %v2122_v4, 16  ;;  %v2378_v28 = vshll.u32 %v2123_v61, 16 }
  0x8a   : > { %v1715_v1 = vadd.bf16 %v1519_v27, %v1208_v63  ;;  %v1994_v52 = vadd.bf16 %v1898_v50, %v1714_v31  ;;  %v2361_v33 = vrot.slane %v2359_v38, 4  ;;  %v2364_v62 = vrot.slane %v2362_v55, 5 }
  0x8b   : > { %v2370_v0 = vrot.slane %v2368_v56, 5  ;;  %v2374_v46 = vrot.slane %v2372_v59, 4  ;;  %v2380_v10 = vrot.slane %v2378_v28, 5  ;;  %v2626_v42 = vmul.bf16 %v4282_v17, %v4529_v7 }
  0x8c   : > { %v1995_v49 = vadd.bf16 %v1901_v35, %v1715_v1  ;;  %v2069_v60 = vadd.bf16 %v2037_v39, %v1994_v52  ;;  %v2365_v47 = vor.u32 %v2364_v62, %v2361_v33  ;;  %v2627_v8 = vmul.bf16 %v4282_v17, %v4540_v3 }
  0x8d   : > { %v2375_v11 = vor.u32 %v2374_v46, %v2370_v0  ;;  %v3682_v9 = vrot.slane %v2625_v34, 9  ;;  %v2759_v20 = vrot.slane %v2626_v42, 5  ;;  %v325_v63 = vmul.bf16 %v4127_v24, %v4236_v58 }
  0x8e   : > { %v2070_v5 = vadd.bf16 %v2038_v2, %v1995_v49  ;;  %v2366_v21 = vrot.slane %v2365_v47, 4  ;;  %v2762_v12 = vrot.slane %v2627_v8, 5  ;;  %v326_v6 = vmul.bf16 %v4127_v24, %v4242_v36 }
  0x8f   : > { %v2376_v19 = vrot.slane %v2375_v11, 4  ;;  %v2760_v39 = vsel %vm4178_vm4, %v3682_v9, %v2759_v20  ;;  %v2761_v40 = vrot.slane %v2759_v20, 4  ;;  %v370_v45 = vmul.bf16 %v4155_v37, %v4236_v58 }
  0x90   : > { %v2371_v4 = vsel %vm4211_vm5, %v2366_v21, %v2370_v0  ;;  %v371_v61 = vmul.bf16 %v4155_v37, %v4242_v36  ;;  %v372_v2 = vmul.bf16 %v4155_v37, %v4289_v16  ;;  %v877_v34 = vmul.bf16 %v4130_v26, %v4236_v58 }
  0x91   : > { %v2381_v44 = vsel %vm4211_vm5, %v2376_v19, %v2380_v10  ;;  %v2576_v22 = vadd.bf16 %v2371_v4, %v2069_v60  ;;  %v2763_v50 = vsel %vm4178_vm4, %v2761_v40, %v2762_v12  ;;  %v464_v23 = vshrl.u32 %v370_v45, 16 }
  0x92   : > { %v2577_v31 = vadd.bf16 %v2381_v44, %v2070_v5  ;;  %v467_v38 = vshll.u32 %v370_v45, 16  ;;  %v473_v55 = vshll.u32 %v371_v61, 16  ;;  %v477_v56 = vshrl.u32 %v371_v61, 16 }
  0x93   : > { %v2856_v27 = vadd.bf16 %v2760_v39, %v2576_v22  ;;  %v466_v35 = vrot.slane %v464_v23, 4  ;;  %v483_v59 = vshll.u32 %v372_v2, 16  ;;  %v878_v28 = vmul.bf16 %v4130_v26, %v4242_v36 }
  0x94   : > { %v2857_v1 = vadd.bf16 %v2763_v50, %v2577_v31  ;;  %v469_v58 = vrot.slane %v467_v38, 5  ;;  %v475_v52 = vrot.slane %v473_v55, 5  ;;  %v479_v33 = vrot.slane %v477_v56, 4 }
  0x95   : > { %v2888_v62 = vunpack.c.l.bf16 %v2856_v27  ;;  %v485_v0 = vrot.slane %v483_v59, 5  ;;  %v879_v46 = vmul.bf16 %v4130_v26, %v4289_v16  ;;  %v3637_v10 = vrot.slane %v877_v34, 9 }
  0x96   : > { %v2889_v42 = vunpack.c.l.bf16 %v2857_v1  ;;  %v470_v49 = vor.u32 %v469_v58, %v466_v35  ;;  %v480_v60 = vor.u32 %v479_v33, %v475_v52  ;;  %v986_v47 = vrot.slane %v878_v28, 5 }
  0x97   : > { %v2927_v8 = vadd.f32 %v4335_v54, %v2888_v62  ;;  %v989_v11 = vrot.slane %v879_v46, 5  ;;  %v1161_v36 = vmul.bf16 %v4139_v30, %v4441_v13  ;;  %v1162_v9 = vmul.bf16 %v4139_v30, %v4444_v18  ;;  %v4610_v46 = vld [vmem:[%s4118_s12 + $0x34] sm:$0xf] }
  0x98   : > { %v2928_v20 = vadd.f32 %v4335_v54, %v2889_v42  ;;  %v471_v5 = vrot.slane %v470_v49, 4  ;;  %v481_v21 = vrot.slane %v480_v60, 4  ;;  %v987_v16 = vsel %vm4178_vm4, %v3637_v10, %v986_v47 }
  0x99   : > { %v2959_v12 = vmax.f32 %v2927_v8, 0.0  ;;  %v988_v19 = vrot.slane %v986_v47, 4  ;;  %v1238_v39 = vmul.bf16 %v4188_v53, %v4441_v13  ;;  %v1239_v40 = vmul.bf16 %v4188_v53, %v4444_v18 }
  0x9a   : > { %v2960_v45 = vmax.f32 %v2928_v20, 0.0  ;;  %v476_v4 = vsel %vm4211_vm5, %v471_v5, %v475_v52  ;;  %v486_v61 = vsel %vm4211_vm5, %v481_v21, %v485_v0  ;;  %v1240_v2 = vmul.bf16 %v4188_v53, %v4457_v25  ;;  %v4607_v0 = vld [vmem:[%s4118_s12 + $0x30] sm:$0xf] }
  0x9b   : > { %v2991_v34 = vmin.f32 %v2959_v12, 6.0  ;;  %v835_v44 = vadd.bf16 %v476_v4, %v325_v63  ;;  %v836_v22 = vadd.bf16 %v486_v61, %v326_v6  ;;  %v990_v50 = vsel %vm4178_vm4, %v988_v19, %v989_v11 }
  0x9c   : > { %v2992_v23 = vmin.f32 %v2960_v45, 6.0  ;;  %v1329_v31 = vshrl.u32 %v1238_v39, 16  ;;  %v1332_v38 = vshll.u32 %v1238_v39, 16  ;;  %v1338_v55 = vshll.u32 %v1239_v40, 16 }
  0x9d   : > { %v1118_v56 = vadd.bf16 %v987_v16, %v835_v44  ;;  %v1119_v27 = vadd.bf16 %v990_v50, %v836_v22  ;;  %v1342_v35 = vshrl.u32 %v1239_v40, 16  ;;  %v1348_v59 = vshll.u32 %v1240_v2, 16 }
  0x9e   : > { %v3014_v28 = vpack.c.bf16 %v2992_v23, %v2991_v34  ;;  %v1331_v1 = vrot.slane %v1329_v31, 4  ;;  %v1334_v58 = vrot.slane %v1332_v38, 5  ;;  %v1340_v52 = vrot.slane %v1338_v55, 5 }
  0x9f   : > { %v1193_v63 = vadd.bf16 %v1161_v36, %v1118_v56  ;;  %v1194_v6 = vadd.bf16 %v1162_v9, %v1119_v27  ;;  %v1344_v33 = vrot.slane %v1342_v35, 4  ;;  %v1350_v62 = vrot.slane %v1348_v59, 5  ;;  %v4625_v9 = vld [vmem:[%s4118_s12 + $0x38] sm:$0x1] }
  0xa0   : > { %3762 = vmatmul.mubr.bf16.vlgmr.msra.gmra.mxu1 %v3014_v28  ;;  %v1335_v10 = vor.u32 %v1334_v58, %v1331_v1  ;;  %v1742_v42 = vmul.bf16 %v4142_v32, %v4441_v13  ;;  %v1743_v49 = vmul.bf16 %v4142_v32, %v4444_v18  ;;  %v1744_v60 = vmul.bf16 %v4142_v32, %v4457_v25 }
  0xa1   : > { %v1345_v47 = vor.u32 %v1344_v33, %v1340_v52  ;;  %v2023_v8 = vmul.bf16 %v4233_v57, %v4607_v0  ;;  %v2024_v11 = vmul.bf16 %v4233_v57, %v4610_v46  ;;  %v2100_v36 = vmul.bf16 %v4280_v14, %v4607_v0 }
  0xa2   : > { %v1336_v20 = vrot.slane %v1335_v10, 4  ;;  %v3656_v5 = vrot.slane %v1742_v42, 9  ;;  %v1848_v21 = vrot.slane %v1743_v49, 5  ;;  %v1851_v16 = vrot.slane %v1744_v60, 5 }
  0xa3   : > { %v1346_v12 = vrot.slane %v1345_v47, 4  ;;  %v2101_v19 = vmul.bf16 %v4280_v14, %v4610_v46  ;;  %v2102_v39 = vmul.bf16 %v4280_v14, %v4625_v9  ;;  %v2191_v40 = vshrl.u32 %v2100_v36, 16 }
  0xa4   : > { %v1341_v45 = vsel %vm4211_vm5, %v1336_v20, %v1340_v52  ;;  %v1849_v4 = vsel %vm4178_vm4, %v3656_v5, %v1848_v21  ;;  %v1850_v61 = vrot.slane %v1848_v21, 4  ;;  %v2194_v2 = vshll.u32 %v2100_v36, 16 }
  0xa5   : > { %v1351_v34 = vsel %vm4211_vm5, %v1346_v12, %v1350_v62  ;;  %v1700_v44 = vadd.bf16 %v1341_v45, %v1193_v63  ;;  %v2193_v22 = vrot.slane %v2191_v40, 4  ;;  %v2200_v50 = vshll.u32 %v2101_v19, 16 }
  0xa6   : > { %v1701_v23 = vadd.bf16 %v1351_v34, %v1194_v6  ;;  %v1852_v31 = vsel %vm4178_vm4, %v1850_v61, %v1851_v16  ;;  %v2196_v38 = vrot.slane %v2194_v2, 5  ;;  %v2204_v55 = vshrl.u32 %v2101_v19, 16 }
  0xa7   : > { %v1980_v56 = vadd.bf16 %v1849_v4, %v1700_v44  ;;  %v2202_v27 = vrot.slane %v2200_v50, 5  ;;  %v2210_v35 = vshll.u32 %v2102_v39, 16  ;;  %v2604_v59 = vmul.bf16 %v4282_v17, %v4607_v0 }
  0xa8   : > { %v1981_v28 = vadd.bf16 %v1852_v31, %v1701_v23  ;;  %v2197_v1 = vor.u32 %v2196_v38, %v2193_v22  ;;  %v2206_v58 = vrot.slane %v2204_v55, 4  ;;  %v2605_v52 = vmul.bf16 %v4282_v17, %v4610_v46 }
  0xa9   : > { %v2055_v63 = vadd.bf16 %v2023_v8, %v1980_v56  ;;  %v2212_v33 = vrot.slane %v2210_v35, 5  ;;  %v2606_v6 = vmul.bf16 %v4282_v17, %v4625_v9  ;;  %v3675_v62 = vrot.slane %v2604_v59, 9 }
  0xaa   : > { %v2056_v10 = vadd.bf16 %v2024_v11, %v1981_v28  ;;  %v2198_v42 = vrot.slane %v2197_v1, 4  ;;  %v2207_v49 = vor.u32 %v2206_v58, %v2202_v27  ;;  %v2710_v60 = vrot.slane %v2605_v52, 5 }
  0xab   : > { %v2713_v47 = vrot.slane %v2606_v6, 5  ;;  %v341_v36 = vmul.bf16 %v4127_v24, %v4360_v29  ;;  %v342_v20 = vmul.bf16 %v4127_v24, %v4363_v43  ;;  %v394_v5 = vmul.bf16 %v4155_v37, %v4360_v29 }
  0xac   : > { %v2203_v8 = vsel %vm4211_vm5, %v2198_v42, %v2202_v27  ;;  %v2208_v21 = vrot.slane %v2207_v49, 4  ;;  %v2711_v11 = vsel %vm4178_vm4, %v3675_v62, %v2710_v60  ;;  %v2712_v16 = vrot.slane %v2710_v60, 4 }
  0xad   : > { %v2562_v12 = vadd.bf16 %v2203_v8, %v2055_v63  ;;  %v395_v19 = vmul.bf16 %v4155_v37, %v4363_v43  ;;  %v396_v39 = vmul.bf16 %v4155_v37, %v4374_v51  ;;  %v656_v40 = vshrl.u32 %v394_v5, 16 }
  0xae   : > { %v2213_v45 = vsel %vm4211_vm5, %v2208_v21, %v2212_v33  ;;  %v2714_v4 = vsel %vm4178_vm4, %v2712_v16, %v2713_v47  ;;  %v659_v61 = vshll.u32 %v394_v5, 16  ;;  %v901_v2 = vmul.bf16 %v4130_v26, %v4360_v29 }
  0xaf   : > { %v2563_v34 = vadd.bf16 %v2213_v45, %v2056_v10  ;;  %v2842_v44 = vadd.bf16 %v2711_v11, %v2562_v12  ;;  %v658_v22 = vrot.slane %v656_v40, 4  ;;  %v665_v50 = vshll.u32 %v395_v19, 16 }
  0xb0   : > { %v661_v23 = vrot.slane %v659_v61, 5  ;;  %v669_v31 = vshrl.u32 %v395_v19, 16  ;;  %v675_v38 = vshll.u32 %v396_v39, 16  ;;  %v902_v55 = vmul.bf16 %v4130_v26, %v4363_v43 }
  0xb1   : > { %v2843_v56 = vadd.bf16 %v2714_v4, %v2563_v34  ;;  %v2874_v27 = vunpack.c.l.bf16 %v2842_v44  ;;  %v667_v35 = vrot.slane %v665_v50, 5  ;;  %v903_v59 = vmul.bf16 %v4130_v26, %v4374_v51 }
  0xb2   : > { %v662_v28 = vor.u32 %v661_v23, %v658_v22  ;;  %v671_v1 = vrot.slane %v669_v31, 4  ;;  %v677_v58 = vrot.slane %v675_v38, 5  ;;  %v3645_v29 = vrot.slane %v901_v2, 9 }
  0xb3   : > { %v2875_v52 = vunpack.c.l.bf16 %v2843_v56  ;;  %v2913_v63 = vadd.f32 %v4335_v54, %v2874_v27  ;;  %v1042_v33 = vrot.slane %v902_v55, 5  ;;  %v1045_v6 = vrot.slane %v903_v59, 5  ;;  %v4690_v27 = vld [vmem:[%s4118_s12 + $0x90] sm:$0xf] }
  0xb4   : > { %v663_v62 = vrot.slane %v662_v28, 4  ;;  %v672_v10 = vor.u32 %v671_v1, %v667_v35  ;;  %v1177_v43 = vmul.bf16 %v4139_v30, %v4526_v41  ;;  %v1178_v42 = vmul.bf16 %v4139_v30, %v4529_v7  ;;  %v4695_v1 = vld [vmem:[%s4118_s12 + $0x94] sm:$0xf] }
  0xb5   : > { %v2914_v49 = vadd.f32 %v4335_v54, %v2875_v52  ;;  %v2945_v51 = vmax.f32 %v2913_v63, 0.0  ;;  %v1043_v60 = vsel %vm4178_vm4, %v3645_v29, %v1042_v33  ;;  %v1044_v47 = vrot.slane %v1042_v33, 4 }
  0xb6   : > { %v668_v5 = vsel %vm4211_vm5, %v663_v62, %v667_v35  ;;  %v673_v8 = vrot.slane %v672_v10, 4  ;;  %v1262_v21 = vmul.bf16 %v4188_v53, %v4526_v41  ;;  %v1263_v11 = vmul.bf16 %v4188_v53, %v4529_v7 }
  0xb7   : > { %v2946_v16 = vmax.f32 %v2914_v49, 0.0  ;;  %v2977_v12 = vmin.f32 %v2945_v51, 6.0  ;;  %v851_v19 = vadd.bf16 %v668_v5, %v341_v36  ;;  %v1046_v54 = vsel %vm4178_vm4, %v1044_v47, %v1045_v6 }
  0xb8   : > { %v678_v39 = vsel %vm4211_vm5, %v673_v8, %v677_v58  ;;  %v1264_v40 = vmul.bf16 %v4188_v53, %v4540_v3  ;;  %v1521_v45 = vshrl.u32 %v1262_v21, 16  ;;  %v1524_v4 = vshll.u32 %v1262_v21, 16 }
  0xb9   : > { %v2978_v61 = vmin.f32 %v2946_v16, 6.0  ;;  %v852_v2 = vadd.bf16 %v678_v39, %v342_v20  ;;  %v1134_v34 = vadd.bf16 %v1043_v60, %v851_v19  ;;  %v1530_v44 = vshll.u32 %v1263_v11, 16 }
  0xba   : > { %v1523_v22 = vrot.slane %v1521_v45, 4  ;;  %v1526_v50 = vrot.slane %v1524_v4, 5  ;;  %v1534_v36 = vshrl.u32 %v1263_v11, 16  ;;  %v1540_v23 = vshll.u32 %v1264_v40, 16 }
  0xbb   : > { %v3007_v31 = vpack.c.bf16 %v2978_v61, %v2977_v12  ;;  %v1135_v38 = vadd.bf16 %v1046_v54, %v852_v2  ;;  %v1209_v55 = vadd.bf16 %v1177_v43, %v1134_v34  ;;  %v1532_v56 = vrot.slane %v1530_v44, 5  ;;  %v4706_v43 = vld [vmem:[%s4118_s12 + $0x98] sm:$0x1] }
  0xbc   : > { %v1527_v35 = vor.u32 %v1526_v50, %v1523_v22  ;;  %v1536_v59 = vrot.slane %v1534_v36, 4  ;;  %v1542_v28 = vrot.slane %v1540_v23, 5  ;;  %v1766_v20 = vmul.bf16 %v4142_v32, %v4526_v41 }
  0xbd   : > { %3749 = vmatprep.mubr.bf16.mxu0 %v3007_v31  ;;  %v1210_v58 = vadd.bf16 %v1178_v42, %v1135_v38  ;;  %v1767_v29 = vmul.bf16 %v4142_v32, %v4529_v7  ;;  %v1768_v52 = vmul.bf16 %v4142_v32, %v4540_v3  ;;  %v2039_v63 = vmul.bf16 %v4233_v57, %v4690_v27 }
  0xbe   : > { %v1528_v33 = vrot.slane %v1527_v35, 4  ;;  %v1537_v6 = vor.u32 %v1536_v59, %v1532_v56  ;;  %v3664_v62 = vrot.slane %v1766_v20, 9  ;;  %v2040_v10 = vmul.bf16 %v4233_v57, %v4695_v1 }
  0xbf   : > { %v1904_v49 = vrot.slane %v1767_v29, 5  ;;  %v1907_v51 = vrot.slane %v1768_v52, 5  ;;  %v2124_v42 = vmul.bf16 %v4280_v14, %v4690_v27  ;;  %v2125_v60 = vmul.bf16 %v4280_v14, %v4695_v1 }
  0xc0   : > { %v1533_v47 = vsel %vm4211_vm5, %v1528_v33, %v1532_v56  ;;  %v1538_v5 = vrot.slane %v1537_v6, 4  ;;  %v2126_v8 = vmul.bf16 %v4280_v14, %v4706_v43  ;;  %v2628_v21 = vmul.bf16 %v4282_v17, %v4690_v27 }
  0xc1   : > { %v1716_v11 = vadd.bf16 %v1533_v47, %v1209_v55  ;;  %v1905_v16 = vsel %vm4178_vm4, %v3664_v62, %v1904_v49  ;;  %v1906_v12 = vrot.slane %v1904_v49, 4  ;;  %v2383_v19 = vshrl.u32 %v2124_v42, 16 }
  0xc2   : > { %v1543_v54 = vsel %vm4211_vm5, %v1538_v5, %v1542_v28  ;;  %v2386_v39 = vshll.u32 %v2124_v42, 16  ;;  %v2392_v40 = vshll.u32 %v2125_v60, 16  ;;  %v2396_v45 = vshrl.u32 %v2125_v60, 16 }
  0xc3   : > { %v1717_v4 = vadd.bf16 %v1543_v54, %v1210_v58  ;;  %v1908_v61 = vsel %vm4178_vm4, %v1906_v12, %v1907_v51  ;;  %v1996_v2 = vadd.bf16 %v1905_v16, %v1716_v11  ;;  %v2385_v34 = vrot.slane %v2383_v19, 4 }
  0xc4   : > { %v2388_v44 = vrot.slane %v2386_v39, 5  ;;  %v2394_v22 = vrot.slane %v2392_v40, 5  ;;  %v2398_v50 = vrot.slane %v2396_v45, 4  ;;  %v2402_v36 = vshll.u32 %v2126_v8, 16 }
  0xc5   : > { %v1997_v23 = vadd.bf16 %v1908_v61, %v1717_v4  ;;  %v2071_v31 = vadd.bf16 %v2039_v63, %v1996_v2  ;;  %v2629_v38 = vmul.bf16 %v4282_v17, %v4695_v1  ;;  %v2630_v55 = vmul.bf16 %v4282_v17, %v4706_v43 }
  0xc6   : > { %v2389_v56 = vor.u32 %v2388_v44, %v2385_v34  ;;  %v2399_v35 = vor.u32 %v2398_v50, %v2394_v22  ;;  %v2404_v59 = vrot.slane %v2402_v36, 5  ;;  %v3683_v28 = vrot.slane %v2628_v21, 9 }
  0xc7   : > { %v2072_v20 = vadd.bf16 %v2040_v10, %v1997_v23  ;;  %v2766_v58 = vrot.slane %v2629_v38, 5  ;;  %v2769_v29 = vrot.slane %v2630_v55, 5  ;;  %v327_v52 = vmul.bf16 %v4127_v24, %v4441_v13 }
  0xc8   : > { %v2390_v33 = vrot.slane %v2389_v56, 4  ;;  %v2400_v6 = vrot.slane %v2399_v35, 4  ;;  %v328_v63 = vmul.bf16 %v4127_v24, %v4444_v18  ;;  %v373_v62 = vmul.bf16 %v4155_v37, %v4441_v13 }
  0xc9   : > { %v2767_v49 = vsel %vm4178_vm4, %v3683_v28, %v2766_v58  ;;  %v2768_v51 = vrot.slane %v2766_v58, 4  ;;  %v374_v10 = vmul.bf16 %v4155_v37, %v4444_v18  ;;  %v375_v42 = vmul.bf16 %v4155_v37, %v4457_v25 }
  0xca   : > { %v2395_v60 = vsel %vm4211_vm5, %v2390_v33, %v2394_v22  ;;  %v2405_v47 = vsel %vm4211_vm5, %v2400_v6, %v2404_v59  ;;  %v488_v5 = vshrl.u32 %v373_v62, 16  ;;  %v491_v8 = vshll.u32 %v373_v62, 16 }
  0xcb   : > { %v2578_v21 = vadd.bf16 %v2395_v60, %v2071_v31  ;;  %v2579_v11 = vadd.bf16 %v2405_v47, %v2072_v20  ;;  %v2770_v16 = vsel %vm4178_vm4, %v2768_v51, %v2769_v29  ;;  %v497_v12 = vshll.u32 %v374_v10, 16 }
  0xcc   : > { %v490_v19 = vrot.slane %v488_v5, 4  ;;  %v493_v54 = vrot.slane %v491_v8, 5  ;;  %v501_v39 = vshrl.u32 %v374_v10, 16  ;;  %v507_v40 = vshll.u32 %v375_v42, 16 }
  0xcd   : > { %v2858_v45 = vadd.bf16 %v2767_v49, %v2578_v21  ;;  %v2859_v4 = vadd.bf16 %v2770_v16, %v2579_v11  ;;  %v499_v61 = vrot.slane %v497_v12, 5  ;;  %v880_v2 = vmul.bf16 %v4130_v26, %v4441_v13  ;;  %v4757_v13 = vld [vmem:[%s5785_s3] ss:$0 sm:$0xff] }
  0xce   : > { %v494_v34 = vor.u32 %v493_v54, %v490_v19  ;;  %v503_v44 = vrot.slane %v501_v39, 4  ;;  %v509_v22 = vrot.slane %v507_v40, 5  ;;  %v881_v50 = vmul.bf16 %v4130_v26, %v4444_v18 }
  0xcf   : > { %v2890_v36 = vunpack.c.l.bf16 %v2858_v45  ;;  %v2891_v23 = vunpack.c.l.bf16 %v2859_v4  ;;  %v882_v31 = vmul.bf16 %v4130_v26, %v4457_v25  ;;  %v3638_v38 = vrot.slane %v880_v2, 9 }
  0xd0   : > { %v495_v55 = vrot.slane %v494_v34, 4  ;;  %v504_v56 = vor.u32 %v503_v44, %v499_v61  ;;  %v993_v35 = vrot.slane %v881_v50, 5  ;;  %v1163_v59 = vmul.bf16 %v4139_v30, %v4607_v0 }
  0xd1   : > { %v2929_v28 = vadd.f32 %v4757_v13, %v2890_v36  ;;  %v2930_v18 = vadd.f32 %v4757_v13, %v2891_v23  ;;  %v996_v20 = vrot.slane %v882_v31, 5  ;;  %v1164_v25 = vmul.bf16 %v4139_v30, %v4610_v46  ;;  %v4785_v31 = vld [vmem:[%s4118_s12 + $0x40] sm:$0xf] }
  0xd2   : > { %v500_v58 = vsel %vm4211_vm5, %v495_v55, %v499_v61  ;;  %v505_v29 = vrot.slane %v504_v56, 4  ;;  %v994_v33 = vsel %vm4178_vm4, %v3638_v38, %v993_v35  ;;  %v995_v6 = vrot.slane %v993_v35, 4 }
  0xd3   : > { %v2961_v62 = vmax.f32 %v2929_v28, 0.0  ;;  %v2962_v49 = vmax.f32 %v2930_v18, 0.0  ;;  %v837_v51 = vadd.bf16 %v500_v58, %v327_v52  ;;  %v1241_v10 = vmul.bf16 %v4188_v53, %v4607_v0 }
  0xd4   : > { %v510_v42 = vsel %vm4211_vm5, %v505_v29, %v509_v22  ;;  %v997_v60 = vsel %vm4178_vm4, %v995_v6, %v996_v20  ;;  %v1242_v47 = vmul.bf16 %v4188_v53, %v4610_v46  ;;  %v1243_v5 = vmul.bf16 %v4188_v53, %v4625_v9  ;;  %v4778_v22 = vld [vmem:[%s4118_s12 + $0x3c] sm:$0xf] }
  0xd5   : > { %v2993_v8 = vmin.f32 %v2961_v62, 6.0  ;;  %v2994_v21 = vmin.f32 %v2962_v49, 6.0  ;;  %v838_v11 = vadd.bf16 %v510_v42, %v328_v63  ;;  %v1120_v52 = vadd.bf16 %v994_v33, %v837_v51 }
  0xd6   : > { %v1353_v16 = vshrl.u32 %v1241_v10, 16  ;;  %v1356_v12 = vshll.u32 %v1241_v10, 16  ;;  %v1362_v19 = vshll.u32 %v1242_v47, 16  ;;  %v1366_v54 = vshrl.u32 %v1242_v47, 16 }
  0xd7   : > { %v3015_v39 = vpack.c.bf16 %v2994_v21, %v2993_v8  ;;  %v1121_v40 = vadd.bf16 %v997_v60, %v838_v11  ;;  %v1195_v45 = vadd.bf16 %v1163_v59, %v1120_v52  ;;  %v1372_v4 = vshll.u32 %v1243_v5, 16 }
  0xd8   : > { %v1355_v61 = vrot.slane %v1353_v16, 4  ;;  %v1358_v2 = vrot.slane %v1356_v12, 5  ;;  %v1364_v34 = vrot.slane %v1362_v19, 5  ;;  %v1368_v44 = vrot.slane %v1366_v54, 4 }
  0xd9   : > { %3765 = vmatprep.mubr.bf16.mxu1 %v3015_v39  ;;  %v1196_v50 = vadd.bf16 %v1164_v25, %v1121_v40  ;;  %v1374_v63 = vrot.slane %v1372_v4, 5  ;;  %v1745_v36 = vmul.bf16 %v4142_v32, %v4607_v0  ;;  %v1746_v23 = vmul.bf16 %v4142_v32, %v4610_v46  ;;  %v4796_v25 = vld [vmem:[%s4118_s12 + $0x44] sm:$0x1] }
  0xda   : > { %v1359_v38 = vor.u32 %v1358_v2, %v1355_v61  ;;  %v1369_v55 = vor.u32 %v1368_v44, %v1364_v34  ;;  %v1747_v56 = vmul.bf16 %v4142_v32, %v4625_v9  ;;  %v2025_v35 = vmul.bf16 %v4233_v57, %v4778_v22 }
  0xdb   : > { %v3657_v59 = vrot.slane %v1745_v36, 9  ;;  %v1855_v28 = vrot.slane %v1746_v23, 5  ;;  %v2026_v18 = vmul.bf16 %v4233_v57, %v4785_v31  ;;  %v2103_v20 = vmul.bf16 %v4280_v14, %v4778_v22 }
  0xdc   : > { %v1360_v58 = vrot.slane %v1359_v38, 4  ;;  %v1370_v29 = vrot.slane %v1369_v55, 4  ;;  %v1858_v33 = vrot.slane %v1747_v56, 5  ;;  %v2104_v6 = vmul.bf16 %v4280_v14, %v4785_v31 }
  0xdd   : > { %v1856_v62 = vsel %vm4178_vm4, %v3657_v59, %v1855_v28  ;;  %v1857_v49 = vrot.slane %v1855_v28, 4  ;;  %v2105_v51 = vmul.bf16 %v4280_v14, %v4796_v25  ;;  %v2215_v10 = vshrl.u32 %v2103_v20, 16 }
  0xde   : > { %v1365_v42 = vsel %vm4211_vm5, %v1360_v58, %v1364_v34  ;;  %v1375_v60 = vsel %vm4211_vm5, %v1370_v29, %v1374_v63  ;;  %v2218_v47 = vshll.u32 %v2103_v20, 16  ;;  %v2224_v5 = vshll.u32 %v2104_v6, 16 }
  0xdf   : > { %v1702_v8 = vadd.bf16 %v1365_v42, %v1195_v45  ;;  %v1703_v21 = vadd.bf16 %v1375_v60, %v1196_v50  ;;  %v1859_v11 = vsel %vm4178_vm4, %v1857_v49, %v1858_v33  ;;  %v2217_v52 = vrot.slane %v2215_v10, 4 }
  0xe0   : > { %v2220_v16 = vrot.slane %v2218_v47, 5  ;;  %v2226_v12 = vrot.slane %v2224_v5, 5  ;;  %v2228_v19 = vshrl.u32 %v2104_v6, 16  ;;  %v2234_v54 = vshll.u32 %v2105_v51, 16 }
  0xe1   : > { %v1982_v39 = vadd.bf16 %v1856_v62, %v1702_v8  ;;  %v1983_v40 = vadd.bf16 %v1859_v11, %v1703_v21  ;;  %v2607_v4 = vmul.bf16 %v4282_v17, %v4778_v22  ;;  %v2608_v61 = vmul.bf16 %v4282_v17, %v4785_v31 }
  0xe2   : > { %v2221_v2 = vor.u32 %v2220_v16, %v2217_v52  ;;  %v2230_v34 = vrot.slane %v2228_v19, 4  ;;  %v2236_v45 = vrot.slane %v2234_v54, 5  ;;  %v2609_v44 = vmul.bf16 %v4282_v17, %v4796_v25 }
  0xe3   : > { %v2057_v50 = vadd.bf16 %v2025_v35, %v1982_v39  ;;  %v2058_v63 = vadd.bf16 %v2026_v18, %v1983_v40  ;;  %v3676_v36 = vrot.slane %v2607_v4, 9  ;;  %v2717_v23 = vrot.slane %v2608_v61, 5 }
  0xe4   : > { %v2222_v38 = vrot.slane %v2221_v2, 4  ;;  %v2231_v55 = vor.u32 %v2230_v34, %v2226_v12  ;;  %v2720_v56 = vrot.slane %v2609_v44, 5  ;;  %v343_v59 = vmul.bf16 %v4127_v24, %v4526_v41 }
  0xe5   : > { %v2718_v28 = vsel %vm4178_vm4, %v3676_v36, %v2717_v23  ;;  %v2719_v20 = vrot.slane %v2717_v23, 4  ;;  %v344_v58 = vmul.bf16 %v4127_v24, %v4529_v7  ;;  %v397_v29 = vmul.bf16 %v4155_v37, %v4526_v41 }
  0xe6   : > { %v2227_v35 = vsel %vm4211_vm5, %v2222_v38, %v2226_v12  ;;  %v2232_v18 = vrot.slane %v2231_v55, 4  ;;  %v398_v33 = vmul.bf16 %v4155_v37, %v4529_v7  ;;  %v399_v6 = vmul.bf16 %v4155_v37, %v4540_v3 }
  0xe7   : > { %v2564_v62 = vadd.bf16 %v2227_v35, %v2057_v50  ;;  %v2721_v49 = vsel %vm4178_vm4, %v2719_v20, %v2720_v56  ;;  %v680_v51 = vshrl.u32 %v397_v29, 16  ;;  %v683_v10 = vshll.u32 %v397_v29, 16 }
  0xe8   : > { %v2237_v42 = vsel %vm4211_vm5, %v2232_v18, %v2236_v45  ;;  %v689_v60 = vshll.u32 %v398_v33, 16  ;;  %v693_v47 = vshrl.u32 %v398_v33, 16  ;;  %v699_v5 = vshll.u32 %v399_v6, 16 }
  0xe9   : > { %v2565_v8 = vadd.bf16 %v2237_v42, %v2058_v63  ;;  %v2844_v21 = vadd.bf16 %v2718_v28, %v2564_v62  ;;  %v682_v11 = vrot.slane %v680_v51, 4  ;;  %v685_v52 = vrot.slane %v683_v10, 5 }
  0xea   : > { %v691_v16 = vrot.slane %v689_v60, 5  ;;  %v695_v12 = vrot.slane %v693_v47, 4  ;;  %v701_v19 = vrot.slane %v699_v5, 5  ;;  %v904_v54 = vmul.bf16 %v4130_v26, %v4526_v41 }
  0xeb   : > { %v2845_v39 = vadd.bf16 %v2721_v49, %v2565_v8  ;;  %v2876_v40 = vunpack.c.l.bf16 %v2844_v21  ;;  %v686_v4 = vor.u32 %v685_v52, %v682_v11  ;;  %v905_v61 = vmul.bf16 %v4130_v26, %v4529_v7 }
  0xec   : > { %v696_v2 = vor.u32 %v695_v12, %v691_v16  ;;  %v906_v34 = vmul.bf16 %v4130_v26, %v4540_v3  ;;  %v3646_v45 = vrot.slane %v904_v54, 9  ;;  %v1179_v44 = vmul.bf16 %v4139_v30, %v4690_v27 }
  0xed   : > { %v2877_v50 = vunpack.c.l.bf16 %v2845_v39  ;;  %v2915_v63 = vadd.f32 %v4757_v13, %v2876_v40  ;;  %v687_v36 = vrot.slane %v686_v4, 4  ;;  %v1049_v23 = vrot.slane %v905_v61, 5  ;;  %v4861_v40 = vld [vmem:[%s4118_s12 + $0x9c] sm:$0xf]  ;;  %v4864_v4 = vld [vmem:[%s4118_s12 + $0xa0] sm:$0xf] }
  0xee   : > { %v697_v41 = vrot.slane %v696_v2, 4  ;;  %v1052_v38 = vrot.slane %v906_v34, 5  ;;  %v1180_v55 = vmul.bf16 %v4139_v30, %v4695_v1  ;;  %v1265_v7 = vmul.bf16 %v4188_v53, %v4690_v27 }
  0xef   : > { %v2916_v56 = vadd.f32 %v4757_v13, %v2877_v50  ;;  %v2947_v3 = vmax.f32 %v2915_v63, 0.0  ;;  %v692_v28 = vsel %vm4211_vm5, %v687_v36, %v691_v16  ;;  %v1050_v20 = vsel %vm4178_vm4, %v3646_v45, %v1049_v23 }
  0xf0   : > { %v702_v29 = vsel %vm4211_vm5, %v697_v41, %v701_v19  ;;  %v853_v35 = vadd.bf16 %v692_v28, %v343_v59  ;;  %v1051_v18 = vrot.slane %v1049_v23, 4  ;;  %v1266_v33 = vmul.bf16 %v4188_v53, %v4695_v1  ;;  %v4877_v23 = vld [vmem:[%s4118_s12 + $0xa4] sm:$0x1] }
  0xf1   : > { %v2948_v6 = vmax.f32 %v2916_v56, 0.0  ;;  %v2979_v62 = vmin.f32 %v2947_v3, 6.0  ;;  %v854_v49 = vadd.bf16 %v702_v29, %v344_v58  ;;  %v1267_v51 = vmul.bf16 %v4188_v53, %v4706_v43 }
  0xf2   : > { %v1053_v10 = vsel %vm4178_vm4, %v1051_v18, %v1052_v38  ;;  %v1136_v42 = vadd.bf16 %v1050_v20, %v853_v35  ;;  %v1545_v60 = vshrl.u32 %v1265_v7, 16  ;;  %v1548_v47 = vshll.u32 %v1265_v7, 16 }
  0xf3   : > { %v2980_v5 = vmin.f32 %v2948_v6, 6.0  ;;  %v1137_v59 = vadd.bf16 %v1053_v10, %v854_v49  ;;  %v1554_v8 = vshll.u32 %v1266_v33, 16  ;;  %v1558_v21 = vshrl.u32 %v1266_v33, 16 }
  0xf4   : > { %v1211_v11 = vadd.bf16 %v1179_v44, %v1136_v42  ;;  %v1547_v52 = vrot.slane %v1545_v60, 4  ;;  %v1550_v16 = vrot.slane %v1548_v47, 5  ;;  %v1564_v12 = vshll.u32 %v1267_v51, 16 }
  0xf5   : > { %v3008_v58 = vpack.c.bf16 %v2980_v5, %v2979_v62  ;;  %v1212_v19 = vadd.bf16 %v1180_v55, %v1137_v59  ;;  %v1556_v54 = vrot.slane %v1554_v8, 5  ;;  %v1560_v39 = vrot.slane %v1558_v21, 4 }
  0xf6   : > { %v1551_v61 = vor.u32 %v1550_v16, %v1547_v52  ;;  %v1566_v2 = vrot.slane %v1564_v12, 5  ;;  %v1769_v34 = vmul.bf16 %v4142_v32, %v4690_v27  ;;  %v1770_v45 = vmul.bf16 %v4142_v32, %v4695_v1 }
  0xf7   : > { %3750 = vmatmul.mubr.bf16.gmra.mxu0 %v3008_v58  ;;  %v1561_v44 = vor.u32 %v1560_v39, %v1556_v54  ;;  %v1771_v50 = vmul.bf16 %v4142_v32, %v4706_v43  ;;  %v2041_v63 = vmul.bf16 %v4233_v57, %v4861_v40  ;;  %v2042_v36 = vmul.bf16 %v4233_v57, %v4864_v4 }
  0xf8   : > { %v1552_v41 = vrot.slane %v1551_v61, 4  ;;  %v3665_v38 = vrot.slane %v1769_v34, 9  ;;  %v1911_v55 = vrot.slane %v1770_v45, 5  ;;  %v2127_v7 = vmul.bf16 %v4280_v14, %v4861_v40 }
  0xf9   : > { %v1562_v56 = vrot.slane %v1561_v44, 4  ;;  %v1914_v3 = vrot.slane %v1771_v50, 5  ;;  %v2128_v28 = vmul.bf16 %v4280_v14, %v4864_v4  ;;  %v2129_v20 = vmul.bf16 %v4280_v14, %v4877_v23 }
  0xfa   : > { %v1557_v29 = vsel %vm4211_vm5, %v1552_v41, %v1556_v54  ;;  %v1912_v35 = vsel %vm4178_vm4, %v3665_v38, %v1911_v55  ;;  %v1913_v18 = vrot.slane %v1911_v55, 4  ;;  %v2407_v33 = vshrl.u32 %v2127_v7, 16 }
  0xfb   : > { %v1567_v6 = vsel %vm4211_vm5, %v1562_v56, %v1566_v2  ;;  %v1718_v62 = vadd.bf16 %v1557_v29, %v1211_v11  ;;  %v2410_v49 = vshll.u32 %v2127_v7, 16  ;;  %v2416_v51 = vshll.u32 %v2128_v28, 16 }
  0xfc   : > { %v1719_v10 = vadd.bf16 %v1567_v6, %v1212_v19  ;;  %v1915_v42 = vsel %vm4178_vm4, %v1913_v18, %v1914_v3  ;;  %v2409_v60 = vrot.slane %v2407_v33, 4  ;;  %v2420_v47 = vshrl.u32 %v2128_v28, 16 }
  0xfd   : > { %v1998_v5 = vadd.bf16 %v1912_v35, %v1718_v62  ;;  %v2412_v59 = vrot.slane %v2410_v49, 5  ;;  %v2418_v8 = vrot.slane %v2416_v51, 5  ;;  %v2426_v21 = vshll.u32 %v2129_v20, 16 }
  0xfe   : > { %v1999_v52 = vadd.bf16 %v1915_v42, %v1719_v10  ;;  %v2422_v16 = vrot.slane %v2420_v47, 4  ;;  %v2631_v12 = vmul.bf16 %v4282_v17, %v4861_v40  ;;  %v2632_v11 = vmul.bf16 %v4282_v17, %v4864_v4 }
  0xff   : > { %v2073_v58 = vadd.bf16 %v2041_v63, %v1998_v5  ;;  %v2413_v54 = vor.u32 %v2412_v59, %v2409_v60  ;;  %v2428_v19 = vrot.slane %v2426_v21, 5  ;;  %v2633_v39 = vmul.bf16 %v4282_v17, %v4877_v23 }
 0x100   : > { %v2074_v61 = vadd.bf16 %v2042_v36, %v1999_v52  ;;  %v2423_v2 = vor.u32 %v2422_v16, %v2418_v8  ;;  %v3684_v34 = vrot.slane %v2631_v12, 9  ;;  %v2773_v45 = vrot.slane %v2632_v11, 5 }
 0x101   : > { %v2414_v44 = vrot.slane %v2413_v54, 4  ;;  %v2776_v50 = vrot.slane %v2633_v39, 5  ;;  %v329_v41 = vmul.bf16 %v4127_v24, %v4607_v0  ;;  %v330_v38 = vmul.bf16 %v4127_v24, %v4610_v46 }
 0x102   : > { %v2424_v55 = vrot.slane %v2423_v2, 4  ;;  %v2774_v63 = vsel %vm4178_vm4, %v3684_v34, %v2773_v45  ;;  %v2775_v7 = vrot.slane %v2773_v45, 4  ;;  %v376_v56 = vmul.bf16 %v4155_v37, %v4607_v0 }
 0x103   : > { %v2419_v36 = vsel %vm4211_vm5, %v2414_v44, %v2418_v8  ;;  %v377_v3 = vmul.bf16 %v4155_v37, %v4610_v46  ;;  %v378_v28 = vmul.bf16 %v4155_v37, %v4625_v9  ;;  %v883_v20 = vmul.bf16 %v4130_v26, %v4607_v0 }
 0x104   : > { %v2429_v29 = vsel %vm4211_vm5, %v2424_v55, %v2428_v19  ;;  %v2580_v35 = vadd.bf16 %v2419_v36, %v2073_v58  ;;  %v2777_v18 = vsel %vm4178_vm4, %v2775_v7, %v2776_v50  ;;  %v512_v33 = vshrl.u32 %v376_v56, 16 }
 0x105   : > { %v2581_v6 = vadd.bf16 %v2429_v29, %v2074_v61  ;;  %v515_v62 = vshll.u32 %v376_v56, 16  ;;  %v521_v49 = vshll.u32 %v377_v3, 16  ;;  %v525_v51 = vshrl.u32 %v377_v3, 16 }
 0x106   : > { %v2860_v10 = vadd.bf16 %v2774_v63, %v2580_v35  ;;  %v514_v42 = vrot.slane %v512_v33, 4  ;;  %v531_v60 = vshll.u32 %v378_v28, 16  ;;  %v884_v47 = vmul.bf16 %v4130_v26, %v4610_v46 }
 0x107   : > { %v2861_v5 = vadd.bf16 %v2777_v18, %v2581_v6  ;;  %v517_v0 = vrot.slane %v515_v62, 5  ;;  %v523_v59 = vrot.slane %v521_v49, 5  ;;  %v527_v8 = vrot.slane %v525_v51, 4 }
 0x108   : > { %v2892_v21 = vunpack.c.l.bf16 %v2860_v10  ;;  %v533_v52 = vrot.slane %v531_v60, 5  ;;  %v885_v16 = vmul.bf16 %v4130_v26, %v4625_v9  ;;  %v3639_v12 = vrot.slane %v883_v20, 9 }
 0x109   : > { %v2893_v11 = vunpack.c.l.bf16 %v2861_v5  ;;  %v518_v58 = vor.u32 %v517_v0, %v514_v42  ;;  %v528_v54 = vor.u32 %v527_v8, %v523_v59  ;;  %v1000_v19 = vrot.slane %v884_v47, 5 }
 0x10a   : > { %v2931_v39 = vadd.f32 %v4757_v13, %v2892_v21  ;;  %v1003_v61 = vrot.slane %v885_v16, 5  ;;  %v1165_v46 = vmul.bf16 %v4139_v30, %v4778_v22  ;;  %v1166_v2 = vmul.bf16 %v4139_v30, %v4785_v31  ;;  %v4947_v16 = vld [vmem:[%s4118_s12 + $0x4c] sm:$0xf] }
 0x10b   : > { %v2932_v34 = vadd.f32 %v4757_v13, %v2893_v11  ;;  %v519_v45 = vrot.slane %v518_v58, 4  ;;  %v529_v44 = vrot.slane %v528_v54, 4  ;;  %v1001_v9 = vsel %vm4178_vm4, %v3639_v12, %v1000_v19 }
 0x10c   : > { %v2963_v50 = vmax.f32 %v2931_v39, 0.0  ;;  %v1002_v55 = vrot.slane %v1000_v19, 4  ;;  %v1244_v63 = vmul.bf16 %v4188_v53, %v4778_v22  ;;  %v1245_v7 = vmul.bf16 %v4188_v53, %v4785_v31 }
 0x10d   : > { %v2964_v56 = vmax.f32 %v2932_v34, 0.0  ;;  %v524_v36 = vsel %vm4211_vm5, %v519_v45, %v523_v59  ;;  %v534_v3 = vsel %vm4211_vm5, %v529_v44, %v533_v52  ;;  %v1246_v28 = vmul.bf16 %v4188_v53, %v4796_v25  ;;  %v4944_v52 = vld [vmem:[%s4118_s12 + $0x48] sm:$0xf] }
 0x10e   : > { %v2995_v20 = vmin.f32 %v2963_v50, 6.0  ;;  %v839_v29 = vadd.bf16 %v524_v36, %v329_v41  ;;  %v840_v35 = vadd.bf16 %v534_v3, %v330_v38  ;;  %v1004_v18 = vsel %vm4178_vm4, %v1002_v55, %v1003_v61 }
 0x10f   : > { %v2996_v33 = vmin.f32 %v2964_v56, 6.0  ;;  %v1377_v6 = vshrl.u32 %v1244_v63, 16  ;;  %v1380_v62 = vshll.u32 %v1244_v63, 16  ;;  %v1386_v49 = vshll.u32 %v1245_v7, 16 }
 0x110   : > { %v1122_v51 = vadd.bf16 %v1001_v9, %v839_v29  ;;  %v1123_v10 = vadd.bf16 %v1004_v18, %v840_v35  ;;  %v1390_v42 = vshrl.u32 %v1245_v7, 16  ;;  %v1396_v60 = vshll.u32 %v1246_v28, 16 }
 0x111   : > { %v3016_v47 = vpack.c.bf16 %v2996_v33, %v2995_v20  ;;  %v1379_v5 = vrot.slane %v1377_v6, 4  ;;  %v1382_v0 = vrot.slane %v1380_v62, 5  ;;  %v1388_v59 = vrot.slane %v1386_v49, 5 }
 0x112   : > { %v1197_v41 = vadd.bf16 %v1165_v46, %v1122_v51  ;;  %v1198_v38 = vadd.bf16 %v1166_v2, %v1123_v10  ;;  %v1392_v8 = vrot.slane %v1390_v42, 4  ;;  %v1398_v21 = vrot.slane %v1396_v60, 5  ;;  %v4962_v2 = vld [vmem:[%s4118_s12 + $0x50] sm:$0x1] }
 0x113   : > { %3766 = vmatmul.mubr.bf16.gmra.mxu1 %v3016_v47  ;;  %v1383_v12 = vor.u32 %v1382_v0, %v1379_v5  ;;  %v1748_v11 = vmul.bf16 %v4142_v32, %v4778_v22  ;;  %v1749_v58 = vmul.bf16 %v4142_v32, %v4785_v31  ;;  %v1750_v54 = vmul.bf16 %v4142_v32, %v4796_v25 }
 0x114   : > { %v1393_v19 = vor.u32 %v1392_v8, %v1388_v59  ;;  %v2027_v39 = vmul.bf16 %v4233_v57, %v4944_v52  ;;  %v2028_v61 = vmul.bf16 %v4233_v57, %v4947_v16  ;;  %v2106_v46 = vmul.bf16 %v4280_v14, %v4944_v52 }
 0x115   : > { %v1384_v34 = vrot.slane %v1383_v12, 4  ;;  %v3658_v45 = vrot.slane %v1748_v11, 9  ;;  %v1862_v44 = vrot.slane %v1749_v58, 5  ;;  %v1865_v9 = vrot.slane %v1750_v54, 5 }
 0x116   : > { %v1394_v50 = vrot.slane %v1393_v19, 4  ;;  %v2107_v55 = vmul.bf16 %v4280_v14, %v4947_v16  ;;  %v2108_v63 = vmul.bf16 %v4280_v14, %v4962_v2  ;;  %v2239_v7 = vshrl.u32 %v2106_v46, 16 }
 0x117   : > { %v1389_v56 = vsel %vm4211_vm5, %v1384_v34, %v1388_v59  ;;  %v1863_v36 = vsel %vm4178_vm4, %v3658_v45, %v1862_v44  ;;  %v1864_v3 = vrot.slane %v1862_v44, 4  ;;  %v2242_v28 = vshll.u32 %v2106_v46, 16 }
 0x118   : > { %v1399_v20 = vsel %vm4211_vm5, %v1394_v50, %v1398_v21  ;;  %v1704_v29 = vadd.bf16 %v1389_v56, %v1197_v41  ;;  %v2241_v35 = vrot.slane %v2239_v7, 4  ;;  %v2248_v18 = vshll.u32 %v2107_v55, 16 }
 0x119   : > { %v1705_v33 = vadd.bf16 %v1399_v20, %v1198_v38  ;;  %v1866_v6 = vsel %vm4178_vm4, %v1864_v3, %v1865_v9  ;;  %v2244_v62 = vrot.slane %v2242_v28, 5  ;;  %v2252_v49 = vshrl.u32 %v2107_v55, 16 }
 0x11a   : > { %v1984_v51 = vadd.bf16 %v1863_v36, %v1704_v29  ;;  %v2250_v10 = vrot.slane %v2248_v18, 5  ;;  %v2258_v42 = vshll.u32 %v2108_v63, 16  ;;  %v2610_v60 = vmul.bf16 %v4282_v17, %v4944_v52 }
 0x11b   : > { %v1985_v47 = vadd.bf16 %v1866_v6, %v1705_v33  ;;  %v2245_v5 = vor.u32 %v2244_v62, %v2241_v35  ;;  %v2254_v0 = vrot.slane %v2252_v49, 4  ;;  %v2611_v59 = vmul.bf16 %v4282_v17, %v4947_v16 }
 0x11c   : > { %v2059_v41 = vadd.bf16 %v2027_v39, %v1984_v51  ;;  %v2260_v8 = vrot.slane %v2258_v42, 5  ;;  %v2612_v38 = vmul.bf16 %v4282_v17, %v4962_v2  ;;  %v3677_v21 = vrot.slane %v2610_v60, 9 }
 0x11d   : > { %v2060_v12 = vadd.bf16 %v2028_v61, %v1985_v47  ;;  %v2246_v11 = vrot.slane %v2245_v5, 4  ;;  %v2255_v58 = vor.u32 %v2254_v0, %v2250_v10  ;;  %v2724_v54 = vrot.slane %v2611_v59, 5 }
 0x11e   : > { %v2727_v19 = vrot.slane %v2612_v38, 5  ;;  %v345_v46 = vmul.bf16 %v4127_v24, %v4690_v27  ;;  %v346_v34 = vmul.bf16 %v4127_v24, %v4695_v1  ;;  %v400_v45 = vmul.bf16 %v4155_v37, %v4690_v27 }
 0x11f   : > { %v2251_v39 = vsel %vm4211_vm5, %v2246_v11, %v2250_v10  ;;  %v2256_v44 = vrot.slane %v2255_v58, 4  ;;  %v2725_v61 = vsel %vm4178_vm4, %v3677_v21, %v2724_v54  ;;  %v2726_v9 = vrot.slane %v2724_v54, 4 }
 0x120   : > { %v2566_v50 = vadd.bf16 %v2251_v39, %v2059_v41  ;;  %v401_v55 = vmul.bf16 %v4155_v37, %v4695_v1  ;;  %v402_v63 = vmul.bf16 %v4155_v37, %v4706_v43  ;;  %v704_v7 = vshrl.u32 %v400_v45, 16 }
 0x121   : > { %v2261_v56 = vsel %vm4211_vm5, %v2256_v44, %v2260_v8  ;;  %v2728_v36 = vsel %vm4178_vm4, %v2726_v9, %v2727_v19  ;;  %v707_v3 = vshll.u32 %v400_v45, 16  ;;  %v907_v28 = vmul.bf16 %v4130_v26, %v4690_v27 }
 0x122   : > { %v2567_v20 = vadd.bf16 %v2261_v56, %v2060_v12  ;;  %v2846_v29 = vadd.bf16 %v2725_v61, %v2566_v50  ;;  %v706_v35 = vrot.slane %v704_v7, 4  ;;  %v713_v18 = vshll.u32 %v401_v55, 16 }
 0x123   : > { %v709_v33 = vrot.slane %v707_v3, 5  ;;  %v717_v6 = vshrl.u32 %v401_v55, 16  ;;  %v723_v62 = vshll.u32 %v402_v63, 16  ;;  %v908_v49 = vmul.bf16 %v4130_v26, %v4695_v1 }
 0x124   : > { %v2847_v51 = vadd.bf16 %v2728_v36, %v2567_v20  ;;  %v2878_v10 = vunpack.c.l.bf16 %v2846_v29  ;;  %v715_v42 = vrot.slane %v713_v18, 5  ;;  %v909_v60 = vmul.bf16 %v4130_v26, %v4706_v43 }
 0x125   : > { %v710_v47 = vor.u32 %v709_v33, %v706_v35  ;;  %v719_v5 = vrot.slane %v717_v6, 4  ;;  %v725_v0 = vrot.slane %v723_v62, 5  ;;  %v3647_v27 = vrot.slane %v907_v28, 9 }
 0x126   : > { %v2879_v59 = vunpack.c.l.bf16 %v2847_v51  ;;  %v2917_v41 = vadd.f32 %v4757_v13, %v2878_v10  ;;  %v1056_v8 = vrot.slane %v908_v49, 5  ;;  %v1059_v38 = vrot.slane %v909_v60, 5 }
 0x127   : > { %v711_v21 = vrot.slane %v710_v47, 4  ;;  %v720_v12 = vor.u32 %v719_v5, %v715_v42  ;;  %v1181_v1 = vmul.bf16 %v4139_v30, %v4861_v40  ;;  %v1182_v11 = vmul.bf16 %v4139_v30, %v4864_v4 }
 0x128   : > { %v2918_v58 = vadd.f32 %v4757_v13, %v2879_v59  ;;  %v2949_v43 = vmax.f32 %v2917_v41, 0.0  ;;  %v1057_v54 = vsel %vm4178_vm4, %v3647_v27, %v1056_v8  ;;  %v1058_v19 = vrot.slane %v1056_v8, 4 }
 0x129   : > { %v716_v45 = vsel %vm4211_vm5, %v711_v21, %v715_v42  ;;  %v721_v39 = vrot.slane %v720_v12, 4  ;;  %v1268_v44 = vmul.bf16 %v4188_v53, %v4861_v40  ;;  %v1269_v61 = vmul.bf16 %v4188_v53, %v4864_v4  ;;  %v5027_v42 = vld [vmem:[%s4118_s12 + $0xa8] sm:$0xf] }
 0x12a   : > { %v2950_v9 = vmax.f32 %v2918_v58, 0.0  ;;  %v2981_v50 = vmin.f32 %v2949_v43, 6.0  ;;  %v855_v55 = vadd.bf16 %v716_v45, %v345_v46  ;;  %v1060_v63 = vsel %vm4178_vm4, %v1058_v19, %v1059_v38  ;;  %v5043_v58 = vld [vmem:[%s4118_s12 + $0xb0] sm:$0x1] }
 0x12b   : > { %v726_v7 = vsel %vm4211_vm5, %v721_v39, %v725_v0  ;;  %v1270_v56 = vmul.bf16 %v4188_v53, %v4877_v23  ;;  %v1569_v36 = vshrl.u32 %v1268_v44, 16  ;;  %v1572_v3 = vshll.u32 %v1268_v44, 16  ;;  %v5032_v0 = vld [vmem:[%s4118_s12 + $0xac] sm:$0xf] }
 0x12c   : > { %v2982_v28 = vmin.f32 %v2950_v9, 6.0  ;;  %v856_v20 = vadd.bf16 %v726_v7, %v346_v34  ;;  %v1138_v29 = vadd.bf16 %v1057_v54, %v855_v55  ;;  %v1578_v35 = vshll.u32 %v1269_v61, 16 }
 0x12d   : > { %v1571_v18 = vrot.slane %v1569_v36, 4  ;;  %v1574_v33 = vrot.slane %v1572_v3, 5  ;;  %v1582_v46 = vshrl.u32 %v1269_v61, 16  ;;  %v1588_v6 = vshll.u32 %v1270_v56, 16 }
 0x12e   : > { %v3009_v62 = vpack.c.bf16 %v2982_v28, %v2981_v50  ;;  %v1139_v49 = vadd.bf16 %v1060_v63, %v856_v20  ;;  %v1213_v51 = vadd.bf16 %v1181_v1, %v1138_v29  ;;  %v1580_v10 = vrot.slane %v1578_v35, 5 }
 0x12f   : > { %v1575_v60 = vor.u32 %v1574_v33, %v1571_v18  ;;  %v1584_v47 = vrot.slane %v1582_v46, 4  ;;  %v1590_v5 = vrot.slane %v1588_v6, 5  ;;  %v1772_v34 = vmul.bf16 %v4142_v32, %v4861_v40 }
 0x130   : > { %3753 = vmatprep.mubr.bf16.mxu0 %v3009_v62  ;;  %v1214_v27 = vadd.bf16 %v1182_v11, %v1139_v49  ;;  %v1773_v59 = vmul.bf16 %v4142_v32, %v4864_v4  ;;  %v1774_v41 = vmul.bf16 %v4142_v32, %v4877_v23  ;;  %v2043_v8 = vmul.bf16 %v4233_v57, %v5027_v42 }
 0x131   : > { %v1576_v38 = vrot.slane %v1575_v60, 4  ;;  %v1585_v21 = vor.u32 %v1584_v47, %v1580_v10  ;;  %v3666_v12 = vrot.slane %v1772_v34, 9  ;;  %v2044_v1 = vmul.bf16 %v4233_v57, %v5032_v0 }
 0x132   : > { %v1918_v43 = vrot.slane %v1773_v59, 5  ;;  %v1921_v54 = vrot.slane %v1774_v41, 5  ;;  %v2130_v11 = vmul.bf16 %v4280_v14, %v5027_v42  ;;  %v2131_v19 = vmul.bf16 %v4280_v14, %v5032_v0 }
 0x133   : > { %v1581_v45 = vsel %vm4211_vm5, %v1576_v38, %v1580_v10  ;;  %v1586_v39 = vrot.slane %v1585_v21, 4  ;;  %v2132_v44 = vmul.bf16 %v4280_v14, %v5043_v58  ;;  %v2634_v61 = vmul.bf16 %v4282_v17, %v5027_v42 }
 0x134   : > { %v1720_v9 = vadd.bf16 %v1581_v45, %v1213_v51  ;;  %v1919_v50 = vsel %vm4178_vm4, %v3666_v12, %v1918_v43  ;;  %v1920_v55 = vrot.slane %v1918_v43, 4  ;;  %v2431_v63 = vshrl.u32 %v2130_v11, 16 }
 0x135   : > { %v1591_v7 = vsel %vm4211_vm5, %v1586_v39, %v1590_v5  ;;  %v2434_v56 = vshll.u32 %v2130_v11, 16  ;;  %v2440_v36 = vshll.u32 %v2131_v19, 16  ;;  %v2444_v3 = vshrl.u32 %v2131_v19, 16 }
 0x136   : > { %v1721_v28 = vadd.bf16 %v1591_v7, %v1214_v27  ;;  %v1922_v20 = vsel %vm4178_vm4, %v1920_v55, %v1921_v54  ;;  %v2000_v29 = vadd.bf16 %v1919_v50, %v1720_v9  ;;  %v2433_v35 = vrot.slane %v2431_v63, 4 }
 0x137   : > { %v2436_v18 = vrot.slane %v2434_v56, 5  ;;  %v2442_v33 = vrot.slane %v2440_v36, 5  ;;  %v2446_v46 = vrot.slane %v2444_v3, 4  ;;  %v2450_v6 = vshll.u32 %v2132_v44, 16 }
 0x138   : > { %v2001_v62 = vadd.bf16 %v1922_v20, %v1721_v28  ;;  %v2075_v49 = vadd.bf16 %v2043_v8, %v2000_v29  ;;  %v2635_v51 = vmul.bf16 %v4282_v17, %v5032_v0  ;;  %v2636_v10 = vmul.bf16 %v4282_v17, %v5043_v58 }
 0x139   : > { %v2437_v60 = vor.u32 %v2436_v18, %v2433_v35  ;;  %v2447_v47 = vor.u32 %v2446_v46, %v2442_v33  ;;  %v2452_v5 = vrot.slane %v2450_v6, 5  ;;  %v3685_v34 = vrot.slane %v2634_v61, 9 }
 0x13a   : > { %v2076_v27 = vadd.bf16 %v2044_v1, %v2001_v62  ;;  %v2780_v59 = vrot.slane %v2635_v51, 5  ;;  %v2783_v41 = vrot.slane %v2636_v10, 5  ;;  %v331_v38 = vmul.bf16 %v4127_v24, %v4778_v22 }
 0x13b   : > { %v2438_v21 = vrot.slane %v2437_v60, 4  ;;  %v2448_v12 = vrot.slane %v2447_v47, 4  ;;  %v332_v8 = vmul.bf16 %v4127_v24, %v4785_v31  ;;  %v379_v43 = vmul.bf16 %v4155_v37, %v4778_v22 }
 0x13c   : > { %v2781_v54 = vsel %vm4178_vm4, %v3685_v34, %v2780_v59  ;;  %v2782_v11 = vrot.slane %v2780_v59, 4  ;;  %v380_v1 = vmul.bf16 %v4155_v37, %v4785_v31  ;;  %v381_v19 = vmul.bf16 %v4155_v37, %v4796_v25 }
 0x13d   : > { %v2443_v45 = vsel %vm4211_vm5, %v2438_v21, %v2442_v33  ;;  %v2453_v39 = vsel %vm4211_vm5, %v2448_v12, %v2452_v5  ;;  %v536_v44 = vshrl.u32 %v379_v43, 16  ;;  %v539_v61 = vshll.u32 %v379_v43, 16 }
 0x13e   : > { %v2582_v9 = vadd.bf16 %v2443_v45, %v2075_v49  ;;  %v2583_v50 = vadd.bf16 %v2453_v39, %v2076_v27  ;;  %v2784_v55 = vsel %vm4178_vm4, %v2782_v11, %v2783_v41  ;;  %v545_v63 = vshll.u32 %v380_v1, 16 }
 0x13f   : > { %v538_v7 = vrot.slane %v536_v44, 4  ;;  %v541_v56 = vrot.slane %v539_v61, 5  ;;  %v549_v36 = vshrl.u32 %v380_v1, 16  ;;  %v555_v3 = vshll.u32 %v381_v19, 16 }
 0x140   : > { %v2862_v28 = vadd.bf16 %v2781_v54, %v2582_v9  ;;  %v2863_v20 = vadd.bf16 %v2784_v55, %v2583_v50  ;;  %v547_v29 = vrot.slane %v545_v63, 5  ;;  %v886_v35 = vmul.bf16 %v4130_v26, %v4778_v22 }
 0x141   : > { %v542_v18 = vor.u32 %v541_v56, %v538_v7  ;;  %v551_v33 = vrot.slane %v549_v36, 4  ;;  %v557_v46 = vrot.slane %v555_v3, 5  ;;  %v887_v6 = vmul.bf16 %v4130_v26, %v4785_v31 }
 0x142   : > { %v2894_v62 = vunpack.c.l.bf16 %v2862_v28  ;;  %v2895_v49 = vunpack.c.l.bf16 %v2863_v20  ;;  %v888_v51 = vmul.bf16 %v4130_v26, %v4796_v25  ;;  %v3640_v10 = vrot.slane %v886_v35, 9 }
 0x143   : > { %v543_v60 = vrot.slane %v542_v18, 4  ;;  %v552_v47 = vor.u32 %v551_v33, %v547_v29  ;;  %v1007_v5 = vrot.slane %v887_v6, 5  ;;  %v1167_v34 = vmul.bf16 %v4139_v30, %v4944_v52  ;;  %v5110_v33 = vld [vmem:[%s4118_s12 + $0x54] sm:$0xf] }
 0x144   : > { %v2933_v22 = vadd.f32 %v4757_v13, %v2894_v62  ;;  %v2934_v27 = vadd.f32 %v4757_v13, %v2895_v49  ;;  %v1010_v59 = vrot.slane %v888_v51, 5  ;;  %v1168_v31 = vmul.bf16 %v4139_v30, %v4947_v16  ;;  %v5117_v49 = vld [vmem:[%s4118_s12 + $0x58] sm:$0xf] }
 0x145   : > { %v548_v41 = vsel %vm4211_vm5, %v543_v60, %v547_v29  ;;  %v553_v21 = vrot.slane %v552_v47, 4  ;;  %v1008_v25 = vsel %vm4178_vm4, %v3640_v10, %v1007_v5  ;;  %v1009_v12 = vrot.slane %v1007_v5, 4 }
 0x146   : > { %v2965_v43 = vmax.f32 %v2933_v22, 0.0  ;;  %v2966_v54 = vmax.f32 %v2934_v27, 0.0  ;;  %v841_v11 = vadd.bf16 %v548_v41, %v331_v38  ;;  %v1247_v1 = vmul.bf16 %v4188_v53, %v4944_v52 }
 0x147   : > { %v558_v13 = vsel %vm4211_vm5, %v553_v21, %v557_v46  ;;  %v1011_v19 = vsel %vm4178_vm4, %v1009_v12, %v1010_v59  ;;  %v1248_v45 = vmul.bf16 %v4188_v53, %v4947_v16  ;;  %v1249_v39 = vmul.bf16 %v4188_v53, %v4962_v2  ;;  %v5128_v59 = vld [vmem:[%s4118_s12 + $0x5c] sm:$0x1] }
 0x148   : > { %v2997_v44 = vmin.f32 %v2965_v43, 6.0  ;;  %v2998_v61 = vmin.f32 %v2966_v54, 6.0  ;;  %v842_v9 = vadd.bf16 %v558_v13, %v332_v8  ;;  %v1124_v38 = vadd.bf16 %v1008_v25, %v841_v11 }
 0x149   : > { %v1401_v50 = vshrl.u32 %v1247_v1, 16  ;;  %v1404_v55 = vshll.u32 %v1247_v1, 16  ;;  %v1410_v63 = vshll.u32 %v1248_v45, 16  ;;  %v1414_v7 = vshrl.u32 %v1248_v45, 16 }
 0x14a   : > { %v3017_v56 = vpack.c.bf16 %v2998_v61, %v2997_v44  ;;  %v1125_v36 = vadd.bf16 %v1011_v19, %v842_v9  ;;  %v1199_v3 = vadd.bf16 %v1167_v34, %v1124_v38  ;;  %v1420_v28 = vshll.u32 %v1249_v39, 16 }
 0x14b   : > { %v1403_v20 = vrot.slane %v1401_v50, 4  ;;  %v1406_v29 = vrot.slane %v1404_v55, 5  ;;  %v1412_v35 = vrot.slane %v1410_v63, 5  ;;  %v1416_v18 = vrot.slane %v1414_v7, 4 }
 0x14c   : > { %3769 = vmatprep.mubr.bf16.mxu1 %v3017_v56  ;;  %v1200_v46 = vadd.bf16 %v1168_v31, %v1125_v36  ;;  %v1422_v8 = vrot.slane %v1420_v28, 5  ;;  %v1751_v6 = vmul.bf16 %v4142_v32, %v4944_v52  ;;  %v1752_v62 = vmul.bf16 %v4142_v32, %v4947_v16 }
 0x14d   : > { %v1407_v51 = vor.u32 %v1406_v29, %v1403_v20  ;;  %v1417_v10 = vor.u32 %v1416_v18, %v1412_v35  ;;  %v1753_v60 = vmul.bf16 %v4142_v32, %v4962_v2  ;;  %v2029_v47 = vmul.bf16 %v4233_v57, %v5110_v33 }
 0x14e   : > { %v3659_v5 = vrot.slane %v1751_v6, 9  ;;  %v1869_v34 = vrot.slane %v1752_v62, 5  ;;  %v2030_v22 = vmul.bf16 %v4233_v57, %v5117_v49  ;;  %v2109_v27 = vmul.bf16 %v4280_v14, %v5110_v33 }
 0x14f   : > { %v1408_v31 = vrot.slane %v1407_v51, 4  ;;  %v1418_v41 = vrot.slane %v1417_v10, 4  ;;  %v1872_v21 = vrot.slane %v1753_v60, 5  ;;  %v2110_v25 = vmul.bf16 %v4280_v14, %v5117_v49 }
 0x150   : > { %v1870_v12 = vsel %vm4178_vm4, %v3659_v5, %v1869_v34  ;;  %v1871_v43 = vrot.slane %v1869_v34, 4  ;;  %v2111_v54 = vmul.bf16 %v4280_v14, %v5128_v59  ;;  %v2263_v11 = vshrl.u32 %v2109_v27, 16 }
 0x151   : > { %v1413_v1 = vsel %vm4211_vm5, %v1408_v31, %v1412_v35  ;;  %v1423_v13 = vsel %vm4211_vm5, %v1418_v41, %v1422_v8  ;;  %v2266_v19 = vshll.u32 %v2109_v27, 16  ;;  %v2272_v45 = vshll.u32 %v2110_v25, 16 }
 0x152   : > { %v1706_v39 = vadd.bf16 %v1413_v1, %v1199_v3  ;;  %v1707_v44 = vadd.bf16 %v1423_v13, %v1200_v46  ;;  %v1873_v61 = vsel %vm4178_vm4, %v1871_v43, %v1872_v21  ;;  %v2265_v9 = vrot.slane %v2263_v11, 4 }
 0x153   : > { %v2268_v38 = vrot.slane %v2266_v19, 5  ;;  %v2274_v50 = vrot.slane %v2272_v45, 5  ;;  %v2276_v55 = vshrl.u32 %v2110_v25, 16  ;;  %v2282_v63 = vshll.u32 %v2111_v54, 16 }
 0x154   : > { %v1986_v7 = vadd.bf16 %v1870_v12, %v1706_v39  ;;  %v1987_v56 = vadd.bf16 %v1873_v61, %v1707_v44  ;;  %v2613_v36 = vmul.bf16 %v4282_v17, %v5110_v33  ;;  %v2614_v28 = vmul.bf16 %v4282_v17, %v5117_v49 }
 0x155   : > { %v2269_v20 = vor.u32 %v2268_v38, %v2265_v9  ;;  %v2278_v29 = vrot.slane %v2276_v55, 4  ;;  %v2284_v3 = vrot.slane %v2282_v63, 5  ;;  %v2615_v35 = vmul.bf16 %v4282_v17, %v5128_v59 }
 0x156   : > { %v2061_v18 = vadd.bf16 %v2029_v47, %v1986_v7  ;;  %v2062_v46 = vadd.bf16 %v2030_v22, %v1987_v56  ;;  %v3678_v8 = vrot.slane %v2613_v36, 9  ;;  %v2731_v6 = vrot.slane %v2614_v28, 5 }
 0x157   : > { %v2270_v62 = vrot.slane %v2269_v20, 4  ;;  %v2279_v51 = vor.u32 %v2278_v29, %v2274_v50  ;;  %v2734_v10 = vrot.slane %v2615_v35, 5  ;;  %v347_v60 = vmul.bf16 %v4127_v24, %v4861_v40 }
 0x158   : > { %v2732_v5 = vsel %vm4178_vm4, %v3678_v8, %v2731_v6  ;;  %v2733_v34 = vrot.slane %v2731_v6, 4  ;;  %v348_v27 = vmul.bf16 %v4127_v24, %v4864_v4  ;;  %v403_v31 = vmul.bf16 %v4155_v37, %v4861_v40 }
 0x159   : > { %v2275_v47 = vsel %vm4211_vm5, %v2270_v62, %v2274_v50  ;;  %v2280_v22 = vrot.slane %v2279_v51, 4  ;;  %v404_v41 = vmul.bf16 %v4155_v37, %v4864_v4  ;;  %v405_v21 = vmul.bf16 %v4155_v37, %v4877_v23 }
 0x15a   : > { %v2568_v25 = vadd.bf16 %v2275_v47, %v2061_v18  ;;  %v2735_v12 = vsel %vm4178_vm4, %v2733_v34, %v2734_v10  ;;  %v728_v43 = vshrl.u32 %v403_v31, 16  ;;  %v731_v54 = vshll.u32 %v403_v31, 16  ;;  %v5177_v18 = vld [vmem:[%s5785_s3] ss:$0 sm:$0xff] }
 0x15b   : > { %v2285_v11 = vsel %vm4211_vm5, %v2280_v22, %v2284_v3  ;;  %v737_v1 = vshll.u32 %v404_v41, 16  ;;  %v741_v13 = vshrl.u32 %v404_v41, 16  ;;  %v747_v19 = vshll.u32 %v405_v21, 16 }
 0x15c   : > { %v2569_v45 = vadd.bf16 %v2285_v11, %v2062_v46  ;;  %v2848_v39 = vadd.bf16 %v2732_v5, %v2568_v25  ;;  %v730_v44 = vrot.slane %v728_v43, 4  ;;  %v733_v61 = vrot.slane %v731_v54, 5 }
 0x15d   : > { %v739_v9 = vrot.slane %v737_v1, 5  ;;  %v743_v38 = vrot.slane %v741_v13, 4  ;;  %v749_v50 = vrot.slane %v747_v19, 5  ;;  %v910_v55 = vmul.bf16 %v4130_v26, %v4861_v40 }
 0x15e   : > { %v2849_v63 = vadd.bf16 %v2735_v12, %v2569_v45  ;;  %v2880_v7 = vunpack.c.l.bf16 %v2848_v39  ;;  %v734_v56 = vor.u32 %v733_v61, %v730_v44  ;;  %v911_v36 = vmul.bf16 %v4130_v26, %v4864_v4 }
 0x15f   : > { %v744_v28 = vor.u32 %v743_v38, %v739_v9  ;;  %v912_v20 = vmul.bf16 %v4130_v26, %v4877_v23  ;;  %v3648_v29 = vrot.slane %v910_v55, 9  ;;  %v1183_v3 = vmul.bf16 %v4139_v30, %v5027_v42 }
 0x160   : > { %v2881_v35 = vunpack.c.l.bf16 %v2849_v63  ;;  %v2919_v40 = vadd.f32 %v5177_v18, %v2880_v7  ;;  %v735_v46 = vrot.slane %v734_v56, 4  ;;  %v1063_v8 = vrot.slane %v911_v36, 5  ;;  %v5198_v7 = vld [vmem:[%s4118_s12 + $0xb4] sm:$0xf]  ;;  %v5201_v56 = vld [vmem:[%s4118_s12 + $0xb8] sm:$0xf] }
 0x161   : > { %v745_v6 = vrot.slane %v744_v28, 4  ;;  %v1066_v4 = vrot.slane %v912_v20, 5  ;;  %v1184_v62 = vmul.bf16 %v4139_v30, %v5032_v0  ;;  %v1271_v23 = vmul.bf16 %v4188_v53, %v5027_v42 }
 0x162   : > { %v2920_v51 = vadd.f32 %v5177_v18, %v2881_v35  ;;  %v2951_v10 = vmax.f32 %v2919_v40, 0.0  ;;  %v740_v5 = vsel %vm4211_vm5, %v735_v46, %v739_v9  ;;  %v1064_v34 = vsel %vm4178_vm4, %v3648_v29, %v1063_v8 }
 0x163   : > { %v750_v31 = vsel %vm4211_vm5, %v745_v6, %v749_v50  ;;  %v857_v47 = vadd.bf16 %v740_v5, %v347_v60  ;;  %v1065_v22 = vrot.slane %v1063_v8, 4  ;;  %v1272_v41 = vmul.bf16 %v4188_v53, %v5032_v0  ;;  %v5214_v8 = vld [vmem:[%s4118_s12 + $0xbc] sm:$0x1] }
 0x164   : > { %v2952_v21 = vmax.f32 %v2920_v51, 0.0  ;;  %v2983_v25 = vmin.f32 %v2951_v10, 6.0  ;;  %v858_v12 = vadd.bf16 %v750_v31, %v348_v27  ;;  %v1273_v43 = vmul.bf16 %v4188_v53, %v5043_v58 }
 0x165   : > { %v1067_v54 = vsel %vm4178_vm4, %v1065_v22, %v1066_v4  ;;  %v1140_v11 = vadd.bf16 %v1064_v34, %v857_v47  ;;  %v1593_v1 = vshrl.u32 %v1271_v23, 16  ;;  %v1596_v13 = vshll.u32 %v1271_v23, 16 }
 0x166   : > { %v2984_v19 = vmin.f32 %v2952_v21, 6.0  ;;  %v1141_v60 = vadd.bf16 %v1067_v54, %v858_v12  ;;  %v1602_v45 = vshll.u32 %v1272_v41, 16  ;;  %v1606_v39 = vshrl.u32 %v1272_v41, 16 }
 0x167   : > { %v1215_v44 = vadd.bf16 %v1183_v3, %v1140_v11  ;;  %v1595_v61 = vrot.slane %v1593_v1, 4  ;;  %v1598_v9 = vrot.slane %v1596_v13, 5  ;;  %v1612_v38 = vshll.u32 %v1273_v43, 16 }
 0x168   : > { %v3010_v27 = vpack.c.bf16 %v2984_v19, %v2983_v25  ;;  %v1216_v50 = vadd.bf16 %v1184_v62, %v1141_v60  ;;  %v1604_v55 = vrot.slane %v1602_v45, 5  ;;  %v1608_v63 = vrot.slane %v1606_v39, 4 }
 0x169   : > { %v1599_v36 = vor.u32 %v1598_v9, %v1595_v61  ;;  %v1614_v28 = vrot.slane %v1612_v38, 5  ;;  %v1775_v20 = vmul.bf16 %v4142_v32, %v5027_v42  ;;  %v1776_v29 = vmul.bf16 %v4142_v32, %v5032_v0 }
 0x16a   : > { %3754 = vmatmul.mubr.bf16.gmra.mxu0 %v3010_v27  ;;  %v1609_v3 = vor.u32 %v1608_v63, %v1604_v55  ;;  %v1777_v35 = vmul.bf16 %v4142_v32, %v5043_v58  ;;  %v2045_v40 = vmul.bf16 %v4233_v57, %v5198_v7  ;;  %v2046_v46 = vmul.bf16 %v4233_v57, %v5201_v56 }
 0x16b   : > { %v1600_v6 = vrot.slane %v1599_v36, 4  ;;  %v3667_v4 = vrot.slane %v1775_v20, 9  ;;  %v1925_v62 = vrot.slane %v1776_v29, 5  ;;  %v2133_v23 = vmul.bf16 %v4280_v14, %v5198_v7 }
 0x16c   : > { %v1610_v51 = vrot.slane %v1609_v3, 4  ;;  %v1928_v10 = vrot.slane %v1777_v35, 5  ;;  %v2134_v5 = vmul.bf16 %v4280_v14, %v5201_v56  ;;  %v2135_v34 = vmul.bf16 %v4280_v14, %v5214_v8 }
 0x16d   : > { %v1605_v31 = vsel %vm4211_vm5, %v1600_v6, %v1604_v55  ;;  %v1926_v47 = vsel %vm4178_vm4, %v3667_v4, %v1925_v62  ;;  %v1927_v22 = vrot.slane %v1925_v62, 4  ;;  %v2455_v41 = vshrl.u32 %v2133_v23, 16 }
 0x16e   : > { %v1615_v21 = vsel %vm4211_vm5, %v1610_v51, %v1614_v28  ;;  %v1722_v25 = vadd.bf16 %v1605_v31, %v1215_v44  ;;  %v2458_v12 = vshll.u32 %v2133_v23, 16  ;;  %v2464_v43 = vshll.u32 %v2134_v5, 16 }
 0x16f   : > { %v1723_v54 = vadd.bf16 %v1615_v21, %v1216_v50  ;;  %v1929_v11 = vsel %vm4178_vm4, %v1927_v22, %v1928_v10  ;;  %v2457_v1 = vrot.slane %v2455_v41, 4  ;;  %v2468_v13 = vshrl.u32 %v2134_v5, 16 }
 0x170   : > { %v2002_v19 = vadd.bf16 %v1926_v47, %v1722_v25  ;;  %v2460_v60 = vrot.slane %v2458_v12, 5  ;;  %v2466_v45 = vrot.slane %v2464_v43, 5  ;;  %v2474_v39 = vshll.u32 %v2135_v34, 16 }
 0x171   : > { %v2003_v61 = vadd.bf16 %v1929_v11, %v1723_v54  ;;  %v2470_v9 = vrot.slane %v2468_v13, 4  ;;  %v2637_v38 = vmul.bf16 %v4282_v17, %v5198_v7  ;;  %v2638_v44 = vmul.bf16 %v4282_v17, %v5201_v56 }
 0x172   : > { %v2077_v27 = vadd.bf16 %v2045_v40, %v2002_v19  ;;  %v2461_v55 = vor.u32 %v2460_v60, %v2457_v1  ;;  %v2476_v50 = vrot.slane %v2474_v39, 5  ;;  %v2639_v63 = vmul.bf16 %v4282_v17, %v5214_v8 }
 0x173   : > { %v2078_v36 = vadd.bf16 %v2046_v46, %v2003_v61  ;;  %v2471_v28 = vor.u32 %v2470_v9, %v2466_v45  ;;  %v3686_v20 = vrot.slane %v2637_v38, 9  ;;  %v2787_v29 = vrot.slane %v2638_v44, 5 }
 0x174   : > { %v2462_v3 = vrot.slane %v2461_v55, 4  ;;  %v2790_v35 = vrot.slane %v2639_v63, 5  ;;  %v333_v6 = vmul.bf16 %v4127_v24, %v4944_v52  ;;  %v334_v4 = vmul.bf16 %v4127_v24, %v4947_v16 }
 0x175   : > { %v2472_v62 = vrot.slane %v2471_v28, 4  ;;  %v2788_v40 = vsel %vm4178_vm4, %v3686_v20, %v2787_v29  ;;  %v2789_v23 = vrot.slane %v2787_v29, 4  ;;  %v382_v51 = vmul.bf16 %v4155_v37, %v4944_v52 }
 0x176   : > { %v2467_v46 = vsel %vm4211_vm5, %v2462_v3, %v2466_v45  ;;  %v383_v10 = vmul.bf16 %v4155_v37, %v4947_v16  ;;  %v384_v5 = vmul.bf16 %v4155_v37, %v4962_v2  ;;  %v889_v34 = vmul.bf16 %v4130_v26, %v4944_v52 }
 0x177   : > { %v2477_v31 = vsel %vm4211_vm5, %v2472_v62, %v2476_v50  ;;  %v2584_v47 = vadd.bf16 %v2467_v46, %v2077_v27  ;;  %v2791_v22 = vsel %vm4178_vm4, %v2789_v23, %v2790_v35  ;;  %v560_v41 = vshrl.u32 %v382_v51, 16 }
 0x178   : > { %v2585_v21 = vadd.bf16 %v2477_v31, %v2078_v36  ;;  %v563_v25 = vshll.u32 %v382_v51, 16  ;;  %v569_v12 = vshll.u32 %v383_v10, 16  ;;  %v573_v43 = vshrl.u32 %v383_v10, 16 }
 0x179   : > { %v2864_v54 = vadd.bf16 %v2788_v40, %v2584_v47  ;;  %v562_v11 = vrot.slane %v560_v41, 4  ;;  %v579_v1 = vshll.u32 %v384_v5, 16  ;;  %v890_v13 = vmul.bf16 %v4130_v26, %v4947_v16 }
 0x17a   : > { %v2865_v19 = vadd.bf16 %v2791_v22, %v2585_v21  ;;  %v565_v52 = vrot.slane %v563_v25, 5  ;;  %v571_v60 = vrot.slane %v569_v12, 5  ;;  %v575_v45 = vrot.slane %v573_v43, 4 }
 0x17b   : > { %v2896_v39 = vunpack.c.l.bf16 %v2864_v54  ;;  %v581_v61 = vrot.slane %v579_v1, 5  ;;  %v891_v9 = vmul.bf16 %v4130_v26, %v4962_v2  ;;  %v3641_v38 = vrot.slane %v889_v34, 9 }
 0x17c   : > { %v2897_v44 = vunpack.c.l.bf16 %v2865_v19  ;;  %v566_v27 = vor.u32 %v565_v52, %v562_v11  ;;  %v576_v55 = vor.u32 %v575_v45, %v571_v60  ;;  %v1014_v50 = vrot.slane %v890_v13, 5 }
 0x17d   : > { %v2935_v63 = vadd.f32 %v5177_v18, %v2896_v39  ;;  %v1017_v36 = vrot.slane %v891_v9, 5  ;;  %v1169_v16 = vmul.bf16 %v4139_v30, %v5110_v33  ;;  %v1170_v28 = vmul.bf16 %v4139_v30, %v5117_v49 }
 0x17e   : > { %v2936_v20 = vadd.f32 %v5177_v18, %v2897_v44  ;;  %v567_v29 = vrot.slane %v566_v27, 4  ;;  %v577_v3 = vrot.slane %v576_v55, 4  ;;  %v1015_v2 = vsel %vm4178_vm4, %v3641_v38, %v1014_v50  ;;  %v5287_v55 = vld [vmem:[%s4118_s12 + $0x60] sm:$0xf] }
 0x17f   : > { %v2967_v35 = vmax.f32 %v2935_v63, 0.0  ;;  %v1016_v62 = vrot.slane %v1014_v50, 4  ;;  %v1250_v40 = vmul.bf16 %v4188_v53, %v5110_v33  ;;  %v1251_v23 = vmul.bf16 %v4188_v53, %v5117_v49  ;;  %v5292_v63 = vld [vmem:[%s4118_s12 + $0x64] sm:$0xf] }
 0x180   : > { %v2968_v51 = vmax.f32 %v2936_v20, 0.0  ;;  %v572_v46 = vsel %vm4211_vm5, %v567_v29, %v571_v60  ;;  %v582_v10 = vsel %vm4211_vm5, %v577_v3, %v581_v61  ;;  %v1252_v5 = vmul.bf16 %v4188_v53, %v5128_v59 }
 0x181   : > { %v2999_v34 = vmin.f32 %v2967_v35, 6.0  ;;  %v843_v31 = vadd.bf16 %v572_v46, %v333_v6  ;;  %v844_v47 = vadd.bf16 %v582_v10, %v334_v4  ;;  %v1018_v22 = vsel %vm4178_vm4, %v1016_v62, %v1017_v36  ;;  %v5301_v62 = vld [vmem:[%s4118_s12 + $0x68] sm:$0x1] }
 0x182   : > { %v3000_v41 = vmin.f32 %v2968_v51, 6.0  ;;  %v1425_v21 = vshrl.u32 %v1250_v40, 16  ;;  %v1428_v25 = vshll.u32 %v1250_v40, 16  ;;  %v1434_v12 = vshll.u32 %v1251_v23, 16 }
 0x183   : > { %v1126_v43 = vadd.bf16 %v1015_v2, %v843_v31  ;;  %v1127_v54 = vadd.bf16 %v1018_v22, %v844_v47  ;;  %v1438_v11 = vshrl.u32 %v1251_v23, 16  ;;  %v1444_v1 = vshll.u32 %v1252_v5, 16 }
 0x184   : > { %v3018_v13 = vpack.c.bf16 %v3000_v41, %v2999_v34  ;;  %v1427_v19 = vrot.slane %v1425_v21, 4  ;;  %v1430_v52 = vrot.slane %v1428_v25, 5  ;;  %v1436_v60 = vrot.slane %v1434_v12, 5 }
 0x185   : > { %v1201_v45 = vadd.bf16 %v1169_v16, %v1126_v43  ;;  %v1202_v6 = vadd.bf16 %v1170_v28, %v1127_v54  ;;  %v1440_v4 = vrot.slane %v1438_v11, 4  ;;  %v1446_v39 = vrot.slane %v1444_v1, 5 }
 0x186   : > { %3770 = vmatmul.mubr.bf16.gmra.mxu1 %v3018_v13  ;;  %v1431_v61 = vor.u32 %v1430_v52, %v1427_v19  ;;  %v1754_v9 = vmul.bf16 %v4142_v32, %v5110_v33  ;;  %v1755_v38 = vmul.bf16 %v4142_v32, %v5117_v49  ;;  %v1756_v44 = vmul.bf16 %v4142_v32, %v5128_v59 }
 0x187   : > { %v1441_v27 = vor.u32 %v1440_v4, %v1436_v60  ;;  %v2031_v50 = vmul.bf16 %v5287_v55, %v4233_v57  ;;  %v2032_v36 = vmul.bf16 %v5292_v63, %v4233_v57  ;;  %v2112_v16 = vmul.bf16 %v5287_v55, %v4280_v14 }
 0x188   : > { %v1432_v28 = vrot.slane %v1431_v61, 4  ;;  %v3660_v20 = vrot.slane %v1754_v9, 9  ;;  %v1876_v29 = vrot.slane %v1755_v38, 5  ;;  %v1879_v3 = vrot.slane %v1756_v44, 5 }
 0x189   : > { %v1442_v2 = vrot.slane %v1441_v27, 4  ;;  %v2113_v35 = vmul.bf16 %v5292_v63, %v4280_v14  ;;  %v2114_v40 = vmul.bf16 %v5301_v62, %v4280_v14  ;;  %v2287_v23 = vshrl.u32 %v2112_v16, 16 }
 0x18a   : > { %v1437_v51 = vsel %vm4211_vm5, %v1432_v28, %v1436_v60  ;;  %v1877_v46 = vsel %vm4178_vm4, %v3660_v20, %v1876_v29  ;;  %v1878_v10 = vrot.slane %v1876_v29, 4  ;;  %v2290_v5 = vshll.u32 %v2112_v16, 16 }
 0x18b   : > { %v1447_v34 = vsel %vm4211_vm5, %v1442_v2, %v1446_v39  ;;  %v1708_v31 = vadd.bf16 %v1437_v51, %v1201_v45  ;;  %v2289_v47 = vrot.slane %v2287_v23, 4  ;;  %v2296_v22 = vshll.u32 %v2113_v35, 16 }
 0x18c   : > { %v1709_v41 = vadd.bf16 %v1447_v34, %v1202_v6  ;;  %v1880_v21 = vsel %vm4178_vm4, %v1878_v10, %v1879_v3  ;;  %v2292_v25 = vrot.slane %v2290_v5, 5  ;;  %v2300_v12 = vshrl.u32 %v2113_v35, 16 }
 0x18d   : > { %v1988_v43 = vadd.bf16 %v1877_v46, %v1708_v31  ;;  %v2298_v54 = vrot.slane %v2296_v22, 5  ;;  %v2306_v11 = vshll.u32 %v2114_v40, 16  ;;  %v2616_v1 = vmul.bf16 %v5287_v55, %v4282_v17 }
 0x18e   : > { %v1989_v13 = vadd.bf16 %v1880_v21, %v1709_v41  ;;  %v2293_v19 = vor.u32 %v2292_v25, %v2289_v47  ;;  %v2302_v52 = vrot.slane %v2300_v12, 4  ;;  %v2617_v60 = vmul.bf16 %v5292_v63, %v4282_v17 }
 0x18f   : > { %v2063_v45 = vadd.bf16 %v2031_v50, %v1988_v43  ;;  %v2308_v4 = vrot.slane %v2306_v11, 5  ;;  %v2618_v6 = vmul.bf16 %v5301_v62, %v4282_v17  ;;  %v3679_v39 = vrot.slane %v2616_v1, 9 }
 0x190   : > { %v2064_v61 = vadd.bf16 %v2032_v36, %v1989_v13  ;;  %v2294_v9 = vrot.slane %v2293_v19, 4  ;;  %v2303_v38 = vor.u32 %v2302_v52, %v2298_v54  ;;  %v2738_v44 = vrot.slane %v2617_v60, 5 }
 0x191   : > { %v2741_v27 = vrot.slane %v2618_v6, 5  ;;  %v349_v16 = vmul.bf16 %v4127_v24, %v5027_v42  ;;  %v350_v28 = vmul.bf16 %v4127_v24, %v5032_v0  ;;  %v406_v20 = vmul.bf16 %v4155_v37, %v5027_v42 }
 0x192   : > { %v2299_v50 = vsel %vm4211_vm5, %v2294_v9, %v2298_v54  ;;  %v2304_v29 = vrot.slane %v2303_v38, 4  ;;  %v2739_v36 = vsel %vm4178_vm4, %v3679_v39, %v2738_v44  ;;  %v2740_v3 = vrot.slane %v2738_v44, 4 }
 0x193   : > { %v2570_v2 = vadd.bf16 %v2299_v50, %v2063_v45  ;;  %v407_v35 = vmul.bf16 %v4155_v37, %v5032_v0  ;;  %v408_v40 = vmul.bf16 %v4155_v37, %v5043_v58  ;;  %v752_v23 = vshrl.u32 %v406_v20, 16 }
 0x194   : > { %v2309_v51 = vsel %vm4211_vm5, %v2304_v29, %v2308_v4  ;;  %v2742_v46 = vsel %vm4178_vm4, %v2740_v3, %v2741_v27  ;;  %v755_v10 = vshll.u32 %v406_v20, 16  ;;  %v913_v5 = vmul.bf16 %v4130_v26, %v5027_v42 }
 0x195   : > { %v2571_v34 = vadd.bf16 %v2309_v51, %v2064_v61  ;;  %v2850_v31 = vadd.bf16 %v2739_v36, %v2570_v2  ;;  %v754_v47 = vrot.slane %v752_v23, 4  ;;  %v761_v22 = vshll.u32 %v407_v35, 16 }
 0x196   : > { %v757_v41 = vrot.slane %v755_v10, 5  ;;  %v765_v21 = vshrl.u32 %v407_v35, 16  ;;  %v771_v25 = vshll.u32 %v408_v40, 16  ;;  %v914_v12 = vmul.bf16 %v4130_v26, %v5032_v0 }
 0x197   : > { %v2851_v43 = vadd.bf16 %v2742_v46, %v2571_v34  ;;  %v2882_v54 = vunpack.c.l.bf16 %v2850_v31  ;;  %v763_v11 = vrot.slane %v761_v22, 5  ;;  %v915_v1 = vmul.bf16 %v4130_v26, %v5043_v58 }
 0x198   : > { %v758_v13 = vor.u32 %v757_v41, %v754_v47  ;;  %v767_v19 = vrot.slane %v765_v21, 4  ;;  %v773_v52 = vrot.slane %v771_v25, 5  ;;  %v3649_v42 = vrot.slane %v913_v5, 9 }
 0x199   : > { %v2883_v60 = vunpack.c.l.bf16 %v2851_v43  ;;  %v2921_v45 = vadd.f32 %v5177_v18, %v2882_v54  ;;  %v1070_v4 = vrot.slane %v914_v12, 5  ;;  %v1073_v6 = vrot.slane %v915_v1, 5 }
 0x19a   : > { %v759_v39 = vrot.slane %v758_v13, 4  ;;  %v768_v61 = vor.u32 %v767_v19, %v763_v11  ;;  %v1185_v0 = vmul.bf16 %v4139_v30, %v5198_v7  ;;  %v1186_v9 = vmul.bf16 %v4139_v30, %v5201_v56 }
 0x19b   : > { %v2922_v38 = vadd.f32 %v5177_v18, %v2883_v60  ;;  %v2953_v58 = vmax.f32 %v2921_v45, 0.0  ;;  %v1071_v44 = vsel %vm4178_vm4, %v3649_v42, %v1070_v4  ;;  %v1072_v27 = vrot.slane %v1070_v4, 4 }
 0x19c   : > { %v764_v20 = vsel %vm4211_vm5, %v759_v39, %v763_v11  ;;  %v769_v50 = vrot.slane %v768_v61, 4  ;;  %v1274_v29 = vmul.bf16 %v4188_v53, %v5198_v7  ;;  %v1275_v36 = vmul.bf16 %v4188_v53, %v5201_v56  ;;  %v5364_v11 = vld [vmem:[%s4118_s12 + $0xc0] sm:$0xf] }
 0x19d   : > { %v2954_v3 = vmax.f32 %v2922_v38, 0.0  ;;  %v2985_v2 = vmin.f32 %v2953_v58, 6.0  ;;  %v859_v35 = vadd.bf16 %v764_v20, %v349_v16  ;;  %v1074_v40 = vsel %vm4178_vm4, %v1072_v27, %v1073_v6  ;;  %v5380_v38 = vld [vmem:[%s4118_s12 + $0xc8] sm:$0x1] }
 0x19e   : > { %v774_v23 = vsel %vm4211_vm5, %v769_v50, %v773_v52  ;;  %v1276_v51 = vmul.bf16 %v4188_v53, %v5214_v8  ;;  %v1617_v46 = vshrl.u32 %v1274_v29, 16  ;;  %v1620_v10 = vshll.u32 %v1274_v29, 16  ;;  %v5369_v52 = vld [vmem:[%s4118_s12 + $0xc4] sm:$0xf] }
 0x19f   : > { %v2986_v5 = vmin.f32 %v2954_v3, 6.0  ;;  %v860_v34 = vadd.bf16 %v774_v23, %v350_v28  ;;  %v1142_v31 = vadd.bf16 %v1071_v44, %v859_v35  ;;  %v1626_v47 = vshll.u32 %v1275_v36, 16 }
 0x1a0   : > { %v1619_v22 = vrot.slane %v1617_v46, 4  ;;  %v1622_v41 = vrot.slane %v1620_v10, 5  ;;  %v1630_v16 = vshrl.u32 %v1275_v36, 16  ;;  %v1636_v21 = vshll.u32 %v1276_v51, 16 }
 0x1a1   : > { %v3011_v25 = vpack.c.bf16 %v2986_v5, %v2985_v2  ;;  %v1143_v12 = vadd.bf16 %v1074_v40, %v860_v34  ;;  %v1217_v43 = vadd.bf16 %v1185_v0, %v1142_v31  ;;  %v1628_v54 = vrot.slane %v1626_v47, 5 }
 0x1a2   : > { %v1623_v1 = vor.u32 %v1622_v41, %v1619_v22  ;;  %v1632_v13 = vrot.slane %v1630_v16, 4  ;;  %v1638_v19 = vrot.slane %v1636_v21, 5  ;;  %v1778_v28 = vmul.bf16 %v4142_v32, %v5198_v7 }
 0x1a3   : > { %3757 = vmatprep.mubr.bf16.mxu0 %v3011_v25  ;;  %v1218_v42 = vadd.bf16 %v1186_v9, %v1143_v12  ;;  %v1779_v60 = vmul.bf16 %v4142_v32, %v5201_v56  ;;  %v1780_v45 = vmul.bf16 %v4142_v32, %v5214_v8  ;;  %v2047_v4 = vmul.bf16 %v4233_v57, %v5364_v11 }
 0x1a4   : > { %v1624_v6 = vrot.slane %v1623_v1, 4  ;;  %v1633_v39 = vor.u32 %v1632_v13, %v1628_v54  ;;  %v3668_v61 = vrot.slane %v1778_v28, 9  ;;  %v2048_v0 = vmul.bf16 %v4233_v57, %v5369_v52 }
 0x1a5   : > { %v1932_v58 = vrot.slane %v1779_v60, 5  ;;  %v1935_v44 = vrot.slane %v1780_v45, 5  ;;  %v2136_v9 = vmul.bf16 %v4280_v14, %v5364_v11  ;;  %v2137_v27 = vmul.bf16 %v4280_v14, %v5369_v52 }
 0x1a6   : > { %v1629_v20 = vsel %vm4211_vm5, %v1624_v6, %v1628_v54  ;;  %v1634_v50 = vrot.slane %v1633_v39, 4  ;;  %v2138_v29 = vmul.bf16 %v4280_v14, %v5380_v38  ;;  %v2640_v36 = vmul.bf16 %v4282_v17, %v5364_v11 }
 0x1a7   : > { %v1724_v3 = vadd.bf16 %v1629_v20, %v1217_v43  ;;  %v1933_v2 = vsel %vm4178_vm4, %v3668_v61, %v1932_v58  ;;  %v1934_v35 = vrot.slane %v1932_v58, 4  ;;  %v2479_v40 = vshrl.u32 %v2136_v9, 16 }
 0x1a8   : > { %v1639_v23 = vsel %vm4211_vm5, %v1634_v50, %v1638_v19  ;;  %v2482_v51 = vshll.u32 %v2136_v9, 16  ;;  %v2488_v46 = vshll.u32 %v2137_v27, 16  ;;  %v2492_v10 = vshrl.u32 %v2137_v27, 16 }
 0x1a9   : > { %v1725_v5 = vadd.bf16 %v1639_v23, %v1218_v42  ;;  %v1936_v34 = vsel %vm4178_vm4, %v1934_v35, %v1935_v44  ;;  %v2004_v31 = vadd.bf16 %v1933_v2, %v1724_v3  ;;  %v2481_v47 = vrot.slane %v2479_v40, 4 }
 0x1aa   : > { %v2484_v22 = vrot.slane %v2482_v51, 5  ;;  %v2490_v41 = vrot.slane %v2488_v46, 5  ;;  %v2494_v16 = vrot.slane %v2492_v10, 4  ;;  %v2498_v21 = vshll.u32 %v2138_v29, 16 }
 0x1ab   : > { %v2005_v25 = vadd.bf16 %v1936_v34, %v1725_v5  ;;  %v2079_v12 = vadd.bf16 %v2047_v4, %v2004_v31  ;;  %v2641_v43 = vmul.bf16 %v4282_v17, %v5369_v52  ;;  %v2642_v54 = vmul.bf16 %v4282_v17, %v5380_v38 }
 0x1ac   : > { %v2485_v1 = vor.u32 %v2484_v22, %v2481_v47  ;;  %v2495_v13 = vor.u32 %v2494_v16, %v2490_v41  ;;  %v2500_v19 = vrot.slane %v2498_v21, 5  ;;  %v3687_v28 = vrot.slane %v2640_v36, 9 }
 0x1ad   : > { %v2080_v42 = vadd.bf16 %v2048_v0, %v2005_v25  ;;  %v2794_v60 = vrot.slane %v2641_v43, 5  ;;  %v2797_v45 = vrot.slane %v2642_v54, 5  ;;  %v335_v6 = vmul.bf16 %v4127_v24, %v5110_v33 }
 0x1ae   : > { %v2486_v39 = vrot.slane %v2485_v1, 4  ;;  %v2496_v61 = vrot.slane %v2495_v13, 4  ;;  %v336_v4 = vmul.bf16 %v4127_v24, %v5117_v49  ;;  %v385_v58 = vmul.bf16 %v4155_v37, %v5110_v33 }
 0x1af   : > { %v2795_v44 = vsel %vm4178_vm4, %v3687_v28, %v2794_v60  ;;  %v2796_v9 = vrot.slane %v2794_v60, 4  ;;  %v386_v0 = vmul.bf16 %v4155_v37, %v5117_v49  ;;  %v387_v27 = vmul.bf16 %v4155_v37, %v5128_v59 }
 0x1b0   : > { %v2491_v20 = vsel %vm4211_vm5, %v2486_v39, %v2490_v41  ;;  %v2501_v50 = vsel %vm4211_vm5, %v2496_v61, %v2500_v19  ;;  %v584_v29 = vshrl.u32 %v385_v58, 16  ;;  %v587_v36 = vshll.u32 %v385_v58, 16 }
 0x1b1   : > { %v2586_v3 = vadd.bf16 %v2491_v20, %v2079_v12  ;;  %v2587_v2 = vadd.bf16 %v2501_v50, %v2080_v42  ;;  %v2798_v35 = vsel %vm4178_vm4, %v2796_v9, %v2797_v45  ;;  %v593_v40 = vshll.u32 %v386_v0, 16 }
 0x1b2   : > { %v586_v23 = vrot.slane %v584_v29, 4  ;;  %v589_v51 = vrot.slane %v587_v36, 5  ;;  %v597_v46 = vshrl.u32 %v386_v0, 16  ;;  %v603_v10 = vshll.u32 %v387_v27, 16 }
 0x1b3   : > { %v2866_v5 = vadd.bf16 %v2795_v44, %v2586_v3  ;;  %v2867_v34 = vadd.bf16 %v2798_v35, %v2587_v2  ;;  %v595_v31 = vrot.slane %v593_v40, 5  ;;  %v892_v47 = vmul.bf16 %v4130_v26, %v5110_v33 }
 0x1b4   : > { %v590_v22 = vor.u32 %v589_v51, %v586_v23  ;;  %v599_v41 = vrot.slane %v597_v46, 4  ;;  %v605_v16 = vrot.slane %v603_v10, 5  ;;  %v893_v21 = vmul.bf16 %v4130_v26, %v5117_v49 }
 0x1b5   : > { %v2898_v25 = vunpack.c.l.bf16 %v2866_v5  ;;  %v2899_v12 = vunpack.c.l.bf16 %v2867_v34  ;;  %v894_v43 = vmul.bf16 %v4130_v26, %v5128_v59  ;;  %v3642_v54 = vrot.slane %v892_v47, 9 }
 0x1b6   : > { %v591_v1 = vrot.slane %v590_v22, 4  ;;  %v600_v13 = vor.u32 %v599_v41, %v595_v31  ;;  %v1021_v19 = vrot.slane %v893_v21, 5  ;;  %v1171_v28 = vmul.bf16 %v5287_v55, %v4139_v30 }
 0x1b7   : > { %v2937_v33 = vadd.f32 %v5177_v18, %v2898_v25  ;;  %v2938_v42 = vadd.f32 %v5177_v18, %v2899_v12  ;;  %v1024_v60 = vrot.slane %v894_v43, 5  ;;  %v1172_v49 = vmul.bf16 %v5292_v63, %v4139_v30 }
 0x1b8   : > { %v596_v45 = vsel %vm4211_vm5, %v591_v1, %v595_v31  ;;  %v601_v39 = vrot.slane %v600_v13, 4  ;;  %v1022_v59 = vsel %vm4178_vm4, %v3642_v54, %v1021_v19  ;;  %v1023_v61 = vrot.slane %v1021_v19, 4  ;;  %v5453_v1 = vld [vmem:[%s4118_s12 + $0x6c] sm:$0xf] }
 0x1b9   : > { %v2969_v58 = vmax.f32 %v2937_v33, 0.0  ;;  %v2970_v44 = vmax.f32 %v2938_v42, 0.0  ;;  %v845_v9 = vadd.bf16 %v596_v45, %v335_v6  ;;  %v1253_v0 = vmul.bf16 %v5287_v55, %v4188_v53  ;;  %v5458_v33 = vld [vmem:[%s4118_s12 + $0x70] sm:$0xf] }
 0x1ba   : > { %v606_v27 = vsel %vm4211_vm5, %v601_v39, %v605_v16  ;;  %v1025_v20 = vsel %vm4178_vm4, %v1023_v61, %v1024_v60  ;;  %v1254_v50 = vmul.bf16 %v5292_v63, %v4188_v53  ;;  %v1255_v29 = vmul.bf16 %v5301_v62, %v4188_v53 }
 0x1bb   : > { %v3001_v36 = vmin.f32 %v2969_v58, 6.0  ;;  %v3002_v3 = vmin.f32 %v2970_v44, 6.0  ;;  %v846_v2 = vadd.bf16 %v606_v27, %v336_v4  ;;  %v1128_v35 = vadd.bf16 %v1022_v59, %v845_v9  ;;  %v5469_v59 = vld [vmem:[%s4118_s12 + $0x74] sm:$0x1] }
 0x1bc   : > { %v1449_v6 = vshrl.u32 %v1253_v0, 16  ;;  %v1452_v40 = vshll.u32 %v1253_v0, 16  ;;  %v1458_v23 = vshll.u32 %v1254_v50, 16  ;;  %v1462_v51 = vshrl.u32 %v1254_v50, 16 }
 0x1bd   : > { %v3019_v46 = vpack.c.bf16 %v3002_v3, %v3001_v36  ;;  %v1129_v10 = vadd.bf16 %v1025_v20, %v846_v2  ;;  %v1203_v5 = vadd.bf16 %v1171_v28, %v1128_v35  ;;  %v1468_v34 = vshll.u32 %v1255_v29, 16 }
 0x1be   : > { %v1451_v31 = vrot.slane %v1449_v6, 4  ;;  %v1454_v47 = vrot.slane %v1452_v40, 5  ;;  %v1460_v22 = vrot.slane %v1458_v23, 5  ;;  %v1464_v41 = vrot.slane %v1462_v51, 4 }
 0x1bf   : > { %3773 = vmatprep.mubr.bf16.mxu1 %v3019_v46  ;;  %v1204_v16 = vadd.bf16 %v1172_v49, %v1129_v10  ;;  %v1470_v21 = vrot.slane %v1468_v34, 5  ;;  %v1757_v4 = vmul.bf16 %v5287_v55, %v4142_v32  ;;  %v1758_v25 = vmul.bf16 %v5292_v63, %v4142_v32 }
 0x1c0   : > { %v1455_v12 = vor.u32 %v1454_v47, %v1451_v31  ;;  %v1465_v43 = vor.u32 %v1464_v41, %v1460_v22  ;;  %v1759_v54 = vmul.bf16 %v5301_v62, %v4142_v32  ;;  %v2033_v13 = vmul.bf16 %v5453_v1, %v4233_v57 }
 0x1c1   : > { %v3661_v19 = vrot.slane %v1757_v4, 9  ;;  %v1883_v28 = vrot.slane %v1758_v25, 5  ;;  %v2034_v55 = vmul.bf16 %v5458_v33, %v4233_v57  ;;  %v2115_v63 = vmul.bf16 %v5453_v1, %v4280_v14 }
 0x1c2   : > { %v1456_v42 = vrot.slane %v1455_v12, 4  ;;  %v1466_v60 = vrot.slane %v1465_v43, 4  ;;  %v1886_v49 = vrot.slane %v1759_v54, 5  ;;  %v2116_v62 = vmul.bf16 %v5458_v33, %v4280_v14 }
 0x1c3   : > { %v1884_v45 = vsel %vm4178_vm4, %v3661_v19, %v1883_v28  ;;  %v1885_v39 = vrot.slane %v1883_v28, 4  ;;  %v2117_v61 = vmul.bf16 %v5469_v59, %v4280_v14  ;;  %v2311_v58 = vshrl.u32 %v2115_v63, 16 }
 0x1c4   : > { %v1461_v44 = vsel %vm4211_vm5, %v1456_v42, %v1460_v22  ;;  %v1471_v9 = vsel %vm4211_vm5, %v1466_v60, %v1470_v21  ;;  %v2314_v0 = vshll.u32 %v2115_v63, 16  ;;  %v2320_v27 = vshll.u32 %v2116_v62, 16 }
 0x1c5   : > { %v1710_v20 = vadd.bf16 %v1461_v44, %v1203_v5  ;;  %v1711_v50 = vadd.bf16 %v1471_v9, %v1204_v16  ;;  %v1887_v29 = vsel %vm4178_vm4, %v1885_v39, %v1886_v49  ;;  %v2313_v36 = vrot.slane %v2311_v58, 4 }
 0x1c6   : > { %v2316_v3 = vrot.slane %v2314_v0, 5  ;;  %v2322_v2 = vrot.slane %v2320_v27, 5  ;;  %v2324_v35 = vshrl.u32 %v2116_v62, 16  ;;  %v2330_v6 = vshll.u32 %v2117_v61, 16 }
 0x1c7   : > { %v1990_v40 = vadd.bf16 %v1884_v45, %v1710_v20  ;;  %v1991_v23 = vadd.bf16 %v1887_v29, %v1711_v50  ;;  %v2619_v51 = vmul.bf16 %v5453_v1, %v4282_v17  ;;  %v2620_v46 = vmul.bf16 %v5458_v33, %v4282_v17 }
 0x1c8   : > { %v2317_v10 = vor.u32 %v2316_v3, %v2313_v36  ;;  %v2326_v34 = vrot.slane %v2324_v35, 4  ;;  %v2332_v5 = vrot.slane %v2330_v6, 5  ;;  %v2621_v31 = vmul.bf16 %v5469_v59, %v4282_v17 }
 0x1c9   : > { %v2065_v47 = vadd.bf16 %v2033_v13, %v1990_v40  ;;  %v2066_v22 = vadd.bf16 %v2034_v55, %v1991_v23  ;;  %v3680_v41 = vrot.slane %v2619_v51, 9  ;;  %v2745_v16 = vrot.slane %v2620_v46, 5 }
 0x1ca   : > { %v2318_v21 = vrot.slane %v2317_v10, 4  ;;  %v2327_v4 = vor.u32 %v2326_v34, %v2322_v2  ;;  %v2748_v25 = vrot.slane %v2621_v31, 5  ;;  %v351_v12 = vmul.bf16 %v4127_v24, %v5198_v7 }
 0x1cb   : > { %v2746_v43 = vsel %vm4178_vm4, %v3680_v41, %v2745_v16  ;;  %v2747_v54 = vrot.slane %v2745_v16, 4  ;;  %v352_v19 = vmul.bf16 %v4127_v24, %v5201_v56  ;;  %v409_v28 = vmul.bf16 %v4155_v37, %v5198_v7 }
 0x1cc   : > { %v2323_v13 = vsel %vm4211_vm5, %v2318_v21, %v2322_v2  ;;  %v2328_v55 = vrot.slane %v2327_v4, 4  ;;  %v410_v63 = vmul.bf16 %v4155_v37, %v5201_v56  ;;  %v411_v42 = vmul.bf16 %v4155_v37, %v5214_v8 }
 0x1cd   : > { %v2572_v60 = vadd.bf16 %v2323_v13, %v2065_v47  ;;  %v2749_v49 = vsel %vm4178_vm4, %v2747_v54, %v2748_v25  ;;  %v776_v62 = vshrl.u32 %v409_v28, 16  ;;  %v779_v45 = vshll.u32 %v409_v28, 16 }
 0x1ce   : > { %v2333_v24 = vsel %vm4211_vm5, %v2328_v55, %v2332_v5  ;;  %v785_v39 = vshll.u32 %v410_v63, 16  ;;  %v789_v61 = vshrl.u32 %v410_v63, 16  ;;  %v795_v58 = vshll.u32 %v411_v42, 16 }
 0x1cf   : > { %v2573_v44 = vadd.bf16 %v2333_v24, %v2066_v22  ;;  %v2852_v9 = vadd.bf16 %v2746_v43, %v2572_v60  ;;  %v778_v0 = vrot.slane %v776_v62, 4  ;;  %v781_v27 = vrot.slane %v779_v45, 5 }
 0x1d0   : > { %v787_v20 = vrot.slane %v785_v39, 5  ;;  %v791_v50 = vrot.slane %v789_v61, 4  ;;  %v797_v29 = vrot.slane %v795_v58, 5  ;;  %v916_v37 = vmul.bf16 %v4130_v26, %v5198_v7  ;;  %v304_v61 = vld [vmem:[%s4118_s12 + $0xcc] sm:$0xf] }
 0x1d1   : > { %v2853_v36 = vadd.bf16 %v2749_v49, %v2573_v44  ;;  %v2884_v3 = vunpack.c.l.bf16 %v2852_v9  ;;  %v782_v2 = vor.u32 %v781_v27, %v778_v0  ;;  %v917_v35 = vmul.bf16 %v4130_v26, %v5201_v56  ;;  %v305_v9 = vld [vmem:[%s4118_s12 + $0xd0] sm:$0xf]  ;;  %v306_v0 = vld [vmem:[%s4118_s12 + $0xd4] sm:$0x1] }
 0x1d2   : > { %v792_v6 = vor.u32 %v791_v50, %v787_v20  ;;  %v918_v40 = vmul.bf16 %v4130_v26, %v5214_v8  ;;  %v3650_v23 = vrot.slane %v916_v37, 9  ;;  %v1187_v51 = vmul.bf16 %v4139_v30, %v5364_v11 }
 0x1d3   : > { %v2885_v46 = vunpack.c.l.bf16 %v2853_v36  ;;  %v2923_v10 = vadd.f32 %v5177_v18, %v2884_v3  ;;  %v783_v34 = vrot.slane %v782_v2, 4  ;;  %v1077_v5 = vrot.slane %v917_v35, 5 }
 0x1d4   : > { %v793_v7 = vrot.slane %v792_v6, 4  ;;  %v1080_v31 = vrot.slane %v918_v40, 5  ;;  %v1188_v47 = vmul.bf16 %v4139_v30, %v5369_v52  ;;  %v1277_v56 = vmul.bf16 %v4188_v53, %v5364_v11 }
 0x1d5   : > { %v2924_v22 = vadd.f32 %v5177_v18, %v2885_v46  ;;  %v2955_v26 = vmax.f32 %v2923_v10, 0.0  ;;  %v788_v8 = vsel %vm4211_vm5, %v783_v34, %v787_v20  ;;  %v1078_v41 = vsel %vm4178_vm4, %v3650_v23, %v1077_v5 }
 0x1d6   : > { %v798_v16 = vsel %vm4211_vm5, %v793_v7, %v797_v29  ;;  %v861_v21 = vadd.bf16 %v788_v8, %v351_v12  ;;  %v1079_v4 = vrot.slane %v1077_v5, 4  ;;  %v1278_v30 = vmul.bf16 %v4188_v53, %v5369_v52 }
 0x1d7   : > { %v2956_v25 = vmax.f32 %v2924_v22, 0.0  ;;  %v2987_v43 = vmin.f32 %v2955_v26, 6.0  ;;  %v862_v54 = vadd.bf16 %v798_v16, %v352_v19  ;;  %v1279_v18 = vmul.bf16 %v4188_v53, %v5380_v38  ;;  %v3747_v26 = vpop.f32.mrf.mxu0 }
 0x1d8   : > { %v1081_v28 = vsel %vm4178_vm4, %v1079_v4, %v1080_v31  ;;  %v1144_v13 = vadd.bf16 %v1078_v41, %v861_v21  ;;  %v1641_v55 = vshrl.u32 %v1277_v56, 16  ;;  %v1644_v63 = vshll.u32 %v1277_v56, 16  ;;  %v3763_v4 = vpop.f32.mrf.mxu1 }
 0x1d9   : > { %v2988_v12 = vmin.f32 %v2956_v25, 6.0  ;;  %v1145_v42 = vadd.bf16 %v1081_v28, %v862_v54  ;;  %v1650_v60 = vshll.u32 %v1278_v30, 16  ;;  %v1654_v49 = vshrl.u32 %v1278_v30, 16 }
 0x1da   : > { %v1219_v62 = vadd.bf16 %v1187_v51, %v1144_v13  ;;  %v1643_v45 = vrot.slane %v1641_v55, 4  ;;  %v1646_v24 = vrot.slane %v1644_v63, 5  ;;  %v1660_v39 = vshll.u32 %v1279_v18, 16  ;;  %v5556_v18 = vld [vmem:[%s5786_s4] ss:$0 sm:$0xff] }
 0x1db   : > { %v3012_v19 = vpack.c.bf16 %v2988_v12, %v2987_v43  ;;  %v1220_v58 = vadd.bf16 %v1188_v47, %v1145_v42  ;;  %v1652_v53 = vrot.slane %v1650_v60, 5  ;;  %v1656_v44 = vrot.slane %v1654_v49, 4 }
 0x1dc   : > { %v1647_v27 = vor.u32 %v1646_v24, %v1643_v45  ;;  %v1662_v20 = vrot.slane %v1660_v39, 5  ;;  %v1781_v50 = vmul.bf16 %v4142_v32, %v5364_v11  ;;  %v1782_v29 = vmul.bf16 %v4142_v32, %v5369_v52 }
 0x1dd   : > { %3758 = vmatmul.mubr.bf16.gmra.mxu0 %v3012_v19  ;;  %v1657_v37 = vor.u32 %v1656_v44, %v1652_v53  ;;  %v1783_v36 = vmul.bf16 %v4142_v32, %v5380_v38  ;;  %v2049_v3 = vmul.bf16 %v4233_v57, %v304_v61  ;;  %v2050_v2 = vmul.bf16 %v4233_v57, %v305_v9  ;;  %v3867_v19 = vld [vmem:[%s4118_s12 + $0x18] sm:$0xf] }
 0x1de   : > { %v1648_v35 = vrot.slane %v1647_v27, 4  ;;  %v3669_v6 = vrot.slane %v1781_v50, 9  ;;  %v1939_v40 = vrot.slane %v1782_v29, 5  ;;  %v2139_v23 = vmul.bf16 %v4280_v14, %v304_v61 }
 0x1df   : > { %v1658_v51 = vrot.slane %v1657_v37, 4  ;;  %v1942_v46 = vrot.slane %v1783_v36, 5  ;;  %v2140_v11 = vmul.bf16 %v4280_v14, %v305_v9  ;;  %v2141_v52 = vmul.bf16 %v4280_v14, %v306_v0 }
 0x1e0   : > { %v1653_v10 = vsel %vm4211_vm5, %v1648_v35, %v1652_v53  ;;  %v1940_v32 = vsel %vm4178_vm4, %v3669_v6, %v1939_v40  ;;  %v1941_v38 = vrot.slane %v1939_v40, 4  ;;  %v2503_v34 = vshrl.u32 %v2139_v23, 16  ;;  %v3869_v6 = vld [vmem:[%s4118_s12 + $0x78] sm:$0xf] }
 0x1e1   : > { %v1663_v57 = vsel %vm4211_vm5, %v1658_v51, %v1662_v20  ;;  %v1726_v5 = vadd.bf16 %v1653_v10, %v1219_v62  ;;  %v2506_v7 = vshll.u32 %v2139_v23, 16  ;;  %v2512_v31 = vshll.u32 %v2140_v11, 16  ;;  %v3126_v62 = vpop.f32.mrf.mxu0  ;;  %v3870_v23 = vld [vmem:[%s4118_s12 + $0x7c] sm:$0xf]  ;;  %v3871_v10 = vld [vmem:[%s4118_s12 + $0xc] sm:$0xf] }
 0x1e2   : > { %v1727_v47 = vadd.bf16 %v1663_v57, %v1220_v58  ;;  %v1943_v56 = vsel %vm4178_vm4, %v1941_v38, %v1942_v46  ;;  %v2505_v22 = vrot.slane %v2503_v34, 4  ;;  %v2516_v14 = vshrl.u32 %v2140_v11, 16  ;;  %v3190_v58 = vpop.f32.mrf.mxu1 }
 0x1e3   : > { %v2006_v8 = vadd.bf16 %v1940_v32, %v1726_v5  ;;  %v2508_v41 = vrot.slane %v2506_v7, 5  ;;  %v2514_v16 = vrot.slane %v2512_v31, 5  ;;  %v2522_v21 = vshll.u32 %v2141_v52, 16 }
 0x1e4   : > { %v2007_v30 = vadd.bf16 %v1943_v56, %v1727_v47  ;;  %v2518_v25 = vrot.slane %v2516_v14, 4  ;;  %v2643_v43 = vmul.bf16 %v4282_v17, %v304_v61  ;;  %v2644_v54 = vmul.bf16 %v4282_v17, %v305_v9  ;;  %v3868_v9 = vld [vmem:[%s4118_s12 + $0x1c] sm:$0xf]  ;;  %v3764_v11 = vpop.f32.mrf.mxu1 }
 0x1e5   : > { %v2081_v28 = vadd.bf16 %v2049_v3, %v2006_v8  ;;  %v2509_v13 = vor.u32 %v2508_v41, %v2505_v22  ;;  %v2524_v55 = vrot.slane %v2522_v21, 5  ;;  %v2645_v63 = vmul.bf16 %v4282_v17, %v306_v0 }
 0x1e6   : > { %v2082_v12 = vadd.bf16 %v2050_v2, %v2007_v30  ;;  %v2519_v42 = vor.u32 %v2518_v25, %v2514_v16  ;;  %v3688_v60 = vrot.slane %v2643_v43, 9  ;;  %v2801_v49 = vrot.slane %v2644_v54, 5  ;;  %v3748_v2 = vpop.f32.mrf.mxu0  ;;  %v3193_v21 = vpop.f32.mrf.mxu1 }
 0x1e7   : > { %v2510_v45 = vrot.slane %v2509_v13, 4  ;;  %v2804_v24 = vrot.slane %v2645_v63, 5  ;;  %v3135_v39 = vadd.f32 %v3747_v26, %v5556_v18  ;;  %v3256_v61 = vunpack.c.l.bf16 %v3867_v19  ;;  %v3876_v19 = vld [vmem:[%s4118_s12 + $0x14] sm:$0x1] }
 0x1e8   : > { %v2520_v53 = vrot.slane %v2519_v42, 4  ;;  %v2802_v17 = vsel %vm4178_vm4, %v3688_v60, %v2801_v49  ;;  %v2803_v44 = vrot.slane %v2801_v49, 4  ;;  %v3257_v0 = vunpack.c.l.bf16 %v3868_v9  ;;  %v3129_v14 = vpop.f32.mrf.mxu0  ;;  %v3875_v60 = vld [vmem:[%s4118_s12 + $0x80] sm:$0x1] }
 0x1e9   : > { %v2515_v27 = vsel %vm4211_vm5, %v2510_v45, %v2514_v16  ;;  %v3355_v20 = vrot.slane %v3256_v61, 1  ;;  %v3199_v50 = vadd.f32 %v3763_v4, %v5556_v18  ;;  %v3280_v40 = vunpack.c.l.bf16 %v3869_v6  ;;  %v3873_v4 = vld [vmem:[%s5785_s3] ss:$0 sm:$0xff] }
 0x1ea   : > { %v2525_v29 = vsel %vm4211_vm5, %v2520_v53, %v2524_v55  ;;  %v2588_v37 = vadd.bf16 %v2515_v27, %v2081_v28  ;;  %v2805_v36 = vsel %vm4178_vm4, %v2803_v44, %v2804_v24  ;;  %v5576_v3 = vrot.slane %v3257_v0, 1 }
 0x1eb   : > { %v2589_v35 = vadd.bf16 %v2525_v29, %v2082_v12  ;;  %v3281_v51 = vunpack.c.l.bf16 %v3870_v23  ;;  %v3127_v46 = vadd.f32 %v5556_v18, %v3126_v62  ;;  %v3253_v32 = vunpack.c.l.bf16 %v3871_v10  ;;  %v3751_v62 = vpop.f32.mrf.mxu0 }
 0x1ec   : > { %v2868_v52 = vadd.bf16 %v2802_v17, %v2588_v37  ;;  %v3357_v15 = vsel %vm3349_vm6, %v3355_v20, %v5576_v3  ;;  %v3254_v38 = vunpack.c.l.bf16 %v3872_v48  ;;  %v3395_v5 = vrot.slane %v3280_v40, 1  ;;  %v3879_v48 = vld [vmem:[%s4118_s12 + $0x90] sm:$0xf] }
 0x1ed   : > { %v2869_v34 = vadd.bf16 %v2805_v36, %v2589_v35  ;;  %v3464_v57 = vadd.f32 %v3357_v15, %v3135_v39  ;;  %v3396_v7 = vrot.slane %v3281_v51, 1  ;;  %v3350_v47 = vrot.slane %v3253_v32, 1  ;;  %v3877_v36 = vld [vmem:[%s4118_s12 + $0x30] sm:$0xf]  ;;  %v3142_v35 = vpop.f32.mrf.mxu0 }
 0x1ee   : > { %v2900_v31 = vunpack.c.l.bf16 %v2868_v52  ;;  %v3351_v56 = vrot.slane %v3254_v38, 1  ;;  %v3191_v22 = vadd.f32 %v5556_v18, %v3190_v58  ;;  %v3277_v41 = vunpack.c.l.bf16 %v5453_v1  ;;  %v3767_v58 = vpop.f32.mrf.mxu1 }
 0x1ef   : > { %v2901_v26 = vunpack.c.l.bf16 %v2869_v34  ;;  %3496 = vst [vmem:[%s5587_s15 + $0x10] sm:$0xff] %v3464_v57  ;;  %v3397_v8 = vsel %vm3349_vm6, %v3395_v5, %v3396_v7  ;;  %v3278_v16 = vunpack.c.l.bf16 %v5458_v33  ;;  %v3138_v54 = vadd.f32 %v3748_v2, %v5556_v18  ;;  %v3874_v33 = vld [vmem:[%s4118_s12 + $0x20] sm:$0x1]  ;;  %v3880_v34 = vld [vmem:[%s4118_s12 + $0x94] sm:$0xf] }
 0x1f0   : > { %v2939_v30 = vadd.f32 %v3873_v4, %v2900_v31  ;;  %v3480_v25 = vadd.f32 %v3397_v8, %v3199_v50  ;;  %v3352_v43 = vsel %vm3349_vm6, %v3350_v47, %v3351_v56  ;;  %v3390_v55 = vrot.slane %v3277_v41, 1  ;;  %v3206_v51 = vpop.f32.mrf.mxu1  ;;  %v3881_v31 = vld [vmem:[%s4118_s12 + $0x24] sm:$0xf] }
 0x1f1   : > { %v2940_v28 = vadd.f32 %v3873_v4, %v2901_v26  ;;  %v3462_v13 = vadd.f32 %v3352_v43, %v3127_v46  ;;  %v3391_v1 = vrot.slane %v3278_v16, 1  ;;  %v3258_v12 = vunpack.c.l.bf16 %v3874_v33  ;;  %v3883_v43 = vld [vmem:[%s4118_s12 + $0x84] sm:$0xf] }
 0x1f2   : > { %v2971_v63 = vmax.f32 %v2939_v30, 0.0  ;;  %3512 = vst [vmem:[%s5587_s15 + $0x90] sm:$0xff] %v3480_v25  ;;  %v3202_v42 = vadd.f32 %v3764_v11, %v5556_v18  ;;  %v3282_v49 = vunpack.c.l.bf16 %v3875_v60  ;;  %v3130_v39 = vadd.f32 %v5556_v18, %v3129_v14  ;;  %v3878_v11 = vld [vmem:[%s4118_s12 + $0x34] sm:$0xf]  ;;  %v3752_v14 = vpop.f32.mrf.mxu0  ;;  %v3885_v60 = vld [vmem:[%s4118_s12 + $0x38] sm:$0x1] }
 0x1f3   : > { %v2972_v45 = vmax.f32 %v2940_v28, 0.0  ;;  %3494 = vst [vmem:[%s5587_s15] sm:$0xff] %v3462_v13  ;;  %v3392_v24 = vsel %vm3349_vm6, %v3390_v55, %v3391_v1  ;;  %v3255_v61 = vunpack.c.l.bf16 %v3876_v19  ;;  %v3358_v44 = vrot.slane %v3258_v12, 1  ;;  %v3886_v19 = vld [vmem:[%s4118_s12 + $0x98] sm:$0x1] }
 0x1f4   : > { %v3003_v53 = vmin.f32 %v2971_v63, 6.0  ;;  %v3478_v17 = vadd.f32 %v3392_v24, %v3191_v22  ;;  %v3398_v9 = vrot.slane %v3282_v49, 1  ;;  %v3279_v20 = vunpack.c.l.bf16 %v5469_v59 }
 0x1f5   : > { %v3004_v0 = vmin.f32 %v2972_v45, 6.0  ;;  %v3353_v27 = vrot.slane %v3255_v61, 1  ;;  %v3359_v50 = vsel %vm3349_vm6, %v5576_v3, %v3358_v44  ;;  %v3194_v37 = vadd.f32 %v5556_v18, %v3193_v21  ;;  %v3768_v21 = vpop.f32.mrf.mxu1  ;;  %v3887_v44 = vld [vmem:[%s4118_s12 + $0x2c] sm:$0x1] }
 0x1f6   : > { %3510 = vst [vmem:[%s5587_s15 + $0x80] sm:$0xff] %v3478_v17  ;;  %v3399_v29 = vsel %vm3349_vm6, %v3396_v7, %v3398_v9  ;;  %v3262_v2 = vunpack.c.l.bf16 %v3877_v36  ;;  %v3465_v40 = vadd.f32 %v3359_v50, %v3138_v54  ;;  %v3393_v3 = vrot.slane %v3279_v20, 1  ;;  %v3888_v50 = vld [vmem:[%s4118_s12 + $0x8c] sm:$0x1] }
 0x1f7   : > { %v3020_v6 = vpack.c.bf16 %v3004_v0, %v3003_v53  ;;  %v3481_v23 = vadd.f32 %v3399_v29, %v3202_v42  ;;  %v3354_v59 = vsel %vm3349_vm6, %v3351_v56, %v3353_v27  ;;  %v3263_v52 = vunpack.c.l.bf16 %v3878_v11  ;;  %v3882_v56 = vld [vmem:[%s4118_s12 + $0x28] sm:$0xf] }
 0x1f8   : > { %v3463_v46 = vadd.f32 %v3354_v59, %v3130_v39  ;;  %v3365_v15 = vrot.slane %v3262_v2, 1  ;;  %3497 = vst [vmem:[%s5587_s15 + $0x18] sm:$0xff] %v3465_v40  ;;  %v3151_v10 = vadd.f32 %v3751_v62, %v5556_v18  ;;  %v3215_v32 = vadd.f32 %v3767_v58, %v5556_v18  ;;  %v3145_v62 = vpop.f32.mrf.mxu0  ;;  %v3209_v58 = vpop.f32.mrf.mxu1 }
 0x1f9   : > { %3774 = vmatmul.mubr.bf16.gmra.mxu1 %v3020_v6  ;;  %3513 = vst [vmem:[%s5587_s15 + $0x98] sm:$0xff] %v3481_v23  ;;  %v3286_v38 = vunpack.c.l.bf16 %v3879_v48  ;;  %v3287_v57 = vunpack.c.l.bf16 %v3880_v34  ;;  %v3394_v5 = vsel %vm3349_vm6, %v3391_v1, %v3393_v3  ;;  %v3366_v7 = vrot.slane %v3263_v52, 1  ;;  %v3884_v1 = vld [vmem:[%s4118_s12 + $0x88] sm:$0xf]  ;;  %v3891_v48 = vld [vmem:[%s4118_s12 + $0x3c] sm:$0xf] }
 0x1fa   : > { %3495 = vst [vmem:[%s5587_s15 + $0x8] sm:$0xff] %v3463_v46  ;;  %v3259_v47 = vunpack.c.l.bf16 %v3881_v31  ;;  %v3260_v22 = vunpack.c.l.bf16 %v3882_v56  ;;  %v3479_v26 = vadd.f32 %v3394_v5, %v3194_v37  ;;  %v3143_v16 = vadd.f32 %v5556_v18, %v3142_v35  ;;  %v3889_v52 = vld [vmem:[%s4118_s12 + $0x48] sm:$0xf]  ;;  %v3892_v34 = vld [vmem:[%s4118_s12 + $0x40] sm:$0xf] }
 0x1fb   : > { %v3405_v8 = vrot.slane %v3286_v38, 1  ;;  %v3406_v41 = vrot.slane %v3287_v57, 1  ;;  %v3367_v4 = vsel %vm3349_vm6, %v3365_v15, %v3366_v7  ;;  %v3283_v54 = vunpack.c.l.bf16 %v3883_v43  ;;  %v3893_v31 = vld [vmem:[%s4118_s12 + $0x50] sm:$0x1] }
 0x1fc   : > { %v3360_v30 = vrot.slane %v3259_v47, 1  ;;  %v3361_v25 = vrot.slane %v3260_v22, 1  ;;  %3511 = vst [vmem:[%s5587_s15 + $0x88] sm:$0xff] %v3479_v26  ;;  %v3468_v28 = vadd.f32 %v3367_v4, %v3151_v10  ;;  %v3207_v55 = vadd.f32 %v5556_v18, %v3206_v51  ;;  %v3890_v10 = vld [vmem:[%s4118_s12 + $0x4c] sm:$0xf] }
 0x1fd   : > { %v3407_v13 = vsel %vm3349_vm6, %v3405_v8, %v3406_v41  ;;  %v3284_v63 = vunpack.c.l.bf16 %v3884_v1  ;;  %v3400_v42 = vrot.slane %v3283_v54, 1  ;;  %v3264_v49 = vunpack.c.l.bf16 %v3885_v60 }
 0x1fe   : > { %v3484_v33 = vadd.f32 %v3407_v13, %v3215_v32  ;;  %v3362_v12 = vsel %vm3349_vm6, %v3360_v30, %v3361_v25  ;;  %3500 = vst [vmem:[%s5587_s15 + $0x30] sm:$0xff] %v3468_v28  ;;  %v3154_v39 = vadd.f32 %v3752_v14, %v5556_v18  ;;  %v3288_v61 = vunpack.c.l.bf16 %v3886_v19  ;;  %v3894_v14 = vld [vmem:[%s4118_s12 + $0x44] sm:$0x1] }
 0x1ff   : > { %v3466_v45 = vadd.f32 %v3362_v12, %v3143_v16  ;;  %v3401_v24 = vrot.slane %v3284_v63, 1  ;;  %v3368_v53 = vrot.slane %v3264_v49, 1  ;;  %v3218_v17 = vadd.f32 %v3768_v21, %v5556_v18  ;;  %v3895_v49 = vld [vmem:[%s4118_s12 + $0xa8] sm:$0xf] }
 0x200   : > { %3516 = vst [vmem:[%s5587_s15 + $0xb0] sm:$0xff] %v3484_v33  ;;  %v3261_v9 = vunpack.c.l.bf16 %v3887_v44  ;;  %v3408_v27 = vrot.slane %v3288_v61, 1  ;;  %v3146_v20 = vadd.f32 %v5556_v18, %v3145_v62  ;;  %v3285_v29 = vunpack.c.l.bf16 %v3888_v50  ;;  %v3898_v61 = vld [vmem:[%s4118_s12 + $0xa0] sm:$0xf]  ;;  %v3899_v44 = vld [vmem:[%s4118_s12 + $0xb0] sm:$0x1] }
 0x201   : > { %3498 = vst [vmem:[%s5587_s15 + $0x20] sm:$0xff] %v3466_v45  ;;  %v3402_v0 = vsel %vm3349_vm6, %v3400_v42, %v3401_v24  ;;  %v3369_v36 = vsel %vm3349_vm6, %v3366_v7, %v3368_v53  ;;  %v3210_v35 = vadd.f32 %v5556_v18, %v3209_v58  ;;  %v3268_v15 = vunpack.c.l.bf16 %v3889_v52  ;;  %v3896_v45 = vld [vmem:[%s4118_s12 + $0xac] sm:$0xf] }
 0x202   : > { %v3482_v37 = vadd.f32 %v3402_v0, %v3207_v55  ;;  %v3363_v2 = vrot.slane %v3261_v9, 1  ;;  %v3469_v6 = vadd.f32 %v3369_v36, %v3154_v39  ;;  %v3409_v40 = vsel %vm3349_vm6, %v3406_v41, %v3408_v27  ;;  %v3897_v39 = vld [vmem:[%s4118_s12 + $0x9c] sm:$0xf] }
 0x203   : > { %v3403_v23 = vrot.slane %v3285_v29, 1  ;;  %v3485_v59 = vadd.f32 %v3409_v40, %v3218_v17  ;;  %v3269_v32 = vunpack.c.l.bf16 %v3890_v10  ;;  %v3265_v38 = vunpack.c.l.bf16 %v3891_v48 }
 0x204   : > { %3514 = vst [vmem:[%s5587_s15 + $0xa0] sm:$0xff] %v3482_v37  ;;  %v3364_v51 = vsel %vm3349_vm6, %v3361_v25, %v3363_v2  ;;  %3501 = vst [vmem:[%s5587_s15 + $0x38] sm:$0xff] %v3469_v6  ;;  %v3266_v57 = vunpack.c.l.bf16 %v3892_v34  ;;  %v3375_v5 = vrot.slane %v3268_v15, 1  ;;  %v3270_v47 = vunpack.c.l.bf16 %v3893_v31 }
 0x205   : > { %v3467_v46 = vadd.f32 %v3364_v51, %v3146_v20  ;;  %v3404_v3 = vsel %vm3349_vm6, %v3401_v24, %v3403_v23  ;;  %3517 = vst [vmem:[%s5587_s15 + $0xb8] sm:$0xff] %v3485_v59  ;;  %v3376_v7 = vrot.slane %v3269_v32, 1  ;;  %v3370_v56 = vrot.slane %v3265_v38, 1  ;;  %v3900_v20 = vld [vmem:[%s4118_s12 + $0xa4] sm:$0x1] }
 0x206   : > { %v3483_v11 = vadd.f32 %v3404_v3, %v3210_v35  ;;  %v3371_v22 = vrot.slane %v3266_v57, 1  ;;  %v3267_v26 = vunpack.c.l.bf16 %v3894_v14  ;;  %v3378_v16 = vrot.slane %v3270_v47, 1  ;;  %v3901_v38 = vld [vmem:[%s4118_s12 + $0x60] sm:$0xf]  ;;  %v3902_v57 = vld [vmem:[%s4118_s12 + $0x64] sm:$0xf] }
 0x207   : > { %3499 = vst [vmem:[%s5587_s15 + $0x28] sm:$0xff] %v3467_v46  ;;  %v3377_v41 = vsel %vm3349_vm6, %v3375_v5, %v3376_v7  ;;  %v3292_v62 = vunpack.c.l.bf16 %v3895_v49  ;;  %v3293_v24 = vunpack.c.l.bf16 %v3896_v45  ;;  %v3289_v19 = vunpack.c.l.bf16 %v3897_v39  ;;  %v3904_v47 = vld [vmem:[%s4118_s12 + $0x58] sm:$0xf] }
 0x208   : > { %3515 = vst [vmem:[%s5587_s15 + $0xa8] sm:$0xff] %v3483_v11  ;;  %v3372_v30 = vsel %vm3349_vm6, %v3370_v56, %v3371_v22  ;;  %v3373_v25 = vrot.slane %v3267_v26, 1  ;;  %v3379_v13 = vsel %vm3349_vm6, %v3376_v7, %v3378_v16  ;;  %v3290_v58 = vunpack.c.l.bf16 %v3898_v61  ;;  %v3903_v7 = vld [vmem:[%s4118_s12 + $0x54] sm:$0xf]  ;;  %v3905_v26 = vld [vmem:[%s4118_s12 + $0x68] sm:$0x1] }
 0x209   : > { %v3415_v53 = vrot.slane %v3292_v62, 1  ;;  %v3416_v17 = vrot.slane %v3293_v24, 1  ;;  %v3294_v9 = vunpack.c.l.bf16 %v3899_v44  ;;  %v3410_v0 = vrot.slane %v3289_v19, 1  ;;  %v3907_v19 = vld [vmem:[%s4118_s12 + $0xc0] sm:$0xf] }
 0x20a   : > { %v3374_v33 = vsel %vm3349_vm6, %v3371_v22, %v3373_v25  ;;  %v3411_v27 = vrot.slane %v3290_v58, 1  ;;  %v3291_v50 = vunpack.c.l.bf16 %v3900_v20  ;;  %v3274_v34 = vunpack.c.l.bf16 %v3901_v38  ;;  %v3908_v58 = vld [vmem:[%s4118_s12 + $0xc4] sm:$0xf] }
 0x20b   : > { %v3417_v37 = vsel %vm3349_vm6, %v3415_v53, %v3416_v17  ;;  %v3418_v36 = vrot.slane %v3294_v9, 1  ;;  %v3275_v5 = vunpack.c.l.bf16 %v3902_v57  ;;  %v3271_v31 = vunpack.c.l.bf16 %v3903_v7  ;;  %v3910_v9 = vld [vmem:[%s4118_s12 + $0xb8] sm:$0xf] }
 0x20c   : > { %v3412_v6 = vsel %vm3349_vm6, %v3410_v0, %v3411_v27  ;;  %v3413_v40 = vrot.slane %v3291_v50, 1  ;;  %v3272_v56 = vunpack.c.l.bf16 %v3904_v47  ;;  %v3385_v22 = vrot.slane %v3274_v34, 1  ;;  %v3911_v50 = vld [vmem:[%s4118_s12 + $0xc8] sm:$0x1] }
 0x20d   : > { %v3419_v46 = vsel %vm3349_vm6, %v3416_v17, %v3418_v36  ;;  %v3386_v14 = vrot.slane %v3275_v5, 1  ;;  %v3298_v61 = vunpack.c.l.bf16 %v3907_v19  ;;  %v3299_v53 = vunpack.c.l.bf16 %v3908_v58  ;;  %v3909_v17 = vld [vmem:[%s4118_s12 + $0xb4] sm:$0xf] }
 0x20e   : > { %v3414_v15 = vsel %vm3349_vm6, %v3411_v27, %v3413_v40  ;;  %v3381_v16 = vrot.slane %v3272_v56, 1  ;;  %v3295_v44 = vunpack.c.l.bf16 %v3909_v17  ;;  %v3296_v0 = vunpack.c.l.bf16 %v3910_v9 }
 0x20f   : > { %v3387_v25 = vsel %vm3349_vm6, %v3385_v22, %v3386_v14  ;;  %v3425_v27 = vrot.slane %v3298_v61, 1  ;;  %v3426_v20 = vrot.slane %v3299_v53, 1 }
 0x210   : > { %v3421_v36 = vrot.slane %v3296_v0, 1 }
 0x211   : > { %v3427_v40 = vsel %vm3349_vm6, %v3425_v27, %v3426_v20 }
 0x22a   : > { %v3755_v8 = vpop.f32.mrf.mxu0 }
 0x22b   : > { %v3167_v21 = vadd.f32 %v3755_v8, %v5556_v18  ;;  %v3276_v8 = vunpack.c.l.bf16 %v3905_v26 }
 0x22c   : > { %v3158_v4 = vpop.f32.mrf.mxu0 }
 0x22d   : > { %v3472_v43 = vadd.f32 %v3377_v41, %v3167_v21  ;;  %v3159_v54 = vadd.f32 %v5556_v18, %v3158_v4  ;;  %v3380_v41 = vrot.slane %v3271_v31, 1  ;;  %v3906_v21 = vld [vmem:[%s4118_s12 + $0x5c] sm:$0x1] }
 0x22e   : > { %v3756_v28 = vpop.f32.mrf.mxu0  ;;  %v3273_v4 = vunpack.c.l.bf16 %v3906_v21 }
 0x22f   : > { %3504 = vst [vmem:[%s5587_s15 + $0x50] sm:$0xff] %v3472_v43  ;;  %v3470_v55 = vadd.f32 %v3372_v30, %v3159_v54  ;;  %v3170_v1 = vadd.f32 %v3756_v28, %v5556_v18  ;;  %v3388_v43 = vrot.slane %v3276_v8, 1 }
 0x230   : > { %v3161_v63 = vpop.f32.mrf.mxu0 }
 0x231   : > { %3502 = vst [vmem:[%s5587_s15 + $0x40] sm:$0xff] %v3470_v55  ;;  %v3473_v12 = vadd.f32 %v3379_v13, %v3170_v1  ;;  %v3162_v42 = vadd.f32 %v5556_v18, %v3161_v63  ;;  %v3382_v13 = vsel %vm3349_vm6, %v3380_v41, %v3381_v16  ;;  %v3383_v55 = vrot.slane %v3273_v4, 1 }
 0x233   : > { %3505 = vst [vmem:[%s5587_s15 + $0x58] sm:$0xff] %v3473_v12  ;;  %v3471_v60 = vadd.f32 %v3374_v33, %v3162_v42  ;;  %v3389_v12 = vsel %vm3349_vm6, %v3386_v14, %v3388_v43  ;;  %v3384_v62 = vsel %vm3349_vm6, %v3381_v16, %v3383_v55 }
 0x235   : > { %3503 = vst [vmem:[%s5587_s15 + $0x48] sm:$0xff] %v3471_v60 }
 0x246   : > { %v3771_v29 = vpop.f32.mrf.mxu1 }
 0x247   : > { %v3231_v2 = vadd.f32 %v3771_v29, %v5556_v18  ;;  %v3300_v29 = vunpack.c.l.bf16 %v3911_v50 }
 0x248   : > { %v3222_v35 = vpop.f32.mrf.mxu1 }
 0x249   : > { %v3488_v23 = vadd.f32 %v3417_v37, %v3231_v2  ;;  %v3223_v59 = vadd.f32 %v5556_v18, %v3222_v35  ;;  %v3420_v37 = vrot.slane %v3295_v44, 1  ;;  %v3912_v2 = vld [vmem:[%s4118_s12 + $0xbc] sm:$0x1]  ;;  %s3704_s12 = sshll.u32 %s3981_s21, 12  ;;  %s5737_s21 = scalar_lea.sflag [#allocation3], %s239_s13 }
 0x24a   : > { %v3772_v51 = vpop.f32.mrf.mxu1  ;;  %v3297_v35 = vunpack.c.l.bf16 %v3912_v2  ;;  %s5729_s29 = scalar_lea.hbm %s5787_s5, %s3704_s12 }
 0x24b   : > { %3520 = vst [vmem:[%s5587_s15 + $0xd0] sm:$0xff] %v3488_v23  ;;  %v3486_v3 = vadd.f32 %v3412_v6, %v3223_v59  ;;  %v3234_v11 = vadd.f32 %v3772_v51, %v5556_v18  ;;  %v3428_v23 = vrot.slane %v3300_v29, 1 }
 0x24c   : > { %v3225_v52 = vpop.f32.mrf.mxu1 }
 0x24d   : > { %3518 = vst [vmem:[%s5587_s15 + $0xc0] sm:$0xff] %v3486_v3  ;;  %v3489_v10 = vadd.f32 %v3419_v46, %v3234_v11  ;;  %v3226_v32 = vadd.f32 %v5556_v18, %v3225_v52  ;;  %v3422_v46 = vsel %vm3349_vm6, %v3420_v37, %v3421_v36  ;;  %v3423_v3 = vrot.slane %v3297_v35, 1 }
 0x24f   : > { %3521 = vst [vmem:[%s5587_s15 + $0xd8] sm:$0xff] %v3489_v10  ;;  %v3487_v48 = vadd.f32 %v3414_v15, %v3226_v32  ;;  %v3429_v10 = vsel %vm3349_vm6, %v3426_v20, %v3428_v23  ;;  %v3424_v34 = vsel %vm3349_vm6, %v3421_v36, %v3423_v3 }
 0x251   : > { %3519 = vst [vmem:[%s5587_s15 + $0xc8] sm:$0xff] %v3487_v48 }
 0x29d   : > { %v3759_v30 = vpop.f32.mrf.mxu0 }
 0x29e   : > { %v3183_v54 = vadd.f32 %v3759_v30, %v5556_v18 }
 0x29f   : > { %v3174_v28 = vpop.f32.mrf.mxu0 }
 0x2a0   : > { %v3476_v1 = vadd.f32 %v3387_v25, %v3183_v54  ;;  %v3175_v63 = vadd.f32 %v5556_v18, %v3174_v28 }
 0x2a1   : > { %v3760_v33 = vpop.f32.mrf.mxu0 }
 0x2a2   : > { %3508 = vst [vmem:[%s5587_s15 + $0x70] sm:$0xff] %v3476_v1  ;;  %v3474_v42 = vadd.f32 %v3382_v13, %v3175_v63  ;;  %v3186_v60 = vadd.f32 %v3760_v33, %v5556_v18 }
 0x2a3   : > { %v3177_v49 = vpop.f32.mrf.mxu0 }
 0x2a4   : > { %3506 = vst [vmem:[%s5587_s15 + $0x60] sm:$0xff] %v3474_v42  ;;  %v3477_v45 = vadd.f32 %v3389_v12, %v3186_v60  ;;  %v3178_v24 = vadd.f32 %v5556_v18, %v3177_v49 }
 0x2a6   : > { %3509 = vst [vmem:[%s5587_s15 + $0x78] sm:$0xff] %v3477_v45  ;;  %v3475_v39 = vadd.f32 %v3384_v62, %v3178_v24 }
 0x2a8   : > { %3507 = vst [vmem:[%s5587_s15 + $0x68] sm:$0xff] %v3475_v39 }
 0x2b9   : > { %v3775_v6 = vpop.f32.mrf.mxu1 }
 0x2ba   : > { %v3247_v59 = vadd.f32 %v3775_v6, %v5556_v18 }
 0x2bb   : > { %v3238_v51 = vpop.f32.mrf.mxu1 }
 0x2bc   : > { %v3492_v11 = vadd.f32 %v3427_v40, %v3247_v59  ;;  %v3239_v52 = vadd.f32 %v5556_v18, %v3238_v51 }
 0x2bd   : > { %v3776_v15 = vpop.f32.mrf.mxu1 }
 0x2be   : > { %3524 = vst [vmem:[%s5587_s15 + $0xf0] sm:$0xff] %v3492_v11  ;;  %v3490_v32 = vadd.f32 %v3422_v46, %v3239_v52  ;;  %v3250_v48 = vadd.f32 %v3776_v15, %v5556_v18 }
 0x2bf   : > { %v3241_v38 = vpop.f32.mrf.mxu1 }
 0x2c0   : > { %3522 = vst [vmem:[%s5587_s15 + $0xe0] sm:$0xff] %v3490_v32  ;;  %v3493_v57 = vadd.f32 %v3429_v10, %v3250_v48  ;;  %v3242_v5 = vadd.f32 %v5556_v18, %v3241_v38 }
 0x2c2   : > { %3525 = vst [vmem:[%s5587_s15 + $0xf8] sm:$0xff] %v3493_v57  ;;  %v3491_v7 = vadd.f32 %v3424_v34, %v3242_v5 }
 0x2c4   : > { %3523 = vst [vmem:[%s5587_s15 + $0xe8] sm:$0xff] %v3491_v7 }
 0x2c5   : > { %3926 = shalt.err (!%p3923_p5)
}
 0x2c6   : > { %s3927_s11 = scalar_lea.hbm %s5729_s29, 4096  ;;  %s3931_s15 = scalar_lea.hbm %s5787_s5, 8192 }
 0x2c7   : > { %p3928_p6 = scmp.ne.s32.totalorder %s5729_s29, %s3927_s11  ;;  %p3932_p10 = scmp.lt.s32.totalorder %s5729_s29, %s5787_s5 }
 0x2c8   : > { %p3933_p11 = scmp.lt.s32.totalorder %s3931_s15, %s3927_s11 }
 0x2c9   : > { %p3929_p7 = pnand %p3928_p6, %p4064_p4 }
 0x2ca   : > { %p3934_p12 = por %p3933_p11, %p3932_p10 }
 0x2cb   : > { %p3930_p9 = pneg %p3929_p7 }
 0x2cd   : > { %p3935_p13 = pnand %p3934_p12, %p3930_p9 }
 0x2cf   : > { %3938 = shalt.err (!%p3935_p13)
}
 0x2d0   : > { %s3992_s12 = smov 128   ;;  %s3993_s25 = smov 8  }
 0x2d1   : > { %3794 = dma.vmem_to_hbm [thread:$0]  (%p4064_p4), %s5731_s24, 4096, %s5729_s29, %s5737_s21, %s3992_s12, %s3992_s12, %s3993_s25  }
 0x2d2 PF: > { %p3800_p0 = scmp.ge.s32.totalorder %s3989_s23, 2  ;;  %s3558_s27 = sand.u32 1, %s3969_s18  }
 0x2d3   : > { %s3559_s7 = scalar_lea.sflag [#allocation3], %s3558_s27 }
 0x2d4   : > { %p3797_p1 = pnand %p3800_p0, %p4071_p8 }
 0x2d6   : > { %p3798_p2 = pneg %p3797_p1 }
 0x2d8   : > { %3964 = dma.done.wait (%p3798_p2), %s3559_s7, 4096  }
 0x2d9   : > { %3966 = vsyncadd (%p3798_p2), %s3559_s7, 4294963200  ;;  %s18_s23 = sadd.s32 1, %s3989_s23   ;;  %s5794_s18 = smov %s3973_s19 }
 0x2da   : > { %p15_p3 = scmp.ge.s32.totalorder %s18_s23, 4   ;;  %s5795_s19 = smov %s3977_s20 }
 0x2db   : > { %s5796_s20 = smov %s4077_s6  ;;  %s5797_s21 = smov %s3985_s22 }
 0x2dc   : > { %s5798_s22 = smov %s5800_s26  ;;  %17 = sbr.rel (!%p15_p3) target bundleno = 4 (0x4), region = 75 }
 0x2e1   :  { %3564 = vsyncpa [#allocation3], 1 }
 0x2e2   :  { %3566 = vsyncpa [#allocation3 + $0x1], 1 }

</bundles_post_ra>
